<compile_context>
chip_gen: v6e
topology: v6e:2x2x1
jax: 0.10.0
libtpu: 0.0.40
codegen_flags: <defaults>
</compile_context>

<pallas_src>
import functools

import jax
import jax.numpy as jnp
from jax import lax
from jax.experimental import pallas as pl
from jax.experimental.pallas import tpu as pltpu

EPS = 1e-5
NEG_SLOPE = 0.01          # nn.LeakyReLU default negative_slope
LANE = 128
VMEM_LIMIT = 32 * 1024 * 1024


def _round_up(x, m):
    return ((x + m - 1) // m) * m


def _conv_stats_kernel(x_ref, w_ref, y_ref, sum_ref, sumsq_ref, *, H, W, KH, KW, Cin):
    """Pass 1: conv (tap-accumulated MXU matmuls) + per-image channel stats.

    x_ref:     (1, H+KH-1, W+KW-1, Cin)  bf16 (spatially padded image)
    w_ref:     (KH*KW, Cin, Cp)          bf16 (Cout zero-padded to Cp lanes)
    y_ref:     (1, H*W, Cp)              f32  conv output for this image
    sum_ref:   (1, 1, Cp)                f32  per-channel sum over H*W
    sumsq_ref: (1, 1, Cp)                f32  per-channel sum of squares
    """
    for kh in range(KH):
        for kw in range(KW):
            k = kh * KW + kw
            # Shifted window for this tap; static slice offsets.
            xt = x_ref[0, kh:kh + H, kw:kw + W, :].reshape(H * W, Cin)
            contrib = jnp.dot(xt, w_ref[k], preferred_element_type=jnp.float32)
            if k == 0:
                y_ref[0] = contrib          # accumulate directly in the VMEM out tile
            else:
                y_ref[0] += contrib
    y = y_ref[0]
    sum_ref[0] = jnp.sum(y, axis=0, keepdims=True)
    sumsq_ref[0] = jnp.sum(y * y, axis=0, keepdims=True)


def _bn_act_kernel(y_ref, scale_ref, shift_ref, out_ref):
    """Pass 2: y * scale + shift, then LeakyReLU (all f32, lane-dense tiles)."""
    z = y_ref[...] * scale_ref[...] + shift_ref[...]
    out_ref[...] = jnp.where(z >= 0, z, NEG_SLOPE * z)


def conv_bn_act(x_nchw, weight, gamma, beta):
    """x_nchw: (N, Cin, H, W); weight: (Cout, Cin, KH, KW) -> (N, Cout, H, W)."""
    N, Cin, H, W = x_nchw.shape
    Cout, _, KH, KW = weight.shape
    ph, pw = KH // 2, KW // 2
    Hp, Wp = H + KH - 1, W + KW - 1
    Cp = _round_up(Cout, LANE)      # lane-dense channel dim for y / output
    M = N * H * W

    # --- glue: NCHW -> NHWC, spatial pad, bf16 cast (no im2col slab in HBM) ---
    x_nhwc = jnp.transpose(x_nchw, (0, 2, 3, 1))
    x_pad = jnp.pad(x_nhwc, ((0, 0), (ph, ph), (pw, pw), (0, 0))).astype(jnp.bfloat16)

    # weight (Cout, Cin, KH, KW) -> (KH*KW, Cin, Cp), zero-padded channels.
    w_taps = jnp.transpose(weight, (2, 3, 1, 0)).reshape(KH * KW, Cin, Cout)
    w_taps = jnp.pad(w_taps, ((0, 0), (0, 0), (0, Cp - Cout))).astype(jnp.bfloat16)

    # --- pass 1: conv + per-image per-channel partial stats ---
    kernel1 = functools.partial(_conv_stats_kernel, H=H, W=W, KH=KH, KW=KW, Cin=Cin)
    y, psum, psumsq = pl.pallas_call(
        kernel1,
        out_shape=(
            jax.ShapeDtypeStruct((N, H * W, Cp), jnp.float32),
            jax.ShapeDtypeStruct((N, 1, Cp), jnp.float32),
            jax.ShapeDtypeStruct((N, 1, Cp), jnp.float32),
        ),
        grid=(N,),
        in_specs=[
            pl.BlockSpec((1, Hp, Wp, Cin), lambda n: (n, 0, 0, 0)),
            pl.BlockSpec((KH * KW, Cin, Cp), lambda n: (0, 0, 0)),
        ],
        out_specs=(
            pl.BlockSpec((1, H * W, Cp), lambda n: (n, 0, 0)),
            pl.BlockSpec((1, 1, Cp), lambda n: (n, 0, 0)),
            pl.BlockSpec((1, 1, Cp), lambda n: (n, 0, 0)),
        ),
        compiler_params=pltpu.CompilerParams(
            dimension_semantics=("parallel",),
            vmem_limit_bytes=VMEM_LIMIT,
        ),
    )(x_pad, w_taps)

    # --- glue: combine partial stats, fold BN + affine into scale/shift ---
    cnt = jnp.float32(M)
    tot = jnp.sum(psum, axis=0).reshape(Cp)
    totsq = jnp.sum(psumsq, axis=0).reshape(Cp)
    mean = tot / cnt
    var = jnp.maximum(totsq / cnt - mean * mean, 0.0)   # biased var (BN train mode)
    gamma_p = jnp.pad(gamma.astype(jnp.float32), (0, Cp - Cout))
    beta_p = jnp.pad(beta.astype(jnp.float32), (0, Cp - Cout))
    inv_std = lax.rsqrt(var + EPS)
    scale = (gamma_p * inv_std).reshape(1, Cp)
    shift = (beta_p - mean * gamma_p * inv_std).reshape(1, Cp)

    # --- pass 2: normalize + LeakyReLU over lane-dense (tm, Cp) row tiles ---
    y2d = y.reshape(M, Cp)
    tm = min(256, M)
    out2d = pl.pallas_call(
        _bn_act_kernel,
        out_shape=jax.ShapeDtypeStruct((M, Cp), jnp.float32),
        grid=(pl.cdiv(M, tm),),
        in_specs=[
            pl.BlockSpec((tm, Cp), lambda i: (i, 0)),
            pl.BlockSpec((1, Cp), lambda i: (0, 0)),
            pl.BlockSpec((1, Cp), lambda i: (0, 0)),
        ],
        out_specs=pl.BlockSpec((tm, Cp), lambda i: (i, 0)),
        compiler_params=pltpu.CompilerParams(
            dimension_semantics=("parallel",),
            vmem_limit_bytes=VMEM_LIMIT,
        ),
    )(y2d, scale, shift)

    # back to NCHW, drop the padded channels
    out_nhwc = out2d.reshape(N, H, W, Cp)[..., :Cout]
    return jnp.transpose(out_nhwc, (0, 3, 1, 2))


def reference(x_nchw, weight, gamma, beta):
    """Pure-JAX reference mirroring the PyTorch forward (training-mode BN).

    Inputs are rounded through bf16 exactly like the kernel's MXU inputs so the
    comparison isolates kernel correctness from the (requested) bf16 cast.
    """
    xr = x_nchw.astype(jnp.bfloat16).astype(jnp.float32)
    wr = weight.astype(jnp.bfloat16).astype(jnp.float32)
    y = lax.conv_general_dilated(
        xr, wr, window_strides=(1, 1), padding="SAME",
        dimension_numbers=("NCHW", "OIHW", "NCHW"))
    mean = jnp.mean(y, axis=(0, 2, 3), keepdims=True)
    var = jnp.mean((y - mean) ** 2, axis=(0, 2, 3), keepdims=True)
    z = (y - mean) * lax.rsqrt(var + EPS)
    z = z * gamma.reshape(1, -1, 1, 1) + beta.reshape(1, -1, 1, 1)
    return jnp.where(z >= 0, z, NEG_SLOPE * z)


if __name__ == "__main__":
    key = jax.random.PRNGKey(0)
    k_x, k_w = jax.random.split(key)

    N, Cin, Cout, H, W, K = 2, 4, 8, 16, 16, 3

    x = jax.random.normal(k_x, (N, Cin, H, W), dtype=jnp.float32)
    # Synthetic conv weight (matches nn.Conv2d(Cin, Cout, 3, bias=False) shape).
    weight = 0.1 * jax.random.normal(k_w, (Cout, Cin, K, K), dtype=jnp.float32)
    # BatchNorm2d affine params at their PyTorch init values.
    gamma = jnp.ones((Cout,), dtype=jnp.float32)
    beta = jnp.zeros((Cout,), dtype=jnp.float32)

    out = conv_bn_act(x, weight, gamma, beta)
    out = jax.block_until_ready(out)

    ref = reference(x, weight, gamma, beta)
    assert out.shape == (N, Cout, H, W)
    assert jnp.allclose(out, ref, atol=1e-3, rtol=1e-3), "mismatch vs reference"

    print("KERNEL_OK")
</pallas_src>

<mosaic_0001>
module attributes {stable_mosaic.version = 11 : i64} {
  func.func @_conv_stats_kernel(%arg0: i32, %arg1: memref<1x18x18x4xbf16, #tpu.memory_space<vmem>>, %arg2: memref<9x4x128xbf16, #tpu.memory_space<vmem>>, %arg3: memref<1x256x128xf32, #tpu.memory_space<vmem>>, %arg4: memref<1x1x128xf32, #tpu.memory_space<vmem>>, %arg5: memref<1x1x128xf32, #tpu.memory_space<vmem>>) attributes {dimension_semantics = [#tpu.dimension_semantics<parallel>], iteration_bounds = array<i64: 2>, scalar_prefetch = 0 : i64, scratch_operands = 0 : i64, tpu.core_type = #tpu.core_type<tc>, window_params = [{transform_indices = @transform_0, window_bounds = array<i64: 1, 18, 18, 4>}, {pipeline_mode = #tpu.pipeline_mode<synchronous>, transform_indices = @transform_1, window_bounds = array<i64: 9, 4, 128>}, {transform_indices = @transform_2, window_bounds = array<i64: 1, 256, 128>}, {transform_indices = @transform_3, window_bounds = array<i64: 1, 1, 128>}, {transform_indices = @transform_4, window_bounds = array<i64: 1, 1, 128>}]} {
    %c0 = arith.constant 0 : index
    %c0_0 = arith.constant 0 : index
    %c0_1 = arith.constant 0 : index
    %c0_2 = arith.constant 0 : index
    %0 = vector.load %arg1[%c0, %c0_0, %c0_1, %c0_2] : memref<1x18x18x4xbf16, #tpu.memory_space<vmem>>, vector<1x16x16x4xbf16>
    %1 = vector.shape_cast %0 : vector<1x16x16x4xbf16> to vector<16x16x4xbf16>
    %2 = vector.shape_cast %1 : vector<16x16x4xbf16> to vector<256x4xbf16>
    %c0_3 = arith.constant 0 : index
    %c0_4 = arith.constant 0 : index
    %c0_5 = arith.constant 0 : index
    %3 = vector.load %arg2[%c0_3, %c0_4, %c0_5] : memref<9x4x128xbf16, #tpu.memory_space<vmem>>, vector<1x4x128xbf16>
    %4 = vector.shape_cast %3 : vector<1x4x128xbf16> to vector<4x128xbf16>
    %cst = arith.constant dense<0.000000e+00> : vector<256x128xf32>
    %5 = tpu.matmul %2, %4, %cst {dimension_numbers = #tpu.dot_dimension_numbers<[1], [0], [0], [1], [0, 0, 1, 1], [], []>} : vector<256x4xbf16>, vector<4x128xbf16>, vector<256x128xf32> -> vector<256x128xf32>
    %c0_6 = arith.constant 0 : index
    %c0_7 = arith.constant 0 : index
    %c0_8 = arith.constant 0 : index
    %6 = vector.load %arg3[%c0_6, %c0_7, %c0_8] : memref<1x256x128xf32, #tpu.memory_space<vmem>>, vector<1x256x128xf32>
    %7 = vector.shape_cast %6 : vector<1x256x128xf32> to vector<256x128xf32>
    %8 = vector.shape_cast %5 : vector<256x128xf32> to vector<1x256x128xf32>
    tpu.vector_store %arg3[%c0_6, %c0_7, %c0_8], %8 {strides = array<i32>} : memref<1x256x128xf32, #tpu.memory_space<vmem>>, vector<1x256x128xf32>,
    %c0_9 = arith.constant 0 : index
    %c0_10 = arith.constant 0 : index
    %c1 = arith.constant 1 : index
    %c0_11 = arith.constant 0 : index
    %9 = vector.load %arg1[%c0_9, %c0_10, %c1, %c0_11] : memref<1x18x18x4xbf16, #tpu.memory_space<vmem>>, vector<1x16x16x4xbf16>
    %10 = vector.shape_cast %9 : vector<1x16x16x4xbf16> to vector<16x16x4xbf16>
    %11 = vector.shape_cast %10 : vector<16x16x4xbf16> to vector<256x4xbf16>
    %c1_12 = arith.constant 1 : index
    %c0_13 = arith.constant 0 : index
    %c0_14 = arith.constant 0 : index
    %12 = vector.load %arg2[%c1_12, %c0_13, %c0_14] : memref<9x4x128xbf16, #tpu.memory_space<vmem>>, vector<1x4x128xbf16>
    %13 = vector.shape_cast %12 : vector<1x4x128xbf16> to vector<4x128xbf16>
    %cst_15 = arith.constant dense<0.000000e+00> : vector<256x128xf32>
    %14 = tpu.matmul %11, %13, %cst_15 {dimension_numbers = #tpu.dot_dimension_numbers<[1], [0], [0], [1], [0, 0, 1, 1], [], []>} : vector<256x4xbf16>, vector<4x128xbf16>, vector<256x128xf32> -> vector<256x128xf32>
    %c0_16 = arith.constant 0 : index
    %c0_17 = arith.constant 0 : index
    %c0_18 = arith.constant 0 : index
    %15 = vector.load %arg3[%c0_16, %c0_17, %c0_18] : memref<1x256x128xf32, #tpu.memory_space<vmem>>, vector<1x256x128xf32>
    %16 = vector.shape_cast %15 : vector<1x256x128xf32> to vector<256x128xf32>
    %17 = arith.addf %16, %14 : vector<256x128xf32>
    %c0_19 = arith.constant 0 : index
    %c0_20 = arith.constant 0 : index
    %c0_21 = arith.constant 0 : index
    %18 = vector.load %arg3[%c0_19, %c0_20, %c0_21] : memref<1x256x128xf32, #tpu.memory_space<vmem>>, vector<1x256x128xf32>
    %19 = vector.shape_cast %18 : vector<1x256x128xf32> to vector<256x128xf32>
    %20 = vector.shape_cast %17 : vector<256x128xf32> to vector<1x256x128xf32>
    tpu.vector_store %arg3[%c0_19, %c0_20, %c0_21], %20 {strides = array<i32>} : memref<1x256x128xf32, #tpu.memory_space<vmem>>, vector<1x256x128xf32>,
    %c0_22 = arith.constant 0 : index
    %c0_23 = arith.constant 0 : index
    %c2 = arith.constant 2 : index
    %c0_24 = arith.constant 0 : index
    %21 = vector.load %arg1[%c0_22, %c0_23, %c2, %c0_24] : memref<1x18x18x4xbf16, #tpu.memory_space<vmem>>, vector<1x16x16x4xbf16>
    %22 = vector.shape_cast %21 : vector<1x16x16x4xbf16> to vector<16x16x4xbf16>
    %23 = vector.shape_cast %22 : vector<16x16x4xbf16> to vector<256x4xbf16>
    %c2_25 = arith.constant 2 : index
    %c0_26 = arith.constant 0 : index
    %c0_27 = arith.constant 0 : index
    %24 = vector.load %arg2[%c2_25, %c0_26, %c0_27] : memref<9x4x128xbf16, #tpu.memory_space<vmem>>, vector<1x4x128xbf16>
    %25 = vector.shape_cast %24 : vector<1x4x128xbf16> to vector<4x128xbf16>
    %cst_28 = arith.constant dense<0.000000e+00> : vector<256x128xf32>
    %26 = tpu.matmul %23, %25, %cst_28 {dimension_numbers = #tpu.dot_dimension_numbers<[1], [0], [0], [1], [0, 0, 1, 1], [], []>} : vector<256x4xbf16>, vector<4x128xbf16>, vector<256x128xf32> -> vector<256x128xf32>
    %c0_29 = arith.constant 0 : index
    %c0_30 = arith.constant 0 : index
    %c0_31 = arith.constant 0 : index
    %27 = vector.load %arg3[%c0_29, %c0_30, %c0_31] : memref<1x256x128xf32, #tpu.memory_space<vmem>>, vector<1x256x128xf32>
    %28 = vector.shape_cast %27 : vector<1x256x128xf32> to vector<256x128xf32>
    %29 = arith.addf %28, %26 : vector<256x128xf32>
    %c0_32 = arith.constant 0 : index
    %c0_33 = arith.constant 0 : index
    %c0_34 = arith.constant 0 : index
    %30 = vector.load %arg3[%c0_32, %c0_33, %c0_34] : memref<1x256x128xf32, #tpu.memory_space<vmem>>, vector<1x256x128xf32>
    %31 = vector.shape_cast %30 : vector<1x256x128xf32> to vector<256x128xf32>
    %32 = vector.shape_cast %29 : vector<256x128xf32> to vector<1x256x128xf32>
    tpu.vector_store %arg3[%c0_32, %c0_33, %c0_34], %32 {strides = array<i32>} : memref<1x256x128xf32, #tpu.memory_space<vmem>>, vector<1x256x128xf32>,
    %c0_35 = arith.constant 0 : index
    %c1_36 = arith.constant 1 : index
    %c0_37 = arith.constant 0 : index
    %c0_38 = arith.constant 0 : index
    %33 = vector.load %arg1[%c0_35, %c1_36, %c0_37, %c0_38] : memref<1x18x18x4xbf16, #tpu.memory_space<vmem>>, vector<1x16x16x4xbf16>
    %34 = vector.shape_cast %33 : vector<1x16x16x4xbf16> to vector<16x16x4xbf16>
    %35 = vector.shape_cast %34 : vector<16x16x4xbf16> to vector<256x4xbf16>
    %c3 = arith.constant 3 : index
    %c0_39 = arith.constant 0 : index
    %c0_40 = arith.constant 0 : index
    %36 = vector.load %arg2[%c3, %c0_39, %c0_40] : memref<9x4x128xbf16, #tpu.memory_space<vmem>>, vector<1x4x128xbf16>
    %37 = vector.shape_cast %36 : vector<1x4x128xbf16> to vector<4x128xbf16>
    %cst_41 = arith.constant dense<0.000000e+00> : vector<256x128xf32>
    %38 = tpu.matmul %35, %37, %cst_41 {dimension_numbers = #tpu.dot_dimension_numbers<[1], [0], [0], [1], [0, 0, 1, 1], [], []>} : vector<256x4xbf16>, vector<4x128xbf16>, vector<256x128xf32> -> vector<256x128xf32>
    %c0_42 = arith.constant 0 : index
    %c0_43 = arith.constant 0 : index
    %c0_44 = arith.constant 0 : index
    %39 = vector.load %arg3[%c0_42, %c0_43, %c0_44] : memref<1x256x128xf32, #tpu.memory_space<vmem>>, vector<1x256x128xf32>
    %40 = vector.shape_cast %39 : vector<1x256x128xf32> to vector<256x128xf32>
    %41 = arith.addf %40, %38 : vector<256x128xf32>
    %c0_45 = arith.constant 0 : index
    %c0_46 = arith.constant 0 : index
    %c0_47 = arith.constant 0 : index
    %42 = vector.load %arg3[%c0_45, %c0_46, %c0_47] : memref<1x256x128xf32, #tpu.memory_space<vmem>>, vector<1x256x128xf32>
    %43 = vector.shape_cast %42 : vector<1x256x128xf32> to vector<256x128xf32>
    %44 = vector.shape_cast %41 : vector<256x128xf32> to vector<1x256x128xf32>
    tpu.vector_store %arg3[%c0_45, %c0_46, %c0_47], %44 {strides = array<i32>} : memref<1x256x128xf32, #tpu.memory_space<vmem>>, vector<1x256x128xf32>,
    %c0_48 = arith.constant 0 : index
    %c1_49 = arith.constant 1 : index
    %c1_50 = arith.constant 1 : index
    %c0_51 = arith.constant 0 : index
    %45 = vector.load %arg1[%c0_48, %c1_49, %c1_50, %c0_51] : memref<1x18x18x4xbf16, #tpu.memory_space<vmem>>, vector<1x16x16x4xbf16>
    %46 = vector.shape_cast %45 : vector<1x16x16x4xbf16> to vector<16x16x4xbf16>
    %47 = vector.shape_cast %46 : vector<16x16x4xbf16> to vector<256x4xbf16>
    %c4 = arith.constant 4 : index
    %c0_52 = arith.constant 0 : index
    %c0_53 = arith.constant 0 : index
    %48 = vector.load %arg2[%c4, %c0_52, %c0_53] : memref<9x4x128xbf16, #tpu.memory_space<vmem>>, vector<1x4x128xbf16>
    %49 = vector.shape_cast %48 : vector<1x4x128xbf16> to vector<4x128xbf16>
    %cst_54 = arith.constant dense<0.000000e+00> : vector<256x128xf32>
    %50 = tpu.matmul %47, %49, %cst_54 {dimension_numbers = #tpu.dot_dimension_numbers<[1], [0], [0], [1], [0, 0, 1, 1], [], []>} : vector<256x4xbf16>, vector<4x128xbf16>, vector<256x128xf32> -> vector<256x128xf32>
    %c0_55 = arith.constant 0 : index
    %c0_56 = arith.constant 0 : index
    %c0_57 = arith.constant 0 : index
    %51 = vector.load %arg3[%c0_55, %c0_56, %c0_57] : memref<1x256x128xf32, #tpu.memory_space<vmem>>, vector<1x256x128xf32>
    %52 = vector.shape_cast %51 : vector<1x256x128xf32> to vector<256x128xf32>
    %53 = arith.addf %52, %50 : vector<256x128xf32>
    %c0_58 = arith.constant 0 : index
    %c0_59 = arith.constant 0 : index
    %c0_60 = arith.constant 0 : index
    %54 = vector.load %arg3[%c0_58, %c0_59, %c0_60] : memref<1x256x128xf32, #tpu.memory_space<vmem>>, vector<1x256x128xf32>
    %55 = vector.shape_cast %54 : vector<1x256x128xf32> to vector<256x128xf32>
    %56 = vector.shape_cast %53 : vector<256x128xf32> to vector<1x256x128xf32>
    tpu.vector_store %arg3[%c0_58, %c0_59, %c0_60], %56 {strides = array<i32>} : memref<1x256x128xf32, #tpu.memory_space<vmem>>, vector<1x256x128xf32>,
    %c0_61 = arith.constant 0 : index
    %c1_62 = arith.constant 1 : index
    %c2_63 = arith.constant 2 : index
    %c0_64 = arith.constant 0 : index
    %57 = vector.load %arg1[%c0_61, %c1_62, %c2_63, %c0_64] : memref<1x18x18x4xbf16, #tpu.memory_space<vmem>>, vector<1x16x16x4xbf16>
    %58 = vector.shape_cast %57 : vector<1x16x16x4xbf16> to vector<16x16x4xbf16>
    %59 = vector.shape_cast %58 : vector<16x16x4xbf16> to vector<256x4xbf16>
    %c5 = arith.constant 5 : index
    %c0_65 = arith.constant 0 : index
    %c0_66 = arith.constant 0 : index
    %60 = vector.load %arg2[%c5, %c0_65, %c0_66] : memref<9x4x128xbf16, #tpu.memory_space<vmem>>, vector<1x4x128xbf16>
    %61 = vector.shape_cast %60 : vector<1x4x128xbf16> to vector<4x128xbf16>
    %cst_67 = arith.constant dense<0.000000e+00> : vector<256x128xf32>
    %62 = tpu.matmul %59, %61, %cst_67 {dimension_numbers = #tpu.dot_dimension_numbers<[1], [0], [0], [1], [0, 0, 1, 1], [], []>} : vector<256x4xbf16>, vector<4x128xbf16>, vector<256x128xf32> -> vector<256x128xf32>
    %c0_68 = arith.constant 0 : index
    %c0_69 = arith.constant 0 : index
    %c0_70 = arith.constant 0 : index
    %63 = vector.load %arg3[%c0_68, %c0_69, %c0_70] : memref<1x256x128xf32, #tpu.memory_space<vmem>>, vector<1x256x128xf32>
    %64 = vector.shape_cast %63 : vector<1x256x128xf32> to vector<256x128xf32>
    %65 = arith.addf %64, %62 : vector<256x128xf32>
    %c0_71 = arith.constant 0 : index
    %c0_72 = arith.constant 0 : index
    %c0_73 = arith.constant 0 : index
    %66 = vector.load %arg3[%c0_71, %c0_72, %c0_73] : memref<1x256x128xf32, #tpu.memory_space<vmem>>, vector<1x256x128xf32>
    %67 = vector.shape_cast %66 : vector<1x256x128xf32> to vector<256x128xf32>
    %68 = vector.shape_cast %65 : vector<256x128xf32> to vector<1x256x128xf32>
    tpu.vector_store %arg3[%c0_71, %c0_72, %c0_73], %68 {strides = array<i32>} : memref<1x256x128xf32, #tpu.memory_space<vmem>>, vector<1x256x128xf32>,
    %c0_74 = arith.constant 0 : index
    %c2_75 = arith.constant 2 : index
    %c0_76 = arith.constant 0 : index
    %c0_77 = arith.constant 0 : index
    %69 = vector.load %arg1[%c0_74, %c2_75, %c0_76, %c0_77] : memref<1x18x18x4xbf16, #tpu.memory_space<vmem>>, vector<1x16x16x4xbf16>
    %70 = vector.shape_cast %69 : vector<1x16x16x4xbf16> to vector<16x16x4xbf16>
    %71 = vector.shape_cast %70 : vector<16x16x4xbf16> to vector<256x4xbf16>
    %c6 = arith.constant 6 : index
    %c0_78 = arith.constant 0 : index
    %c0_79 = arith.constant 0 : index
    %72 = vector.load %arg2[%c6, %c0_78, %c0_79] : memref<9x4x128xbf16, #tpu.memory_space<vmem>>, vector<1x4x128xbf16>
    %73 = vector.shape_cast %72 : vector<1x4x128xbf16> to vector<4x128xbf16>
    %cst_80 = arith.constant dense<0.000000e+00> : vector<256x128xf32>
    %74 = tpu.matmul %71, %73, %cst_80 {dimension_numbers = #tpu.dot_dimension_numbers<[1], [0], [0], [1], [0, 0, 1, 1], [], []>} : vector<256x4xbf16>, vector<4x128xbf16>, vector<256x128xf32> -> vector<256x128xf32>
    %c0_81 = arith.constant 0 : index
    %c0_82 = arith.constant 0 : index
    %c0_83 = arith.constant 0 : index
    %75 = vector.load %arg3[%c0_81, %c0_82, %c0_83] : memref<1x256x128xf32, #tpu.memory_space<vmem>>, vector<1x256x128xf32>
    %76 = vector.shape_cast %75 : vector<1x256x128xf32> to vector<256x128xf32>
    %77 = arith.addf %76, %74 : vector<256x128xf32>
    %c0_84 = arith.constant 0 : index
    %c0_85 = arith.constant 0 : index
    %c0_86 = arith.constant 0 : index
    %78 = vector.load %arg3[%c0_84, %c0_85, %c0_86] : memref<1x256x128xf32, #tpu.memory_space<vmem>>, vector<1x256x128xf32>
    %79 = vector.shape_cast %78 : vector<1x256x128xf32> to vector<256x128xf32>
    %80 = vector.shape_cast %77 : vector<256x128xf32> to vector<1x256x128xf32>
    tpu.vector_store %arg3[%c0_84, %c0_85, %c0_86], %80 {strides = array<i32>} : memref<1x256x128xf32, #tpu.memory_space<vmem>>, vector<1x256x128xf32>,
    %c0_87 = arith.constant 0 : index
    %c2_88 = arith.constant 2 : index
    %c1_89 = arith.constant 1 : index
    %c0_90 = arith.constant 0 : index
    %81 = vector.load %arg1[%c0_87, %c2_88, %c1_89, %c0_90] : memref<1x18x18x4xbf16, #tpu.memory_space<vmem>>, vector<1x16x16x4xbf16>
    %82 = vector.shape_cast %81 : vector<1x16x16x4xbf16> to vector<16x16x4xbf16>
    %83 = vector.shape_cast %82 : vector<16x16x4xbf16> to vector<256x4xbf16>
    %c7 = arith.constant 7 : index
    %c0_91 = arith.constant 0 : index
    %c0_92 = arith.constant 0 : index
    %84 = vector.load %arg2[%c7, %c0_91, %c0_92] : memref<9x4x128xbf16, #tpu.memory_space<vmem>>, vector<1x4x128xbf16>
    %85 = vector.shape_cast %84 : vector<1x4x128xbf16> to vector<4x128xbf16>
    %cst_93 = arith.constant dense<0.000000e+00> : vector<256x128xf32>
    %86 = tpu.matmul %83, %85, %cst_93 {dimension_numbers = #tpu.dot_dimension_numbers<[1], [0], [0], [1], [0, 0, 1, 1], [], []>} : vector<256x4xbf16>, vector<4x128xbf16>, vector<256x128xf32> -> vector<256x128xf32>
    %c0_94 = arith.constant 0 : index
    %c0_95 = arith.constant 0 : index
    %c0_96 = arith.constant 0 : index
    %87 = vector.load %arg3[%c0_94, %c0_95, %c0_96] : memref<1x256x128xf32, #tpu.memory_space<vmem>>, vector<1x256x128xf32>
    %88 = vector.shape_cast %87 : vector<1x256x128xf32> to vector<256x128xf32>
    %89 = arith.addf %88, %86 : vector<256x128xf32>
    %c0_97 = arith.constant 0 : index
    %c0_98 = arith.constant 0 : index
    %c0_99 = arith.constant 0 : index
    %90 = vector.load %arg3[%c0_97, %c0_98, %c0_99] : memref<1x256x128xf32, #tpu.memory_space<vmem>>, vector<1x256x128xf32>
    %91 = vector.shape_cast %90 : vector<1x256x128xf32> to vector<256x128xf32>
    %92 = vector.shape_cast %89 : vector<256x128xf32> to vector<1x256x128xf32>
    tpu.vector_store %arg3[%c0_97, %c0_98, %c0_99], %92 {strides = array<i32>} : memref<1x256x128xf32, #tpu.memory_space<vmem>>, vector<1x256x128xf32>,
    %c0_100 = arith.constant 0 : index
    %c2_101 = arith.constant 2 : index
    %c2_102 = arith.constant 2 : index
    %c0_103 = arith.constant 0 : index
    %93 = vector.load %arg1[%c0_100, %c2_101, %c2_102, %c0_103] : memref<1x18x18x4xbf16, #tpu.memory_space<vmem>>, vector<1x16x16x4xbf16>
    %94 = vector.shape_cast %93 : vector<1x16x16x4xbf16> to vector<16x16x4xbf16>
    %95 = vector.shape_cast %94 : vector<16x16x4xbf16> to vector<256x4xbf16>
    %c8 = arith.constant 8 : index
    %c0_104 = arith.constant 0 : index
    %c0_105 = arith.constant 0 : index
    %96 = vector.load %arg2[%c8, %c0_104, %c0_105] : memref<9x4x128xbf16, #tpu.memory_space<vmem>>, vector<1x4x128xbf16>
    %97 = vector.shape_cast %96 : vector<1x4x128xbf16> to vector<4x128xbf16>
    %cst_106 = arith.constant dense<0.000000e+00> : vector<256x128xf32>
    %98 = tpu.matmul %95, %97, %cst_106 {dimension_numbers = #tpu.dot_dimension_numbers<[1], [0], [0], [1], [0, 0, 1, 1], [], []>} : vector<256x4xbf16>, vector<4x128xbf16>, vector<256x128xf32> -> vector<256x128xf32>
    %c0_107 = arith.constant 0 : index
    %c0_108 = arith.constant 0 : index
    %c0_109 = arith.constant 0 : index
    %99 = vector.load %arg3[%c0_107, %c0_108, %c0_109] : memref<1x256x128xf32, #tpu.memory_space<vmem>>, vector<1x256x128xf32>
    %100 = vector.shape_cast %99 : vector<1x256x128xf32> to vector<256x128xf32>
    %101 = arith.addf %100, %98 : vector<256x128xf32>
    %c0_110 = arith.constant 0 : index
    %c0_111 = arith.constant 0 : index
    %c0_112 = arith.constant 0 : index
    %102 = vector.load %arg3[%c0_110, %c0_111, %c0_112] : memref<1x256x128xf32, #tpu.memory_space<vmem>>, vector<1x256x128xf32>
    %103 = vector.shape_cast %102 : vector<1x256x128xf32> to vector<256x128xf32>
    %104 = vector.shape_cast %101 : vector<256x128xf32> to vector<1x256x128xf32>
    tpu.vector_store %arg3[%c0_110, %c0_111, %c0_112], %104 {strides = array<i32>} : memref<1x256x128xf32, #tpu.memory_space<vmem>>, vector<1x256x128xf32>,
    %c0_113 = arith.constant 0 : index
    %c0_114 = arith.constant 0 : index
    %c0_115 = arith.constant 0 : index
    %105 = vector.load %arg3[%c0_113, %c0_114, %c0_115] : memref<1x256x128xf32, #tpu.memory_space<vmem>>, vector<1x256x128xf32>
    %106 = vector.shape_cast %105 : vector<1x256x128xf32> to vector<256x128xf32>
    %cst_116 = arith.constant dense<0.000000e+00> : vector<128xf32>
    %107 = vector.multi_reduction <add>, %106, %cst_116 [0] : vector<256x128xf32> to vector<128xf32>
    %108 = vector.shape_cast %107 : vector<128xf32> to vector<1x128xf32>
    %c0_117 = arith.constant 0 : index
    %c0_118 = arith.constant 0 : index
    %c0_119 = arith.constant 0 : index
    %109 = vector.load %arg4[%c0_117, %c0_118, %c0_119] : memref<1x1x128xf32, #tpu.memory_space<vmem>>, vector<1x1x128xf32>
    %110 = vector.shape_cast %109 : vector<1x1x128xf32> to vector<1x128xf32>
    %111 = vector.shape_cast %108 : vector<1x128xf32> to vector<1x1x128xf32>
    tpu.vector_store %arg4[%c0_117, %c0_118, %c0_119], %111 {strides = array<i32>} : memref<1x1x128xf32, #tpu.memory_space<vmem>>, vector<1x1x128xf32>,
    %112 = arith.mulf %106, %106 : vector<256x128xf32>
    %cst_120 = arith.constant dense<0.000000e+00> : vector<128xf32>
    %113 = vector.multi_reduction <add>, %112, %cst_120 [0] : vector<256x128xf32> to vector<128xf32>
    %114 = vector.shape_cast %113 : vector<128xf32> to vector<1x128xf32>
    %c0_121 = arith.constant 0 : index
    %c0_122 = arith.constant 0 : index
    %c0_123 = arith.constant 0 : index
    %115 = vector.load %arg5[%c0_121, %c0_122, %c0_123] : memref<1x1x128xf32, #tpu.memory_space<vmem>>, vector<1x1x128xf32>
    %116 = vector.shape_cast %115 : vector<1x1x128xf32> to vector<1x128xf32>
    %117 = vector.shape_cast %114 : vector<1x128xf32> to vector<1x1x128xf32>
    tpu.vector_store %arg5[%c0_121, %c0_122, %c0_123], %117 {strides = array<i32>} : memref<1x1x128xf32, #tpu.memory_space<vmem>>, vector<1x1x128xf32>,
    return
  }
  func.func @transform_0(%arg0: i32) -> (i32, i32, i32, i32) {
    %c0_i32 = arith.constant 0 : i32
    %c0_i32_0 = arith.constant 0 : i32
    %c0_i32_1 = arith.constant 0 : i32
    %c0_i32_2 = arith.constant 0 : i32
    return %arg0, %c0_i32, %c0_i32_0, %c0_i32_1 : i32, i32, i32, i32
  }
  func.func @transform_1(%arg0: i32) -> (i32, i32, i32) {
    %c0_i32 = arith.constant 0 : i32
    %c0_i32_0 = arith.constant 0 : i32
    %c0_i32_1 = arith.constant 0 : i32
    %c0_i32_2 = arith.constant 0 : i32
    return %c0_i32, %c0_i32_0, %c0_i32_1 : i32, i32, i32
  }
  func.func @transform_2(%arg0: i32) -> (i32, i32, i32) {
    %c0_i32 = arith.constant 0 : i32
    %c0_i32_0 = arith.constant 0 : i32
    %c0_i32_1 = arith.constant 0 : i32
    return %arg0, %c0_i32, %c0_i32_0 : i32, i32, i32
  }
  func.func @transform_3(%arg0: i32) -> (i32, i32, i32) {
    %c0_i32 = arith.constant 0 : i32
    %c0_i32_0 = arith.constant 0 : i32
    %c0_i32_1 = arith.constant 0 : i32
    return %arg0, %c0_i32, %c0_i32_0 : i32, i32, i32
  }
  func.func @transform_4(%arg0: i32) -> (i32, i32, i32) {
    %c0_i32 = arith.constant 0 : i32
    %c0_i32_0 = arith.constant 0 : i32
    %c0_i32_1 = arith.constant 0 : i32
    return %arg0, %c0_i32, %c0_i32_0 : i32, i32, i32
  }
}

</mosaic_0001>

<bundles_post_ra>
// kernel: tpu_custom_call.1
= control target key start
LH: loop header
LB: loop body
LE: loop exit
PB: predicated region body
PF: predicated region fallthrough
CT: control target
= control target key end

     0   :  { %10 = vsyncpa [#allocation3], 0  ;;  %s8937_s0 = inlined_call_operand.vmem [shape: bf16[2,18,18,4], index: 0, kind: input, shape index: {}]   ;;  %s8938_s1 = inlined_call_operand.vmem [shape: bf16[9,4,128], index: 1, kind: input, shape index: {}]   ;;  %s8939_s2 = inlined_call_operand.hbm [shape: f32[2,256,128], index: 2, kind: output, shape index: {0}]   ;;  %s8940_s3 = inlined_call_operand.hbm [shape: f32[2,1,128], index: 3, kind: output, shape index: {1}]   ;;  %s8941_s4 = inlined_call_operand.hbm [shape: f32[2,1,128], index: 4, kind: output, shape index: {2}]  }
   0x1   :  { %12 = vsyncpa [#allocation3 + $0x1], 0 }
   0x2   :  { %13 = vsyncpa [#allocation5], 0 }
   0x3   :  { %15 = vsyncpa [#allocation5 + $0x1], 0  ;;  %s7128_s15 = smov 0   ;;  %s7130_s16 = smov 0  }
   0x4   :  { %s7132_s17 = smov 0   ;;  %s7134_s18 = smov 0  }
   0x5 LB: > { %s7149_s19 = sadd.s32 4294967295, %s7096_s18   ;;  %s5795_s20 = sadd.s32 4294967294, %s7096_s18   ;;  %s7096_s18 = sphi %s7134_s18, %s9028_s18   ;;  %s7092_s17 = sphi %s7132_s17, %s9027_s17   ;;  %s7088_s16 = sphi %s7130_s16, %s9026_s16   ;;  %s7084_s15 = sphi %s7128_s15, %s9025_s15  }
   0x6   : > { %s7153_s21 = sadd.s32 1, %s7096_s18   ;;  %s75_s22 = sadd.s32 1, %s7092_s17 }
   0x7   : > { %s72_s23 = ssub.s32 %s7096_s18, %s7153_s21  ;;  %p85_p0 = scmp.ne.s32.totalorder %s7092_s17, %s7088_s16 }
   0x8   : > { %p73_p1 = scmp.eq.s32.totalorder %s72_s23, 0  ;;  %p86_p2 = scmp.eq.s32.totalorder %s7149_s19, 1 }
   0x9   : > { %p91_p3 = scmp.ne.s32.totalorder %s7088_s16, %s7084_s15  ;;  %p92_p4 = scmp.eq.s32.totalorder %s5795_s20, 1 }
   0xa   : > { %s7166_s24 = scalar_select %p73_p1, %s7092_s17, %s75_s22  }
   0xb   : > { %p7168_p5 = por %p86_p2, %p85_p0  ;;  %p7172_p6 = por %p92_p4, %p91_p3 }
   0xc   : > { %p5798_p7 = scmp.ge.s32.totalorder %s7096_s18, 1  ;;  %p173_p8 = scmp.lt.s32.totalorder %s7096_s18, 3 }
   0xe   : > { %p174_p9 = pnand %p5798_p7, %p173_p8 }
  0x10   : > { %177 = sbr.rel (%p174_p9) target bundleno = 614 (0x266), region = 28 }
  0x15   : > { %v245_v0 = vld [vmem:[%s8938_s1] sm:$0x3]  ;;  %vm375_vm0 = vcmask 1041408   ;;  %p207_p10 = scmp.lt.s32.totalorder %s7149_s19, 1  ;;  %v5833_v2 = vld [vmem:[%s8938_s1 + $0x2] sm:$0x3] }
  0x16   : > { %6871 = vmatprep.subr.msk.bf16.mxu1 %vm375_vm0, %v245_v0  ;;  %v377_v1 = vsel %vm375_vm0, %v245_v0, 0  ;;  %6870 = vmatprep.subr.msk.bf16.mxu0 %vm375_vm0, %v245_v0  ;;  %v5882_v3 = vld [vmem:[%s8938_s1 + $0x4] sm:$0x3]  ;;  %vm326_vm1 = vcmask 31744   ;;  %v5947_v5 = vld [vmem:[%s8938_s1 + $0x6] sm:$0x3] }
  0x17   : > { %6869 = vmatpush3.bf16.msra.mxu1 %v377_v1  ;;  %s208_s7 = scalar_select %p207_p10, %s7149_s19, 1  ;;  %6563 = vmatpush3.bf16.msra.mxu0 %v377_v1  ;;  %v1106_v7 = vsel %vm375_vm0, %v5833_v2, 0  ;;  %v6028_v9 = vld [vmem:[%s8938_s1 + $0x8] sm:$0x3]  ;;  %v1675_v11 = vsel %vm375_vm0, %v5882_v3, 0  ;;  %vm1461_vm2 = vcmask 1042432  }
  0x18   : > { %6872 = vmatprep.subr.msk.bf16.mxu1 %vm375_vm0, %v5833_v2  ;;  %6873 = vmatprep.subr.msk.bf16.mxu0 %vm375_vm0, %v5882_v3  ;;  %vm620_vm3 = vsmask.f32 3328  ;;  %vm621_vm4 = vsmask.f32 7440  ;;  %v7230_v18 = vld [vmem:[%s8938_s1 + $0xa] sm:$0x3] }
  0x19   : > { %s6880_s8 = smul.u32 216, %s208_s7  ;;  %v7234_v19 = vsel %vm375_vm0, %v5947_v5, 0  ;;  %vm1462_vm5 = vcmask 1046532   ;;  %v7239_v21 = vsel %vm375_vm0, %v6028_v9, 0  ;;  %v7245_v24 = vsel %vm375_vm0, %v7230_v18, 0  ;;  %vm7270_vm7 = vmor %vm620_vm3, %vm621_vm4  ;;  %s7098_s28 = smov [#allocation2]  }
  0x1a   : > { %vm7263_vm6 = vmor %vm1461_vm2, %vm1462_vm5  ;;  %s6984_s29 = sshll.u32 %s7098_s28, 4  ;;  %s6985_s29 = int_to_ptr.vmem [resolvable:$false] %s6984_s29 }
  0x1b   : > { %s7197_s11 = scalar_lea.vmem %s8937_s0, %s6880_s8  ;;  %s7743_s8 = sand.u32 1, %s7088_s16  }
  0x1c   : > { %v6932_v4 = vld [vmem:[%s7197_s11 + $0x60] sm:$0xff]   ;;  %v6933_v6 = vld [vmem:[%s7197_s11 + $0x6c] sm:$0xff]   ;;  %v6936_v12 = vld [vmem:[%s7197_s11 + $0x78] sm:$0xff]   ;;  %s5799_s9 = sshll.u32 %s7743_s8, 8  ;;  %s5633_s23 = scalar_lea.sflag [#allocation3], %s7743_s8 }
  0x1d   : > { %6580 = vmatprep.mubr.msk.bf16.mxu1 %vm326_vm1, %v6932_v4  ;;  %v6934_v8 = vld [vmem:[%s7197_s11] sm:$0xff]   ;;  %v6935_v10 = vld [vmem:[%s7197_s11 + $0xc] sm:$0xff]   ;;  %v6938_v13 = vld [vmem:[%s7197_s11 + $0x18] sm:$0xff]   ;;  %s7816_s10 = scalar_lea.vmem [#allocation2], %s5799_s9  ;;  %s6986_s30 = scalar_lea.vmem %s6985_s29, 8192 }
  0x1e   : > { %6581 = vmatmul.mubr.msk.bf16.vlgmr.msra.gmra.mxu1 %vm326_vm1, %v6933_v6  ;;  %6564 = vmatprep.mubr.msk.bf16.mxu0 %vm326_vm1, %v6934_v8  ;;  %v6937_v14 = vld [vmem:[%s7197_s11 + $0x84] sm:$0xff]   ;;  %v6940_v15 = vld [vmem:[%s7197_s11 + $0x90] sm:$0xff]   ;;  %v6941_v20 = vld [vmem:[%s7197_s11 + $0x9c] sm:$0xff]   ;;  %s5654_s12 = sshll.u32 %s7816_s10, 4  ;;  %s8825_s12 = int_to_ptr.vmem [resolvable:$true] %s5654_s12 }
  0x1f   : > { %6597 = vmatpush3.bf16.msra.mxu1 %v1106_v7  ;;  %6565 = vmatmul.mubr.msk.bf16.vlgmr.msra.gmra.mxu0 %vm326_vm1, %v6935_v10  ;;  %v6939_v16 = vld [vmem:[%s7197_s11 + $0x24] sm:$0xff]   ;;  %v6942_v17 = vld [vmem:[%s7197_s11 + $0x30] sm:$0xff]   ;;  %v6943_v22 = vld [vmem:[%s7197_s11 + $0x3c] sm:$0xff]   ;;  %s6980_s27 = scalar_lea.vmem %s8825_s12, 4096  ;;  %p6987_p0 = scmp.lt.s32.totalorder %s8825_s12, %s6985_s29 }
  0x20   : > { %6874 = vmatprep.subr.msk.bf16.mxu1 %vm375_vm0, %v5947_v5  ;;  %6584 = vmatprep.mubr.msk.bf16.mxu1 %vm326_vm1, %v6936_v12  ;;  %v6944_v23 = vld [vmem:[%s7197_s11 + $0xa8] sm:$0xff]   ;;  %v572_v26 = vld [vmem:[%s7197_s11] sm:$0xf]  ;;  %v573_v27 = vld [vmem:[%s7197_s11 + $0x4] sm:$0xf]  ;;  %p6981_p11 = scmp.ne.s32.totalorder %s8825_s12, %s6980_s27  ;;  %p6988_p1 = scmp.lt.s32.totalorder %s6986_s30, %s6980_s27 }
  0x21   : > { %6631 = vmatpush3.bf16.msra.mxu0 %v1675_v11  ;;  %6568 = vmatprep.mubr.msk.bf16.mxu0 %vm326_vm1, %v6938_v13  ;;  %v6946_v25 = vld [vmem:[%s7197_s11 + $0x48] sm:$0xff]   ;;  %v624_v29 = vshrl.u32 %v572_v26, 16  ;;  %v627_v30 = vshll.u32 %v572_v26, 16  ;;  %v633_v31 = vshll.u32 %v573_v27, 16  ;;  %v637_v32 = vshrl.u32 %v573_v27, 16  ;;  %v6945_v48 = vld [vmem:[%s7197_s11 + $0xb4] sm:$0xff]  }
  0x22   : > { %6875 = vmatprep.subr.msk.bf16.mxu0 %vm375_vm0, %v6028_v9  ;;  %v574_v28 = vld [vmem:[%s7197_s11 + $0x8] sm:$0x1]  ;;  %v575_v33 = vld [vmem:[%s7197_s11 + $0xc] sm:$0xf]  ;;  %v576_v35 = vld [vmem:[%s7197_s11 + $0x10] sm:$0xf]  ;;  %p6982_p12 = pnand %p6981_p11, %p7168_p5  ;;  %p6989_p2 = por %p6988_p1, %p6987_p0 }
  0x23   : > { %v643_v34 = vshll.u32 %v574_v28, 16  ;;  %v577_v36 = vld [vmem:[%s7197_s11 + $0x14] sm:$0x1]  ;;  %v648_v37 = vshrl.u32 %v575_v33, 16  ;;  %v626_v38 = vrot.slane %v624_v29, 4  ;;  %v629_v39 = vrot.slane %v627_v30, 5 }
  0x24   : > { %v635_v40 = vrot.slane %v633_v31, 5  ;;  %v639_v41 = vrot.slane %v637_v32, 4  ;;  %v1365_v42 = vld [vmem:[%s7197_s11] sm:$0xe]  ;;  %v651_v45 = vshll.u32 %v575_v33, 16  ;;  %v657_v46 = vshll.u32 %v576_v35, 16  ;;  %p6983_p13 = pneg %p6982_p12 }
  0x25   : > { %v645_v43 = vrot.slane %v643_v34, 5  ;;  %v650_v44 = vrot.slane %v648_v37, 4  ;;  %v1366_v47 = vld [vmem:[%s7197_s11 + $0x4] sm:$0xf]  ;;  %v630_v49 = vor.u32 %v629_v39, %v626_v38  ;;  %v661_v51 = vshrl.u32 %v576_v35, 16  ;;  %v6947_v8 = vld [vmem:[%s7197_s11 + $0x54] sm:$0xff]  }
  0x26   : > { %6585 = vmatmul.mubr.msk.bf16.gmra.mxu1 %vm326_vm1, %v6937_v14  ;;  %v640_v50 = vor.u32 %v639_v41, %v635_v40  ;;  %v667_v52 = vshll.u32 %v577_v36, 16  ;;  %v1367_v53 = vld [vmem:[%s7197_s11 + $0x8] sm:$0x1]  ;;  %v653_v56 = vrot.slane %v651_v45, 5  ;;  %v659_v57 = vrot.slane %v657_v46, 5  ;;  %p6990_p3 = pnand %p6989_p2, %p6983_p13 }
  0x27   : > { %6588 = vmatprep.mubr.msk.bf16.mxu1 %vm326_vm1, %v6940_v15  ;;  %6569 = vmatmul.mubr.msk.bf16.gmra.mxu0 %vm326_vm1, %v6939_v16  ;;  %v5866_v58 = vrot.slane %v1365_v42, 9  ;;  %v1466_v59 = vrot.slane %v1366_v47, 5  ;;  %v1368_v60 = vld [vmem:[%s7197_s11 + $0xc] sm:$0xe]  ;;  %v631_v61 = vrot.slane %v630_v49, 4  ;;  %v663_v63 = vrot.slane %v661_v51, 4 }
  0x28   : > { %6572 = vmatprep.mubr.msk.bf16.mxu0 %vm326_vm1, %v6942_v17  ;;  %v641_v62 = vrot.slane %v640_v50, 4  ;;  %v669_v0 = vrot.slane %v667_v52, 5  ;;  %v1369_v1 = vld [vmem:[%s7197_s11 + $0x10] sm:$0xf]  ;;  %v654_v2 = vor.u32 %v653_v56, %v650_v44  ;;  %v1469_v5 = vrot.slane %v1367_v53, 5 }
  0x29   : > { %v1467_v3 = vsel %vm7263_vm6, %v5866_v58, %v1466_v59  ;;  %v1468_v4 = vrot.slane %v1466_v59, 4  ;;  %v1370_v6 = vld [vmem:[%s7197_s11 + $0x14] sm:$0x1]  ;;  %v578_v7 = vld [vmem:[%s7197_s11 + $0x18] sm:$0xf]  ;;  %v636_v9 = vsel %vm7270_vm7, %v631_v61, %v635_v40  ;;  %v664_v11 = vor.u32 %v663_v63, %v659_v57 }
  0x2a   : > { %v646_v10 = vsel %vm7270_vm7, %v641_v62, %v645_v43  ;;  %v5867_v12 = vrot.slane %v1368_v60, 9  ;;  %v655_v14 = vrot.slane %v654_v2, 4  ;;  %v1473_v16 = vrot.slane %v1369_v1, 5  ;;  %v579_v17 = vld [vmem:[%s7197_s11 + $0x1c] sm:$0xf] }
  0x2b   : > { %v5834_v13 = vcombine.low %v636_v9, %v646_v10  ;;  %v1470_v15 = vsel %vm7263_vm6, %v1468_v4, %v1469_v5  ;;  %v672_v26 = vshrl.u32 %v578_v7, 16  ;;  %v675_v30 = vshll.u32 %v578_v7, 16  ;;  %v581_v31 = vld [vmem:[%s7197_s11 + $0x24] sm:$0xf]  ;;  %v582_v36 = vld [vmem:[%s7197_s11 + $0x28] sm:$0xf] }
  0x2c   : > { %v660_v27 = vsel %vm7270_vm7, %v655_v14, %v659_v57  ;;  %v1474_v28 = vsel %vm7263_vm6, %v5867_v12, %v1473_v16  ;;  %v1475_v29 = vrot.slane %v1473_v16, 4  ;;  %v681_v34 = vshll.u32 %v579_v17, 16  ;;  %v583_v41 = vld [vmem:[%s7197_s11 + $0x2c] sm:$0x1]  ;;  %v1371_v42 = vld [vmem:[%s7197_s11 + $0x18] sm:$0xe] }
  0x2d   : > { %v674_v33 = vrot.slane %v672_v26, 4  ;;  %v685_v35 = vshrl.u32 %v579_v17, 16  ;;  %v677_v39 = vrot.slane %v675_v30, 5  ;;  %v696_v46 = vshrl.u32 %v581_v31, 16  ;;  %v1372_v47 = vld [vmem:[%s7197_s11 + $0x1c] sm:$0xf] }
  0x2e   : > { %6589 = vmatmul.mubr.msk.bf16.gmra.mxu1 %vm326_vm1, %v6941_v20  ;;  %v665_v20 = vrot.slane %v664_v11, 4  ;;  %v683_v44 = vrot.slane %v681_v34, 5  ;;  %v699_v50 = vshll.u32 %v581_v31, 16  ;;  %v705_v51 = vshll.u32 %v582_v36, 16  ;;  %v1373_v52 = vld [vmem:[%s7197_s11 + $0x20] sm:$0x1] }
  0x2f   : > { %6592 = vmatprep.mubr.msk.bf16.mxu1 %vm326_vm1, %v6944_v23  ;;  %6573 = vmatmul.mubr.msk.bf16.gmra.mxu0 %vm326_vm1, %v6943_v22  ;;  %v5883_v22 = vcombine.low %v1467_v3, %v1470_v15  ;;  %v1476_v23 = vrot.slane %v1370_v6, 5  ;;  %v687_v45 = vrot.slane %v685_v35, 4  ;;  %v698_v56 = vrot.slane %v696_v46, 4  ;;  %v1374_v59 = vld [vmem:[%s7197_s11 + $0x24] sm:$0xe] }
  0x30   : > { %6576 = vmatprep.mubr.msk.bf16.mxu0 %vm326_vm1, %v6946_v25  ;;  %v580_v25 = vld [vmem:[%s7197_s11 + $0x20] sm:$0x1]  ;;  %v670_v32 = vsel %vm7270_vm7, %v665_v20, %v669_v0  ;;  %v709_v57 = vshrl.u32 %v582_v36, 16  ;;  %v715_v58 = vshll.u32 %v583_v41, 16  ;;  %v701_v61 = vrot.slane %v699_v50, 5 }
  0x31   : > { %v5835_v37 = vcombine.low %v660_v27, %v670_v32  ;;  %v1477_v38 = vsel %vm7263_vm6, %v1475_v29, %v1476_v23  ;;  %v691_v40 = vshll.u32 %v580_v25, 16  ;;  %v688_v53 = vor.u32 %v687_v45, %v683_v44  ;;  %v1375_v0 = vld [vmem:[%s7197_s11 + $0x28] sm:$0xf]  ;;  %v1376_v5 = vld [vmem:[%s7197_s11 + $0x2c] sm:$0x1] }
  0x32   : > { %v5884_v43 = vcombine.low %v1474_v28, %v1477_v38  ;;  %v707_v62 = vrot.slane %v705_v51, 5  ;;  %v5868_v63 = vrot.slane %v1371_v42, 9  ;;  %v711_v2 = vrot.slane %v709_v57, 4  ;;  %v584_v10 = vld [vmem:[%s7197_s11 + $0x30] sm:$0xf] }
  0x33   : > { %v693_v49 = vrot.slane %v691_v40, 5  ;;  %v689_v1 = vrot.slane %v688_v53, 4  ;;  %v717_v3 = vrot.slane %v715_v58, 5  ;;  %v1480_v4 = vrot.slane %v1372_v47, 5  ;;  %v585_v20 = vld [vmem:[%s7197_s11 + $0x34] sm:$0xf] }
  0x34   : > { %v702_v7 = vor.u32 %v701_v61, %v698_v56  ;;  %v5869_v9 = vrot.slane %v1374_v59, 9  ;;  %v712_v12 = vor.u32 %v711_v2, %v707_v62  ;;  %v1487_v16 = vrot.slane %v1375_v0, 5  ;;  %v586_v25 = vld [vmem:[%s7197_s11 + $0x38] sm:$0x1]  ;;  %v587_v30 = vld [vmem:[%s7197_s11 + $0x3c] sm:$0xf] }
  0x35   : > { %v694_v11 = vsel %vm7270_vm7, %v689_v1, %v693_v49  ;;  %v1482_v14 = vrot.slane %v1480_v4, 4  ;;  %v1490_v17 = vrot.slane %v1376_v5, 5  ;;  %v720_v26 = vshrl.u32 %v584_v10, 16  ;;  %v588_v35 = vld [vmem:[%s7197_s11 + $0x40] sm:$0xf] }
  0x36   : > { %6593 = vmatmul.mubr.msk.bf16.gmra.mxu1 %vm326_vm1, %v6945_v48  ;;  %v678_v48 = vor.u32 %v677_v39, %v674_v33  ;;  %v703_v15 = vrot.slane %v702_v7, 4  ;;  %v723_v27 = vshll.u32 %v584_v10, 16  ;;  %v1489_v29 = vrot.slane %v1487_v16, 4  ;;  %v589_v40 = vld [vmem:[%s7197_s11 + $0x44] sm:$0x1] }
  0x37   : > { %6598 = vmatprep.mubr.msk.bf16.mxu1 %vm326_vm1, %v5834_v13  ;;  %6577 = vmatmul.mubr.msk.bf16.gmra.mxu0 %vm326_vm1, %v6947_v8  ;;  %v1483_v8 = vrot.slane %v1373_v52, 5  ;;  %v1481_v13 = vsel %vm7263_vm6, %v5868_v63, %v1480_v4  ;;  %v722_v32 = vrot.slane %v720_v26, 4  ;;  %v729_v34 = vshll.u32 %v585_v20, 16  ;;  %v1377_v41 = vld [vmem:[%s7197_s11 + $0x30] sm:$0xe] }
  0x38   : > { %6632 = vmatprep.mubr.msk.bf16.mxu0 %vm326_vm1, %v5883_v22  ;;  %v679_v60 = vrot.slane %v678_v48, 4  ;;  %v713_v22 = vrot.slane %v712_v12, 4  ;;  %v725_v33 = vrot.slane %v723_v27, 5  ;;  %v733_v38 = vshrl.u32 %v585_v20, 16  ;;  %v1378_v46 = vld [vmem:[%s7197_s11 + $0x34] sm:$0xf] }
  0x39   : > { %v1484_v23 = vsel %vm7263_vm6, %v1482_v14, %v1483_v8  ;;  %v739_v39 = vshll.u32 %v586_v25, 16  ;;  %v744_v45 = vshrl.u32 %v587_v30, 16  ;;  %v1379_v47 = vld [vmem:[%s7197_s11 + $0x38] sm:$0x1]  ;;  %v747_v50 = vshll.u32 %v587_v30, 16 }
  0x3a   : > { %v684_v6 = vsel %vm7270_vm7, %v679_v60, %v683_v44  ;;  %v5885_v28 = vcombine.low %v1481_v13, %v1484_v23  ;;  %v718_v31 = vsel %vm7270_vm7, %v713_v22, %v717_v3  ;;  %v731_v44 = vrot.slane %v729_v34, 5  ;;  %v1380_v52 = vld [vmem:[%s7197_s11 + $0x3c] sm:$0xe]  ;;  %v1381_v59 = vld [vmem:[%s7197_s11 + $0x40] sm:$0xf] }
  0x3b   : > { %v735_v48 = vrot.slane %v733_v38, 4  ;;  %v741_v49 = vrot.slane %v739_v39, 5  ;;  %v753_v51 = vshll.u32 %v588_v35, 16  ;;  %v746_v56 = vrot.slane %v744_v45, 4  ;;  %v1382_v0 = vld [vmem:[%s7197_s11 + $0x44] sm:$0x1] }
  0x3c   : > { %v757_v57 = vshrl.u32 %v588_v35, 16  ;;  %v763_v58 = vshll.u32 %v589_v40, 16  ;;  %v749_v61 = vrot.slane %v747_v50, 5  ;;  %v5870_v63 = vrot.slane %v1377_v41, 9  ;;  %v590_v5 = vld [vmem:[%s7197_s11 + $0x48] sm:$0xf] }
  0x3d   : > { %v736_v60 = vor.u32 %v735_v48, %v731_v44  ;;  %v1494_v4 = vrot.slane %v1378_v46, 5  ;;  %v1497_v8 = vrot.slane %v1379_v47, 5  ;;  %v1501_v13 = vrot.slane %v1381_v59, 5  ;;  %v592_v26 = vld [vmem:[%s7197_s11 + $0x50] sm:$0x1] }
  0x3e   : > { %6599 = vmatmul.mubr.msk.bf16.vlgmr.msra.gmra.mxu1 %vm326_vm1, %v5835_v37  ;;  %v1491_v37 = vsel %vm7263_vm6, %v1489_v29, %v1490_v17  ;;  %v759_v2 = vrot.slane %v757_v57, 4  ;;  %v765_v3 = vrot.slane %v763_v58, 5  ;;  %v750_v7 = vor.u32 %v749_v61, %v746_v56  ;;  %v593_v27 = vld [vmem:[%s7197_s11 + $0x54] sm:$0xf]  ;;  %v594_v34 = vld [vmem:[%s7197_s11 + $0x58] sm:$0xf] }
  0x3f   : > { %6665 = vmatpush3.bf16.msra.mxu1 %v7234_v19  ;;  %6633 = vmatmul.mubr.msk.bf16.vlgmr.msra.gmra.mxu0 %vm326_vm1, %v5884_v43  ;;  %v5836_v19 = vcombine.low %v684_v6, %v694_v11  ;;  %v726_v43 = vor.u32 %v725_v33, %v722_v32  ;;  %v737_v6 = vrot.slane %v736_v60, 4  ;;  %v1495_v11 = vsel %vm7263_vm6, %v5870_v63, %v1494_v4  ;;  %v595_v38 = vld [vmem:[%s7197_s11 + $0x5c] sm:$0x1]  ;;  %v1383_v40 = vld [vmem:[%s7197_s11 + $0x48] sm:$0xe] }
  0x40   : > { %6876 = vmatprep.subr.msk.bf16.mxu1 %vm375_vm0, %v7230_v18  ;;  %6699 = vmatpush3.bf16.msra.mxu0 %v7239_v21  ;;  %v708_v18 = vsel %vm7270_vm7, %v703_v15, %v707_v62  ;;  %v1488_v21 = vsel %vm7263_vm6, %v5869_v9, %v1487_v16  ;;  %v755_v62 = vrot.slane %v753_v51, 5  ;;  %v5871_v9 = vrot.slane %v1380_v52, 9  ;;  %v591_v16 = vld [vmem:[%s7197_s11 + $0x4c] sm:$0xf]  ;;  %v1385_v56 = vld [vmem:[%s7197_s11 + $0x50] sm:$0x1] }
  0x41   : > { %6602 = vmatprep.mubr.msk.bf16.mxu1 %vm326_vm1, %v5836_v19  ;;  %v5837_v36 = vcombine.low %v708_v18, %v718_v31  ;;  %6636 = vmatprep.mubr.msk.bf16.mxu0 %vm326_vm1, %v5885_v28  ;;  %v5886_v42 = vcombine.low %v1488_v21, %v1491_v37  ;;  %v727_v53 = vrot.slane %v726_v43, 4  ;;  %v1496_v12 = vrot.slane %v1494_v4, 4  ;;  %v1384_v45 = vld [vmem:[%s7197_s11 + $0x4c] sm:$0xf]  ;;  %v1386_v61 = vld [vmem:[%s7197_s11 + $0x54] sm:$0xe] }
  0x42   : > { %v760_v10 = vor.u32 %v759_v2, %v755_v62  ;;  %v742_v14 = vsel %vm7270_vm7, %v737_v6, %v741_v49  ;;  %v751_v19 = vrot.slane %v750_v7, 4  ;;  %v1504_v15 = vrot.slane %v1382_v0, 5  ;;  %v1387_v2 = vld [vmem:[%s7197_s11 + $0x58] sm:$0xf]  ;;  %v1388_v7 = vld [vmem:[%s7197_s11 + $0x5c] sm:$0x1] }
  0x43   : > { %v732_v1 = vsel %vm7270_vm7, %v727_v53, %v731_v44  ;;  %v768_v17 = vshrl.u32 %v590_v5, 16  ;;  %v1498_v23 = vsel %vm7263_vm6, %v1496_v12, %v1497_v8  ;;  %v1502_v25 = vsel %vm7263_vm6, %v5871_v9, %v1501_v13  ;;  %v596_v8 = vld [vmem:[%s7197_s11 + $0x60] sm:$0xf] }
  0x44   : > { %v5838_v20 = vcombine.low %v732_v1, %v742_v14  ;;  %v761_v22 = vrot.slane %v760_v10, 4  ;;  %v756_v18 = vsel %vm7270_vm7, %v751_v19, %v755_v62  ;;  %v5887_v28 = vcombine.low %v1495_v11, %v1498_v23  ;;  %v598_v23 = vld [vmem:[%s7197_s11 + $0x68] sm:$0x1] }
  0x45   : > { %v1503_v21 = vrot.slane %v1501_v13, 4  ;;  %v770_v29 = vrot.slane %v768_v17, 4  ;;  %v771_v31 = vshll.u32 %v590_v5, 16  ;;  %v777_v32 = vshll.u32 %v591_v16, 16 }
  0x46   : > { %6603 = vmatmul.mubr.msk.bf16.gmra.mxu1 %vm326_vm1, %v5837_v36  ;;  %v766_v30 = vsel %vm7270_vm7, %v761_v22, %v765_v3  ;;  %v781_v33 = vshrl.u32 %v591_v16, 16  ;;  %v787_v37 = vshll.u32 %v592_v26, 16  ;;  %v792_v39 = vshrl.u32 %v593_v27, 16  ;;  %v597_v16 = vld [vmem:[%s7197_s11 + $0x64] sm:$0xf] }
  0x47   : > { %6637 = vmatmul.mubr.msk.bf16.gmra.mxu0 %vm326_vm1, %v5886_v42  ;;  %6606 = vmatprep.mubr.msk.bf16.mxu1 %vm326_vm1, %v5838_v20  ;;  %v5839_v35 = vcombine.low %v756_v18, %v766_v30  ;;  %v1505_v36 = vsel %vm7263_vm6, %v1503_v21, %v1504_v15  ;;  %v773_v42 = vrot.slane %v771_v31, 5  ;;  %v779_v43 = vrot.slane %v777_v32, 5  ;;  %v599_v21 = vld [vmem:[%s7197_s11 + $0x6c] sm:$0xf] }
  0x48   : > { %6640 = vmatprep.mubr.msk.bf16.mxu0 %vm326_vm1, %v5887_v28  ;;  %v5888_v41 = vcombine.low %v1502_v25, %v1505_v36  ;;  %v783_v44 = vrot.slane %v781_v33, 4  ;;  %v789_v46 = vrot.slane %v787_v37, 5  ;;  %v794_v47 = vrot.slane %v792_v39, 4  ;;  %v600_v33 = vld [vmem:[%s7197_s11 + $0x70] sm:$0xf] }
  0x49   : > { %v795_v48 = vshll.u32 %v593_v27, 16  ;;  %v801_v49 = vshll.u32 %v594_v34, 16  ;;  %v774_v50 = vor.u32 %v773_v42, %v770_v29  ;;  %v805_v52 = vshrl.u32 %v594_v34, 16  ;;  %v1389_v39 = vld [vmem:[%s7197_s11 + $0x60] sm:$0xe] }
  0x4a   : > { %v784_v51 = vor.u32 %v783_v44, %v779_v43  ;;  %v811_v53 = vshll.u32 %v595_v38, 16  ;;  %v5872_v59 = vrot.slane %v1383_v40, 9  ;;  %v1508_v60 = vrot.slane %v1384_v45, 5  ;;  %v601_v38 = vld [vmem:[%s7197_s11 + $0x74] sm:$0x1] }
  0x4b   : > { %v797_v57 = vrot.slane %v795_v48, 5  ;;  %v803_v58 = vrot.slane %v801_v49, 5  ;;  %v775_v62 = vrot.slane %v774_v50, 4  ;;  %v807_v0 = vrot.slane %v805_v52, 4  ;;  %v1390_v44 = vld [vmem:[%s7197_s11 + $0x64] sm:$0xf] }
  0x4c   : > { %v785_v63 = vrot.slane %v784_v51, 4  ;;  %v813_v1 = vrot.slane %v811_v53, 5  ;;  %v1509_v4 = vsel %vm7263_vm6, %v5872_v59, %v1508_v60  ;;  %v1510_v5 = vrot.slane %v1508_v60, 4  ;;  %v1391_v49 = vld [vmem:[%s7197_s11 + $0x68] sm:$0x1] }
  0x4d   : > { %v798_v3 = vor.u32 %v797_v57, %v794_v47  ;;  %v1511_v6 = vrot.slane %v1385_v56, 5  ;;  %v780_v9 = vsel %vm7270_vm7, %v775_v62, %v779_v43  ;;  %v808_v11 = vor.u32 %v807_v0, %v803_v58  ;;  %v1392_v56 = vld [vmem:[%s7197_s11 + $0x6c] sm:$0xe] }
  0x4e   : > { %6607 = vmatmul.mubr.msk.bf16.gmra.mxu1 %vm326_vm1, %v5839_v35  ;;  %v790_v10 = vsel %vm7270_vm7, %v785_v63, %v789_v46  ;;  %v5873_v12 = vrot.slane %v1386_v61, 9  ;;  %v1515_v15 = vrot.slane %v1387_v2, 5  ;;  %v1518_v22 = vrot.slane %v1388_v7, 5  ;;  %v1393_v61 = vld [vmem:[%s7197_s11 + $0x70] sm:$0xf] }
  0x4f   : > { %6641 = vmatmul.mubr.msk.bf16.gmra.mxu0 %vm326_vm1, %v5888_v41  ;;  %v5840_v13 = vcombine.low %v780_v9, %v790_v10  ;;  %v799_v14 = vrot.slane %v798_v3, 4  ;;  %v1512_v19 = vsel %vm7263_vm6, %v1510_v5, %v1511_v6  ;;  %v809_v17 = vrot.slane %v808_v11, 4  ;;  %v1394_v2 = vld [vmem:[%s7197_s11 + $0x74] sm:$0x1]  ;;  %v602_v7 = vld [vmem:[%s7197_s11 + $0x78] sm:$0xf] }
  0x50   : > { %v5889_v20 = vcombine.low %v1509_v4, %v1512_v19  ;;  %v816_v25 = vshrl.u32 %v596_v8, 16  ;;  %v1516_v27 = vsel %vm7263_vm6, %v5873_v12, %v1515_v15  ;;  %v1517_v18 = vrot.slane %v1515_v15, 4  ;;  %v603_v15 = vld [vmem:[%s7197_s11 + $0x7c] sm:$0xf] }
  0x51   : > { %6610 = vmatprep.mubr.msk.bf16.mxu1 %vm326_vm1, %v5840_v13  ;;  %v804_v26 = vsel %vm7270_vm7, %v799_v14, %v803_v58  ;;  %v819_v28 = vshll.u32 %v596_v8, 16  ;;  %v814_v29 = vsel %vm7270_vm7, %v809_v17, %v813_v1  ;;  %v825_v31 = vshll.u32 %v597_v16, 16 }
  0x52   : > { %6644 = vmatprep.mubr.msk.bf16.mxu0 %vm326_vm1, %v5889_v20  ;;  %v818_v30 = vrot.slane %v816_v25, 4  ;;  %v829_v32 = vshrl.u32 %v597_v16, 16  ;;  %v5841_v34 = vcombine.low %v804_v26, %v814_v29  ;;  %v1519_v35 = vsel %vm7263_vm6, %v1517_v18, %v1518_v22  ;;  %v604_v20 = vld [vmem:[%s7197_s11 + $0x80] sm:$0x1] }
  0x53   : > { %v821_v36 = vrot.slane %v819_v28, 5  ;;  %v835_v37 = vshll.u32 %v598_v23, 16  ;;  %v5890_v40 = vcombine.low %v1516_v27, %v1519_v35  ;;  %v827_v41 = vrot.slane %v825_v31, 5  ;;  %v605_v28 = vld [vmem:[%s7197_s11 + $0x84] sm:$0xf] }
  0x54   : > { %v831_v42 = vrot.slane %v829_v32, 4  ;;  %v840_v43 = vshrl.u32 %v599_v21, 16  ;;  %v843_v47 = vshll.u32 %v599_v21, 16  ;;  %v849_v48 = vshll.u32 %v600_v33, 16  ;;  %v606_v21 = vld [vmem:[%s7197_s11 + $0x88] sm:$0xf] }
  0x55   : > { %v822_v45 = vor.u32 %v821_v36, %v818_v30  ;;  %v837_v46 = vrot.slane %v835_v37, 5  ;;  %v853_v52 = vshrl.u32 %v600_v33, 16  ;;  %v859_v53 = vshll.u32 %v601_v38, 16  ;;  %v607_v33 = vld [vmem:[%s7197_s11 + $0x8c] sm:$0x1] }
  0x56   : > { %6611 = vmatmul.mubr.msk.bf16.gmra.mxu1 %vm326_vm1, %v5841_v34  ;;  %v832_v50 = vor.u32 %v831_v42, %v827_v41  ;;  %v842_v51 = vrot.slane %v840_v43, 4  ;;  %v845_v58 = vrot.slane %v843_v47, 5  ;;  %v851_v59 = vrot.slane %v849_v48, 5  ;;  %v1395_v38 = vld [vmem:[%s7197_s11 + $0x78] sm:$0xe] }
  0x57   : > { %6645 = vmatmul.mubr.msk.bf16.gmra.mxu0 %vm326_vm1, %v5890_v40  ;;  %v823_v57 = vrot.slane %v822_v45, 4  ;;  %v5874_v60 = vrot.slane %v1389_v39, 9  ;;  %v855_v63 = vrot.slane %v853_v52, 4  ;;  %v861_v0 = vrot.slane %v859_v53, 5  ;;  %v1396_v39 = vld [vmem:[%s7197_s11 + $0x7c] sm:$0xf] }
  0x58   : > { %v833_v62 = vrot.slane %v832_v50, 4  ;;  %v1522_v1 = vrot.slane %v1390_v44, 5  ;;  %v846_v4 = vor.u32 %v845_v58, %v842_v51  ;;  %v1525_v5 = vrot.slane %v1391_v49, 5  ;;  %v1397_v44 = vld [vmem:[%s7197_s11 + $0x80] sm:$0x1] }
  0x59   : > { %v828_v3 = vsel %vm7270_vm7, %v823_v57, %v827_v41  ;;  %v5875_v6 = vrot.slane %v1392_v56, 9  ;;  %v856_v9 = vor.u32 %v855_v63, %v851_v59  ;;  %v1529_v14 = vrot.slane %v1393_v61, 5  ;;  %v1398_v45 = vld [vmem:[%s7197_s11 + $0x84] sm:$0xe]  ;;  %v1399_v50 = vld [vmem:[%s7197_s11 + $0x88] sm:$0xf] }
  0x5a   : > { %v838_v8 = vsel %vm7270_vm7, %v833_v62, %v837_v46  ;;  %v1523_v10 = vsel %vm7263_vm6, %v5874_v60, %v1522_v1  ;;  %v1524_v11 = vrot.slane %v1522_v1, 4  ;;  %v847_v13 = vrot.slane %v846_v4, 4  ;;  %v1400_v57 = vld [vmem:[%s7197_s11 + $0x8c] sm:$0x1]  ;;  %v608_v62 = vld [vmem:[%s7197_s11 + $0x90] sm:$0xf] }
  0x5b   : > { %v5842_v12 = vcombine.low %v828_v3, %v838_v8  ;;  %v1532_v19 = vrot.slane %v1394_v2, 5  ;;  %v857_v16 = vrot.slane %v856_v9, 4  ;;  %v864_v22 = vshrl.u32 %v602_v7, 16 }
  0x5c   : > { %v1526_v17 = vsel %vm7263_vm6, %v1524_v11, %v1525_v5  ;;  %v867_v23 = vshll.u32 %v602_v7, 16  ;;  %v852_v25 = vsel %vm7270_vm7, %v847_v13, %v851_v59  ;;  %v1530_v27 = vsel %vm7263_vm6, %v5875_v6, %v1529_v14 }
  0x5d   : > { %6614 = vmatprep.mubr.msk.bf16.mxu1 %vm326_vm1, %v5842_v12  ;;  %v5891_v26 = vcombine.low %v1523_v10, %v1526_v17  ;;  %v1531_v18 = vrot.slane %v1529_v14, 4  ;;  %v862_v29 = vsel %vm7270_vm7, %v857_v16, %v861_v0  ;;  %v866_v30 = vrot.slane %v864_v22, 4  ;;  %v609_v14 = vld [vmem:[%s7197_s11 + $0x94] sm:$0xf]  ;;  %v610_v22 = vld [vmem:[%s7197_s11 + $0x98] sm:$0x1] }
  0x5e   : > { %v869_v31 = vrot.slane %v867_v23, 5  ;;  %v873_v32 = vshll.u32 %v603_v15, 16  ;;  %v5843_v34 = vcombine.low %v852_v25, %v862_v29  ;;  %v877_v36 = vshrl.u32 %v603_v15, 16  ;;  %v611_v23 = vld [vmem:[%s7197_s11 + $0x9c] sm:$0xf] }
  0x5f   : > { %6648 = vmatprep.mubr.msk.bf16.mxu0 %vm326_vm1, %v5891_v26  ;;  %v1533_v35 = vsel %vm7263_vm6, %v1531_v18, %v1532_v19  ;;  %v883_v37 = vshll.u32 %v604_v20, 16  ;;  %v888_v43 = vshrl.u32 %v605_v28, 16  ;;  %v891_v48 = vshll.u32 %v605_v28, 16  ;;  %v612_v28 = vld [vmem:[%s7197_s11 + $0xa0] sm:$0xf] }
  0x60   : > { %v5892_v40 = vcombine.low %v1530_v27, %v1533_v35  ;;  %v870_v41 = vor.u32 %v869_v31, %v866_v30  ;;  %v875_v42 = vrot.slane %v873_v32, 5  ;;  %6615 = vmatmul.mubr.msk.bf16.gmra.mxu1 %vm326_vm1, %v5843_v34  ;;  %v879_v46 = vrot.slane %v877_v36, 4  ;;  %v1402_v34 = vld [vmem:[%s7197_s11 + $0x94] sm:$0xf] }
  0x61   : > { %v885_v47 = vrot.slane %v883_v37, 5  ;;  %v897_v49 = vshll.u32 %v606_v21, 16  ;;  %v890_v52 = vrot.slane %v888_v43, 4  ;;  %v901_v53 = vshrl.u32 %v606_v21, 16  ;;  %v613_v21 = vld [vmem:[%s7197_s11 + $0xa4] sm:$0x1] }
  0x62   : > { %6649 = vmatmul.mubr.msk.bf16.gmra.mxu0 %vm326_vm1, %v5892_v40  ;;  %v871_v51 = vrot.slane %v870_v41, 4  ;;  %v907_v56 = vshll.u32 %v607_v33, 16  ;;  %v880_v58 = vor.u32 %v879_v46, %v875_v42  ;;  %v893_v59 = vrot.slane %v891_v48, 5  ;;  %v1401_v33 = vld [vmem:[%s7197_s11 + $0x90] sm:$0xe] }
  0x63   : > { %v899_v60 = vrot.slane %v897_v49, 5  ;;  %v5876_v61 = vrot.slane %v1395_v38, 9  ;;  %v903_v0 = vrot.slane %v901_v53, 4  ;;  %v1536_v2 = vrot.slane %v1396_v39, 5  ;;  %v1403_v43 = vld [vmem:[%s7197_s11 + $0x98] sm:$0x1] }
  0x64   : > { %v876_v63 = vsel %vm7270_vm7, %v871_v51, %v875_v42  ;;  %v909_v1 = vrot.slane %v907_v56, 5  ;;  %v881_v3 = vrot.slane %v880_v58, 4  ;;  %v894_v4 = vor.u32 %v893_v59, %v890_v52  ;;  %v1404_v52 = vld [vmem:[%s7197_s11 + $0x9c] sm:$0xe]  ;;  %v7477_v53 = vld [vmem:[%s8938_s1 + $0xc] sm:$0x3] }
  0x65   : > { %v1539_v5 = vrot.slane %v1397_v44, 5  ;;  %v5877_v6 = vrot.slane %v1398_v45, 9  ;;  %v904_v7 = vor.u32 %v903_v0, %v899_v60  ;;  %v1537_v8 = vsel %vm7263_vm6, %v5876_v61, %v1536_v2  ;;  %6877 = vmatprep.subr.msk.bf16.mxu0 %vm375_vm0, %v7477_v53 }
  0x66   : > { %v1538_v9 = vrot.slane %v1536_v2, 4  ;;  %v1543_v10 = vrot.slane %v1399_v50, 5  ;;  %v886_v11 = vsel %vm7270_vm7, %v881_v3, %v885_v47  ;;  %v895_v12 = vrot.slane %v894_v4, 4 }
  0x67   : > { %v1546_v13 = vrot.slane %v1400_v57, 5  ;;  %v912_v19 = vshrl.u32 %v608_v62, 16  ;;  %v5844_v15 = vcombine.low %v876_v63, %v886_v11  ;;  %v905_v16 = vrot.slane %v904_v7, 4  ;;  %v615_v7 = vld [vmem:[%s7197_s11 + $0xac] sm:$0xf] }
  0x68   : > { %v1540_v17 = vsel %vm7263_vm6, %v1538_v9, %v1539_v5  ;;  %v1544_v20 = vsel %vm7263_vm6, %v5877_v6, %v1543_v10  ;;  %v900_v25 = vsel %vm7270_vm7, %v895_v12, %v899_v60  ;;  %v1545_v27 = vrot.slane %v1543_v10, 4  ;;  %v1405_v60 = vld [vmem:[%s7197_s11 + $0xa0] sm:$0xf]  ;;  %v614_v6 = vld [vmem:[%s7197_s11 + $0xa8] sm:$0xf] }
  0x69   : > { %v5893_v26 = vcombine.low %v1537_v8, %v1540_v17  ;;  %v914_v18 = vrot.slane %v912_v19, 4  ;;  %6618 = vmatprep.mubr.msk.bf16.mxu1 %vm326_vm1, %v5844_v15  ;;  %v910_v29 = vsel %vm7270_vm7, %v905_v16, %v909_v1  ;;  %v915_v30 = vshll.u32 %v608_v62, 16  ;;  %v1406_v1 = vld [vmem:[%s7197_s11 + $0xa4] sm:$0x1]  ;;  %v616_v12 = vld [vmem:[%s7197_s11 + $0xb0] sm:$0x1] }
  0x6a   : > { %v921_v31 = vshll.u32 %v609_v14, 16  ;;  %v925_v32 = vshrl.u32 %v609_v14, 16  ;;  %v5845_v35 = vcombine.low %v900_v25, %v910_v29  ;;  %v1547_v36 = vsel %vm7263_vm6, %v1545_v27, %v1546_v13 }
  0x6b   : > { %6652 = vmatprep.mubr.msk.bf16.mxu0 %vm326_vm1, %v5893_v26  ;;  %v931_v37 = vshll.u32 %v610_v22, 16  ;;  %v936_v38 = vshrl.u32 %v611_v23, 16  ;;  %v5894_v39 = vcombine.low %v1544_v20, %v1547_v36  ;;  %v917_v40 = vrot.slane %v915_v30, 5 }
  0x6c   : > { %v923_v41 = vrot.slane %v921_v31, 5  ;;  %v927_v42 = vrot.slane %v925_v32, 4  ;;  %6619 = vmatmul.mubr.msk.bf16.gmra.mxu1 %vm326_vm1, %v5845_v35  ;;  %v939_v46 = vshll.u32 %v611_v23, 16  ;;  %v945_v47 = vshll.u32 %v612_v28, 16  ;;  %v619_v32 = vld [vmem:[%s7197_s11 + $0xbc] sm:$0x1] }
  0x6d   : > { %v933_v44 = vrot.slane %v931_v37, 5  ;;  %v938_v45 = vrot.slane %v936_v38, 4  ;;  %6653 = vmatmul.mubr.msk.bf16.gmra.mxu0 %vm326_vm1, %v5894_v39  ;;  %v918_v48 = vor.u32 %v917_v40, %v914_v18  ;;  %v949_v50 = vshrl.u32 %v612_v28, 16  ;;  %v617_v18 = vld [vmem:[%s7197_s11 + $0xb4] sm:$0xf] }
  0x6e   : > { %v928_v49 = vor.u32 %v927_v42, %v923_v41  ;;  %v955_v51 = vshll.u32 %v613_v21, 16  ;;  %v941_v56 = vrot.slane %v939_v46, 5  ;;  %v947_v57 = vrot.slane %v945_v47, 5  ;;  %v618_v28 = vld [vmem:[%s7197_s11 + $0xb8] sm:$0xf] }
  0x6f   : > { %v5878_v58 = vrot.slane %v1401_v33, 9  ;;  %v1550_v59 = vrot.slane %v1402_v34, 5  ;;  %v919_v61 = vrot.slane %v918_v48, 4  ;;  %v951_v63 = vrot.slane %v949_v50, 4  ;;  %v1407_v37 = vld [vmem:[%s7197_s11 + $0xa8] sm:$0xe] }
  0x70   : > { %v929_v62 = vrot.slane %v928_v49, 4  ;;  %v957_v0 = vrot.slane %v955_v51, 5  ;;  %v942_v2 = vor.u32 %v941_v56, %v938_v45  ;;  %v1553_v5 = vrot.slane %v1403_v43, 5  ;;  %v1408_v38 = vld [vmem:[%s7197_s11 + $0xac] sm:$0xf] }
  0x71   : > { %v1551_v3 = vsel %vm7263_vm6, %v5878_v58, %v1550_v59  ;;  %v1552_v4 = vrot.slane %v1550_v59, 4  ;;  %v924_v8 = vsel %vm7270_vm7, %v919_v61, %v923_v41  ;;  %v952_v10 = vor.u32 %v951_v63, %v947_v57  ;;  %v1409_v43 = vld [vmem:[%s7197_s11 + $0xb0] sm:$0x1]  ;;  %v1411_v56 = vld [vmem:[%s7197_s11 + $0xb8] sm:$0xf] }
  0x72   : > { %v934_v9 = vsel %vm7270_vm7, %v929_v62, %v933_v44  ;;  %v5879_v11 = vrot.slane %v1404_v52, 9  ;;  %v943_v14 = vrot.slane %v942_v2, 4  ;;  %v1557_v15 = vrot.slane %v1405_v60, 5  ;;  %v1410_v44 = vld [vmem:[%s7197_s11 + $0xb4] sm:$0xe] }
  0x73   : > { %v5846_v13 = vcombine.low %v924_v8, %v934_v9  ;;  %v1554_v19 = vsel %vm7263_vm6, %v1552_v4, %v1553_v5  ;;  %v953_v16 = vrot.slane %v952_v10, 4  ;;  %v1560_v20 = vrot.slane %v1406_v1, 5 }
  0x74   : > { %v5895_v17 = vcombine.low %v1551_v3, %v1554_v19  ;;  %v960_v22 = vshrl.u32 %v614_v6, 16  ;;  %v948_v23 = vsel %vm7270_vm7, %v943_v14, %v947_v57  ;;  %v1558_v25 = vsel %vm7263_vm6, %v5879_v11, %v1557_v15  ;;  %v1412_v57 = vld [vmem:[%s7197_s11 + $0xbc] sm:$0x1]  ;;  %v5981_v11 = vld [vmem:[%s7197_s11 + $0x10] sm:$0xf] }
  0x75   : > { %6622 = vmatprep.mubr.msk.bf16.mxu1 %vm326_vm1, %v5846_v13  ;;  %v1559_v26 = vrot.slane %v1557_v15, 4  ;;  %v963_v27 = vshll.u32 %v614_v6, 16  ;;  %v958_v21 = vsel %vm7270_vm7, %v953_v16, %v957_v0  ;;  %v969_v30 = vshll.u32 %v615_v7, 16  ;;  %v5980_v6 = vld [vmem:[%s7197_s11 + $0xc] sm:$0xf] }
  0x76   : > { %6656 = vmatprep.mubr.msk.bf16.mxu0 %vm326_vm1, %v5895_v17  ;;  %v962_v29 = vrot.slane %v960_v22, 4  ;;  %v973_v31 = vshrl.u32 %v615_v7, 16  ;;  %v5847_v33 = vcombine.low %v948_v23, %v958_v21  ;;  %v979_v36 = vshll.u32 %v616_v12, 16  ;;  %v5982_v12 = vld [vmem:[%s7197_s11 + $0x14] sm:$0x1] }
  0x77   : > { %v1561_v34 = vsel %vm7263_vm6, %v1559_v26, %v1560_v20  ;;  %v965_v35 = vrot.slane %v963_v27, 5  ;;  %v971_v40 = vrot.slane %v969_v30, 5  ;;  %v984_v42 = vshrl.u32 %v617_v18, 16  ;;  %v5983_v16 = vld [vmem:[%s7197_s11 + $0x18] sm:$0xf] }
  0x78   : > { %v5896_v39 = vcombine.low %v1558_v25, %v1561_v34  ;;  %v975_v41 = vrot.slane %v973_v31, 4  ;;  %6623 = vmatmul.mubr.msk.bf16.gmra.mxu1 %vm326_vm1, %v5847_v33  ;;  %v981_v46 = vrot.slane %v979_v36, 5  ;;  %v987_v47 = vshll.u32 %v617_v18, 16  ;;  %v5984_v25 = vld [vmem:[%s7197_s11 + $0x1c] sm:$0xf] }
  0x79   : > { %v966_v45 = vor.u32 %v965_v35, %v962_v29  ;;  %v993_v48 = vshll.u32 %v618_v28, 16  ;;  %v986_v50 = vrot.slane %v984_v42, 4  ;;  %v997_v51 = vshrl.u32 %v618_v28, 16  ;;  %v6948_v29 = vld [vmem:[%s7197_s11 + $0xc] sm:$0xff]  }
  0x7a   : > { %6657 = vmatmul.mubr.msk.bf16.gmra.mxu0 %vm326_vm1, %v5896_v39  ;;  %v976_v49 = vor.u32 %v975_v41, %v971_v40  ;;  %v1003_v52 = vshll.u32 %v619_v32, 16  ;;  %v989_v59 = vrot.slane %v987_v47, 5  ;;  %v5880_v61 = vrot.slane %v1407_v37, 9  ;;  %v5985_v37 = vld [vmem:[%s7197_s11 + $0x20] sm:$0x1] }
  0x7b   : > { %v967_v58 = vrot.slane %v966_v45, 4  ;;  %v995_v60 = vrot.slane %v993_v48, 5  ;;  %v999_v63 = vrot.slane %v997_v51, 4  ;;  %v1564_v1 = vrot.slane %v1408_v38, 5  ;;  %v5987_v51 = vld [vmem:[%s7197_s11 + $0x28] sm:$0xf] }
  0x7c   : > { %v977_v62 = vrot.slane %v976_v49, 4  ;;  %v1005_v0 = vrot.slane %v1003_v52, 5  ;;  %v990_v3 = vor.u32 %v989_v59, %v986_v50  ;;  %v1567_v4 = vrot.slane %v1409_v43, 5  ;;  %v5988_v59 = vld [vmem:[%s7197_s11 + $0x2c] sm:$0x1] }
  0x7d   : > { %v972_v2 = vsel %vm7270_vm7, %v967_v58, %v971_v40  ;;  %v5881_v5 = vrot.slane %v1410_v44, 9  ;;  %v1000_v8 = vor.u32 %v999_v63, %v995_v60  ;;  %v1565_v9 = vsel %vm7263_vm6, %v5880_v61, %v1564_v1 }
  0x7e   : > { %v982_v7 = vsel %vm7270_vm7, %v977_v62, %v981_v46  ;;  %v1566_v10 = vrot.slane %v1564_v1, 4  ;;  %v991_v14 = vrot.slane %v990_v3, 4  ;;  %v1571_v19 = vrot.slane %v1411_v56, 5  ;;  %v5986_v46 = vld [vmem:[%s7197_s11 + $0x24] sm:$0xf]  ;;  %v6949_v1 = vld [vmem:[%s7197_s11 + $0x18] sm:$0xff]  }
  0x7f   : > { %v5848_v13 = vcombine.low %v972_v2, %v982_v7  ;;  %v1574_v15 = vrot.slane %v1412_v57, 5  ;;  %v1001_v17 = vrot.slane %v1000_v8, 4  ;;  %v2406_v22 = vshrl.u32 %v5980_v6, 16 }
  0x80   : > { %v1568_v20 = vsel %vm7263_vm6, %v1566_v10, %v1567_v4  ;;  %v2409_v23 = vshll.u32 %v5980_v6, 16  ;;  %v996_v26 = vsel %vm7270_vm7, %v991_v14, %v995_v60  ;;  %v1572_v18 = vsel %vm7263_vm6, %v5881_v5, %v1571_v19  ;;  %v5990_v6 = vld [vmem:[%s7197_s11 + $0x34] sm:$0xf] }
  0x81   : > { %6626 = vmatprep.mubr.msk.bf16.mxu1 %vm326_vm1, %v5848_v13  ;;  %v5897_v27 = vcombine.low %v1565_v9, %v1568_v20  ;;  %v1573_v28 = vrot.slane %v1571_v19, 4  ;;  %v1006_v21 = vsel %vm7270_vm7, %v1001_v17, %v1005_v0  ;;  %v2408_v30 = vrot.slane %v2406_v22, 4  ;;  %v5989_v0 = vld [vmem:[%s7197_s11 + $0x30] sm:$0xf] }
  0x82   : > { %v2411_v31 = vrot.slane %v2409_v23, 5  ;;  %v2415_v32 = vshll.u32 %v5981_v11, 16  ;;  %v5849_v33 = vcombine.low %v996_v26, %v1006_v21  ;;  %v2419_v35 = vshrl.u32 %v5981_v11, 16  ;;  %v5991_v23 = vld [vmem:[%s7197_s11 + $0x38] sm:$0x1] }
  0x83   : > { %6660 = vmatprep.mubr.msk.bf16.mxu0 %vm326_vm1, %v5897_v27  ;;  %v1575_v34 = vsel %vm7263_vm6, %v1573_v28, %v1574_v15  ;;  %v2425_v36 = vshll.u32 %v5982_v12, 16  ;;  %v2430_v41 = vshrl.u32 %v5983_v16, 16  ;;  %v2433_v44 = vshll.u32 %v5983_v16, 16  ;;  %v6950_v12 = vld [vmem:[%s7197_s11 + $0x24] sm:$0xff]  }
  0x84   : > { %v5898_v38 = vcombine.low %v1572_v18, %v1575_v34  ;;  %v2412_v39 = vor.u32 %v2411_v31, %v2408_v30  ;;  %v2417_v40 = vrot.slane %v2415_v32, 5  ;;  %6627 = vmatmul.mubr.msk.bf16.gmra.mxu1 %vm326_vm1, %v5849_v33  ;;  %v2421_v42 = vrot.slane %v2419_v35, 4  ;;  %v5993_v30 = vld [vmem:[%s7197_s11 + $0x40] sm:$0xf]  ;;  %v6951_v32 = vld [vmem:[%s7197_s11 + $0x30] sm:$0xff]  }
  0x85   : > { %v2427_v43 = vrot.slane %v2425_v36, 5  ;;  %v2439_v45 = vshll.u32 %v5984_v25, 16  ;;  %6666 = vmatprep.mubr.msk.bf16.mxu1 %vm326_vm1, %v6948_v29  ;;  %v2432_v48 = vrot.slane %v2430_v41, 4  ;;  %v2443_v49 = vshrl.u32 %v5984_v25, 16  ;;  %v5992_v29 = vld [vmem:[%s7197_s11 + $0x3c] sm:$0xf] }
  0x86   : > { %6661 = vmatmul.mubr.msk.bf16.gmra.mxu0 %vm326_vm1, %v5898_v38  ;;  %v2413_v47 = vrot.slane %v2412_v39, 4  ;;  %v2449_v50 = vshll.u32 %v5985_v37, 16  ;;  %v2422_v52 = vor.u32 %v2421_v42, %v2417_v40  ;;  %v2435_v56 = vrot.slane %v2433_v44, 5  ;;  %v5994_v36 = vld [vmem:[%s7197_s11 + $0x44] sm:$0x1] }
  0x87   : > { %v2441_v57 = vrot.slane %v2439_v45, 5  ;;  %v3877_v58 = vsel %vm375_vm0, %v7477_v53, 0  ;;  %v2445_v61 = vrot.slane %v2443_v49, 4  ;;  %v2454_v63 = vshrl.u32 %v5986_v46, 16  ;;  %v5995_v49 = vld [vmem:[%s7197_s11 + $0x48] sm:$0xf] }
  0x88   : > { %v2418_v60 = vsel %vm7270_vm7, %v2413_v47, %v2417_v40  ;;  %v2451_v62 = vrot.slane %v2449_v50, 5  ;;  %v2423_v2 = vrot.slane %v2422_v52, 4  ;;  %v2436_v3 = vor.u32 %v2435_v56, %v2432_v48  ;;  %v6952_v40 = vld [vmem:[%s7197_s11 + $0x3c] sm:$0xff]  }
  0x89   : > { %v2457_v4 = vshll.u32 %v5986_v46, 16  ;;  %v2463_v5 = vshll.u32 %v5987_v51, 16  ;;  %v2446_v7 = vor.u32 %v2445_v61, %v2441_v57  ;;  %v2456_v8 = vrot.slane %v2454_v63, 4 }
  0x8a   : > { %v2467_v9 = vshrl.u32 %v5987_v51, 16  ;;  %v2473_v53 = vshll.u32 %v5988_v59, 16  ;;  %v2428_v10 = vsel %vm7270_vm7, %v2423_v2, %v2427_v43  ;;  %v2437_v11 = vrot.slane %v2436_v3, 4  ;;  %v5998_v3 = vld [vmem:[%s7197_s11 + $0x54] sm:$0xf] }
  0x8b   : > { %v2459_v13 = vrot.slane %v2457_v4, 5  ;;  %v2465_v14 = vrot.slane %v2463_v5, 5  ;;  %v6029_v19 = vcombine.low %v2418_v60, %v2428_v10  ;;  %v2447_v15 = vrot.slane %v2446_v7, 4 }
  0x8c   : > { %v2469_v16 = vrot.slane %v2467_v9, 4  ;;  %v2475_v17 = vrot.slane %v2473_v53, 5  ;;  %6667 = vmatmul.mubr.msk.bf16.vlgmr.msra.gmra.mxu1 %vm326_vm1, %v6949_v1  ;;  %v2442_v20 = vsel %vm7270_vm7, %v2437_v11, %v2441_v57  ;;  %v2478_v25 = vshrl.u32 %v5989_v0, 16  ;;  %v5996_v57 = vld [vmem:[%s7197_s11 + $0x4c] sm:$0xf] }
  0x8d   : > { %v2460_v22 = vor.u32 %v2459_v13, %v2456_v8  ;;  %v2481_v26 = vshll.u32 %v5989_v0, 16  ;;  %6733 = vmatpush3.bf16.msra.mxu1 %v7245_v24  ;;  %6700 = vmatprep.mubr.msk.bf16.mxu0 %vm326_vm1, %v6029_v19  ;;  %v2452_v27 = vsel %vm7270_vm7, %v2447_v15, %v2451_v62  ;;  %v2487_v28 = vshll.u32 %v5990_v6, 16  ;;  %v5997_v0 = vld [vmem:[%s7197_s11 + $0x50] sm:$0x1]  ;;  %v5999_v8 = vld [vmem:[%s7197_s11 + $0x58] sm:$0xf] }
  0x8e   : > { %v2470_v18 = vor.u32 %v2469_v16, %v2465_v14  ;;  %v2491_v21 = vshrl.u32 %v5990_v6, 16  ;;  %v6030_v31 = vcombine.low %v2442_v20, %v2452_v27  ;;  %6670 = vmatprep.mubr.msk.bf16.mxu1 %vm326_vm1, %v6950_v12  ;;  %v2480_v34 = vrot.slane %v2478_v25, 4  ;;  %v6000_v12 = vld [vmem:[%s7197_s11 + $0x5c] sm:$0x1]  ;;  %v6953_v13 = vld [vmem:[%s7197_s11 + $0x48] sm:$0xff]  }
  0x8f   : > { %v2461_v33 = vrot.slane %v2460_v22, 4  ;;  %v2483_v35 = vrot.slane %v2481_v26, 5  ;;  %v2489_v37 = vrot.slane %v2487_v28, 5  ;;  %v2497_v39 = vshll.u32 %v5991_v23, 16 }
  0x90   : > { %v2471_v24 = vrot.slane %v2470_v18, 4  ;;  %v2493_v38 = vrot.slane %v2491_v21, 4  ;;  %6701 = vmatmul.mubr.msk.bf16.vlgmr.msra.gmra.mxu0 %vm326_vm1, %v6030_v31  ;;  %v2502_v43 = vshrl.u32 %v5992_v29, 16  ;;  %v2505_v44 = vshll.u32 %v5992_v29, 16  ;;  %v6954_v18 = vld [vmem:[%s7197_s11 + $0x54] sm:$0xff]  }
  0x91   : > { %v2466_v41 = vsel %vm7270_vm7, %v2461_v33, %v2465_v14  ;;  %v2484_v42 = vor.u32 %v2483_v35, %v2480_v34  ;;  %6767 = vmatpush3.bf16.msra.mxu0 %v3877_v58  ;;  %v2499_v47 = vrot.slane %v2497_v39, 5  ;;  %v2511_v48 = vshll.u32 %v5993_v30, 16 }
  0x92   : > { %v2476_v45 = vsel %vm7270_vm7, %v2471_v24, %v2475_v17  ;;  %v2494_v46 = vor.u32 %v2493_v38, %v2489_v37  ;;  %v2504_v52 = vrot.slane %v2502_v43, 4  ;;  %v2507_v56 = vrot.slane %v2505_v44, 5  ;;  %v6002_v24 = vld [vmem:[%s7197_s11 + $0x64] sm:$0xf] }
  0x93   : > { %v6031_v50 = vcombine.low %v2466_v41, %v2476_v45  ;;  %v2485_v51 = vrot.slane %v2484_v42, 4  ;;  %v2513_v60 = vrot.slane %v2511_v48, 5  ;;  %v2515_v61 = vshrl.u32 %v5993_v30, 16  ;;  %v6003_v41 = vld [vmem:[%s7197_s11 + $0x68] sm:$0x1] }
  0x94   : > { %v2495_v59 = vrot.slane %v2494_v46, 4  ;;  %v2521_v62 = vshll.u32 %v5994_v36, 16  ;;  %6671 = vmatmul.mubr.msk.bf16.gmra.mxu1 %vm326_vm1, %v6951_v32  ;;  %v2508_v63 = vor.u32 %v2507_v56, %v2504_v52  ;;  %v2526_v1 = vshrl.u32 %v5995_v49, 16  ;;  %v6001_v32 = vld [vmem:[%s7197_s11 + $0x60] sm:$0xf] }
  0x95   : > { %6704 = vmatprep.mubr.msk.bf16.mxu0 %vm326_vm1, %v6031_v50  ;;  %v2490_v58 = vsel %vm7270_vm7, %v2485_v51, %v2489_v37  ;;  %v2529_v2 = vshll.u32 %v5995_v49, 16  ;;  %6674 = vmatprep.mubr.msk.bf16.mxu1 %vm326_vm1, %v6952_v40  ;;  %v2517_v5 = vrot.slane %v2515_v61, 4  ;;  %v2535_v7 = vshll.u32 %v5996_v57, 16  ;;  %v6004_v50 = vld [vmem:[%s7197_s11 + $0x6c] sm:$0xf]  ;;  %v6955_v52 = vld [vmem:[%s7197_s11 + $0x60] sm:$0xff]  }
  0x96   : > { %v2500_v4 = vsel %vm7270_vm7, %v2495_v59, %v2499_v47  ;;  %v2523_v6 = vrot.slane %v2521_v62, 5  ;;  %v2509_v53 = vrot.slane %v2508_v63, 4  ;;  %v2528_v10 = vrot.slane %v2526_v1, 4  ;;  %v7614_v1 = vld [vmem:[%s8938_s1 + $0xe] sm:$0x3] }
  0x97   : > { %v6032_v9 = vcombine.low %v2490_v58, %v2500_v4  ;;  %v2531_v11 = vrot.slane %v2529_v2, 5  ;;  %v2518_v14 = vor.u32 %v2517_v5, %v2513_v60  ;;  %v2537_v19 = vrot.slane %v2535_v7, 5  ;;  %v6956_v5 = vld [vmem:[%s7197_s11 + $0x6c] sm:$0xff]   ;;  %v6007_v7 = vld [vmem:[%s7197_s11 + $0x78] sm:$0xf]  ;;  %6878 = vmatprep.subr.msk.bf16.mxu1 %vm375_vm0, %v7614_v1 }
  0x98   : > { %v2539_v15 = vshrl.u32 %v5996_v57, 16  ;;  %v2545_v16 = vshll.u32 %v5997_v0, 16  ;;  %v2514_v17 = vsel %vm7270_vm7, %v2509_v53, %v2513_v60  ;;  %v2550_v22 = vshrl.u32 %v5998_v3, 16  ;;  %v6005_v60 = vld [vmem:[%s7197_s11 + $0x70] sm:$0xf] }
  0x99   : > { %6705 = vmatmul.mubr.msk.bf16.gmra.mxu0 %vm326_vm1, %v6032_v9  ;;  %v2532_v20 = vor.u32 %v2531_v11, %v2528_v10  ;;  %v2553_v23 = vshll.u32 %v5998_v3, 16  ;;  %v2519_v25 = vrot.slane %v2518_v14, 4  ;;  %v2559_v28 = vshll.u32 %v5999_v8, 16  ;;  %v6006_v0 = vld [vmem:[%s7197_s11 + $0x74] sm:$0x1] }
  0x9a   : > { %v2541_v26 = vrot.slane %v2539_v15, 4  ;;  %v2547_v27 = vrot.slane %v2545_v16, 5  ;;  %v2552_v29 = vrot.slane %v2550_v22, 4  ;;  %v2563_v31 = vshrl.u32 %v5999_v8, 16  ;;  %v6008_v11 = vld [vmem:[%s7197_s11 + $0x7c] sm:$0xf] }
  0x9b   : > { %v2533_v21 = vrot.slane %v2532_v20, 4  ;;  %v2555_v30 = vrot.slane %v2553_v23, 5  ;;  %v2524_v33 = vsel %vm7270_vm7, %v2519_v25, %v2523_v6  ;;  %v2561_v35 = vrot.slane %v2559_v28, 5 }
  0x9c   : > { %v2542_v34 = vor.u32 %v2541_v26, %v2537_v19  ;;  %v2569_v36 = vshll.u32 %v6000_v12, 16  ;;  %6675 = vmatmul.mubr.msk.bf16.gmra.mxu1 %vm326_vm1, %v6953_v13  ;;  %v6033_v37 = vcombine.low %v2514_v17, %v2524_v33  ;;  %v2565_v40 = vrot.slane %v2563_v31, 4 }
  0x9d   : > { %v2538_v38 = vsel %vm7270_vm7, %v2533_v21, %v2537_v19  ;;  %v2556_v39 = vor.u32 %v2555_v30, %v2552_v29  ;;  %6678 = vmatprep.mubr.msk.bf16.mxu1 %vm326_vm1, %v6954_v18  ;;  %v2574_v44 = vshrl.u32 %v6001_v32, 16  ;;  %v2577_v45 = vshll.u32 %v6001_v32, 16  ;;  %v6009_v21 = vld [vmem:[%s7197_s11 + $0x80] sm:$0x1]  ;;  %v6010_v30 = vld [vmem:[%s7197_s11 + $0x84] sm:$0xf] }
  0x9e   : > { %v2543_v42 = vrot.slane %v2542_v34, 4  ;;  %v2571_v43 = vrot.slane %v2569_v36, 5  ;;  %6708 = vmatprep.mubr.msk.bf16.mxu0 %vm326_vm1, %v6033_v37  ;;  %v2566_v47 = vor.u32 %v2565_v40, %v2561_v35  ;;  %v2583_v48 = vshll.u32 %v6002_v24, 16  ;;  %v6012_v40 = vld [vmem:[%s7197_s11 + $0x8c] sm:$0x1] }
  0x9f   : > { %v2557_v46 = vrot.slane %v2556_v39, 4  ;;  %v2587_v49 = vshrl.u32 %v6002_v24, 16  ;;  %v2576_v56 = vrot.slane %v2574_v44, 4  ;;  %v2579_v57 = vrot.slane %v2577_v45, 5  ;;  %v6957_v24 = vld [vmem:[%s7197_s11 + $0x78] sm:$0xff]   ;;  %v6958_v44 = vld [vmem:[%s7197_s11 + $0x84] sm:$0xff]  }
  0xa0   : > { %v2548_v51 = vsel %vm7270_vm7, %v2543_v42, %v2547_v27  ;;  %v2593_v59 = vshll.u32 %v6003_v41, 16  ;;  %v2567_v58 = vrot.slane %v2566_v47, 4  ;;  %v2585_v63 = vrot.slane %v2583_v48, 5 }
  0xa1   : > { %v6034_v61 = vcombine.low %v2538_v38, %v2548_v51  ;;  %v2562_v62 = vsel %vm7270_vm7, %v2557_v46, %v2561_v35  ;;  %v2580_v2 = vor.u32 %v2579_v57, %v2576_v56  ;;  %v2589_v3 = vrot.slane %v2587_v49, 4  ;;  %v6011_v35 = vld [vmem:[%s7197_s11 + $0x88] sm:$0xf]  ;;  %v6013_v46 = vld [vmem:[%s7197_s11 + $0x90] sm:$0xf] }
  0xa2   : > { %v2595_v4 = vrot.slane %v2593_v59, 5  ;;  %v2598_v6 = vshrl.u32 %v6004_v50, 16  ;;  %v2572_v8 = vsel %vm7270_vm7, %v2567_v58, %v2571_v43  ;;  %v2601_v9 = vshll.u32 %v6004_v50, 16  ;;  %v6014_v51 = vld [vmem:[%s7197_s11 + $0x94] sm:$0xf] }
  0xa3   : > { %6709 = vmatmul.mubr.msk.bf16.gmra.mxu0 %vm326_vm1, %v6034_v61  ;;  %v2607_v53 = vshll.u32 %v6005_v60, 16  ;;  %v2611_v10 = vshrl.u32 %v6005_v60, 16  ;;  %v6035_v12 = vcombine.low %v2562_v62, %v2572_v8  ;;  %v2581_v13 = vrot.slane %v2580_v2, 4 }
  0xa4   : > { %v2590_v14 = vor.u32 %v2589_v3, %v2585_v63  ;;  %v2600_v19 = vrot.slane %v2598_v6, 4  ;;  %6679 = vmatmul.mubr.msk.bf16.gmra.mxu1 %vm326_vm1, %v6955_v52  ;;  %v2603_v15 = vrot.slane %v2601_v9, 5  ;;  %v2617_v20 = vshll.u32 %v6006_v0, 16  ;;  %v7647_v52 = vld [vmem:[%s8938_s1 + $0x10] sm:$0x3] }
  0xa5   : > { %v2609_v16 = vrot.slane %v2607_v53, 5  ;;  %v2613_v17 = vrot.slane %v2611_v10, 4  ;;  %6712 = vmatprep.mubr.msk.bf16.mxu0 %vm326_vm1, %v6035_v12  ;;  %v2586_v22 = vsel %vm7270_vm7, %v2581_v13, %v2585_v63  ;;  %6682 = vmatprep.mubr.msk.bf16.mxu1 %vm326_vm1, %v6956_v5  ;;  %v2622_v25 = vshrl.u32 %v6007_v7, 16  ;;  %v6015_v0 = vld [vmem:[%s7197_s11 + $0x98] sm:$0x1] }
  0xa6   : > { %v2591_v23 = vrot.slane %v2590_v14, 4  ;;  %v2625_v26 = vshll.u32 %v6007_v7, 16  ;;  %v2604_v27 = vor.u32 %v2603_v15, %v2600_v19  ;;  %v2619_v28 = vrot.slane %v2617_v20, 5  ;;  %6879 = vmatprep.subr.msk.bf16.mxu0 %vm375_vm0, %v7647_v52  ;;  %v6016_v53 = vld [vmem:[%s7197_s11 + $0x9c] sm:$0xf] }
  0xa7   : > { %v2614_v18 = vor.u32 %v2613_v17, %v2609_v16  ;;  %v2631_v29 = vshll.u32 %v6008_v11, 16  ;;  %v2624_v32 = vrot.slane %v2622_v25, 4  ;;  %v2635_v34 = vshrl.u32 %v6008_v11, 16  ;;  %v6959_v11 = vld [vmem:[%s7197_s11 + $0x90] sm:$0xff]   ;;  %v6960_v19 = vld [vmem:[%s7197_s11 + $0x9c] sm:$0xff]  }
  0xa8   : > { %v2596_v31 = vsel %vm7270_vm7, %v2591_v23, %v2595_v4  ;;  %v2627_v33 = vrot.slane %v2625_v26, 5  ;;  %v2605_v37 = vrot.slane %v2604_v27, 4  ;;  %v2641_v43 = vshll.u32 %v6009_v21, 16  ;;  %v6018_v23 = vld [vmem:[%s7197_s11 + $0xa4] sm:$0x1] }
  0xa9   : > { %v6036_v36 = vcombine.low %v2586_v22, %v2596_v31  ;;  %v2615_v38 = vrot.slane %v2614_v18, 4  ;;  %v2633_v39 = vrot.slane %v2631_v29, 5  ;;  %v2637_v42 = vrot.slane %v2635_v34, 4  ;;  %v6017_v22 = vld [vmem:[%s7197_s11 + $0xa0] sm:$0xf] }
  0xaa   : > { %v2628_v41 = vor.u32 %v2627_v33, %v2624_v32  ;;  %v2646_v45 = vshrl.u32 %v6010_v30, 16  ;;  %v2610_v47 = vsel %vm7270_vm7, %v2605_v37, %v2609_v16  ;;  %v2649_v49 = vshll.u32 %v6010_v30, 16  ;;  %v6020_v32 = vld [vmem:[%s7197_s11 + $0xac] sm:$0xf] }
  0xab   : > { %6713 = vmatmul.mubr.msk.bf16.gmra.mxu0 %vm326_vm1, %v6036_v36  ;;  %v2620_v48 = vsel %vm7270_vm7, %v2615_v38, %v2619_v28  ;;  %v2655_v50 = vshll.u32 %v6011_v35, 16  ;;  %v2638_v59 = vor.u32 %v2637_v42, %v2633_v39  ;;  %v2643_v60 = vrot.slane %v2641_v43, 5  ;;  %v6019_v28 = vld [vmem:[%s7197_s11 + $0xa8] sm:$0xf] }
  0xac   : > { %v6037_v56 = vcombine.low %v2610_v47, %v2620_v48  ;;  %v2629_v57 = vrot.slane %v2628_v41, 4  ;;  %6683 = vmatmul.mubr.msk.bf16.gmra.mxu1 %vm326_vm1, %v6957_v24  ;;  %v2648_v61 = vrot.slane %v2646_v45, 4  ;;  %v2651_v62 = vrot.slane %v2649_v49, 5  ;;  %v6021_v47 = vld [vmem:[%s7197_s11 + $0xb0] sm:$0x1] }
  0xad   : > { %v2657_v58 = vrot.slane %v2655_v50, 5  ;;  %v2659_v63 = vshrl.u32 %v6011_v35, 16  ;;  %v2639_v3 = vrot.slane %v2638_v59, 4  ;;  %6686 = vmatprep.mubr.msk.bf16.mxu1 %vm326_vm1, %v6958_v44  ;;  %v2665_v4 = vshll.u32 %v6012_v40, 16 }
  0xae   : > { %6716 = vmatprep.mubr.msk.bf16.mxu0 %vm326_vm1, %v6037_v56  ;;  %v2634_v2 = vsel %vm7270_vm7, %v2629_v57, %v2633_v39  ;;  %v2670_v5 = vshrl.u32 %v6013_v46, 16  ;;  %v2652_v6 = vor.u32 %v2651_v62, %v2648_v61  ;;  %v2673_v8 = vshll.u32 %v6013_v46, 16  ;;  %v6022_v57 = vld [vmem:[%s7197_s11 + $0xb4] sm:$0xf] }
  0xaf   : > { %v2661_v7 = vrot.slane %v2659_v63, 4  ;;  %v2679_v9 = vshll.u32 %v6014_v51, 16  ;;  %v2644_v10 = vsel %vm7270_vm7, %v2639_v3, %v2643_v60  ;;  %v2667_v12 = vrot.slane %v2665_v4, 5  ;;  %v6961_v60 = vld [vmem:[%s7197_s11 + $0xa8] sm:$0xff]   ;;  %v6962_v63 = vld [vmem:[%s7197_s11 + $0xb4] sm:$0xff]  }
  0xb0   : > { %v2672_v13 = vrot.slane %v2670_v5, 4  ;;  %v2683_v14 = vshrl.u32 %v6014_v51, 16  ;;  %v6038_v15 = vcombine.low %v2634_v2, %v2644_v10  ;;  %v2653_v16 = vrot.slane %v2652_v6, 4  ;;  %v6024_v6 = vld [vmem:[%s7197_s11 + $0xbc] sm:$0x1] }
  0xb1   : > { %v2662_v17 = vor.u32 %v2661_v7, %v2657_v58  ;;  %v2675_v20 = vrot.slane %v2673_v8, 5  ;;  %v2681_v25 = vrot.slane %v2679_v9, 5  ;;  %v2689_v27 = vshll.u32 %v6015_v0, 16  ;;  %v6023_v0 = vld [vmem:[%s7197_s11 + $0xb8] sm:$0xf] }
  0xb2   : > { %v2685_v26 = vrot.slane %v2683_v14, 4  ;;  %v2694_v18 = vshrl.u32 %v6016_v53, 16  ;;  %v2658_v21 = vsel %vm7270_vm7, %v2653_v16, %v2657_v58  ;;  %v2697_v31 = vshll.u32 %v6016_v53, 16  ;;  %v6025_v7 = vld [vmem:[%s7197_s11 + $0xc0] sm:$0xf] }
  0xb3   : > { %6717 = vmatmul.mubr.msk.bf16.gmra.mxu0 %vm326_vm1, %v6038_v15  ;;  %v2663_v29 = vrot.slane %v2662_v17, 4  ;;  %v2676_v30 = vor.u32 %v2675_v20, %v2672_v13  ;;  %v2691_v34 = vrot.slane %v2689_v27, 5  ;;  %v2703_v36 = vshll.u32 %v6017_v22, 16  ;;  %v6027_v27 = vld [vmem:[%s7197_s11 + $0xc8] sm:$0x1] }
  0xb4   : > { %v2686_v33 = vor.u32 %v2685_v26, %v2681_v25  ;;  %v2696_v35 = vrot.slane %v2694_v18, 4  ;;  %6687 = vmatmul.mubr.msk.bf16.gmra.mxu1 %vm326_vm1, %v6959_v11  ;;  %v2699_v38 = vrot.slane %v2697_v31, 5  ;;  %v2707_v39 = vshrl.u32 %v6017_v22, 16  ;;  %v6026_v11 = vld [vmem:[%s7197_s11 + $0xc4] sm:$0xf] }
  0xb5   : > { %v2668_v24 = vsel %vm7270_vm7, %v2663_v29, %v2667_v12  ;;  %v2677_v37 = vrot.slane %v2676_v30, 4  ;;  %6690 = vmatprep.mubr.msk.bf16.mxu1 %vm326_vm1, %v6960_v19  ;;  %v2705_v42 = vrot.slane %v2703_v36, 5  ;;  %v2713_v43 = vshll.u32 %v6018_v23, 16  ;;  %v6061_v30 = vld [vmem:[%s7197_s11 + $0xc] sm:$0xe] }
  0xb6   : > { %v6039_v40 = vcombine.low %v2658_v21, %v2668_v24  ;;  %v2687_v41 = vrot.slane %v2686_v33, 4  ;;  %v2700_v45 = vor.u32 %v2699_v38, %v2696_v35  ;;  %v2709_v46 = vrot.slane %v2707_v39, 4  ;;  %v6062_v31 = vld [vmem:[%s7197_s11 + $0x10] sm:$0xf]  ;;  %v6063_v36 = vld [vmem:[%s7197_s11 + $0x14] sm:$0x1] }
  0xb7   : > { %v2682_v44 = vsel %vm7270_vm7, %v2677_v37, %v2681_v25  ;;  %v2718_v48 = vshrl.u32 %v6019_v28, 16  ;;  %v2715_v50 = vrot.slane %v2713_v43, 5  ;;  %v2721_v51 = vshll.u32 %v6019_v28, 16  ;;  %v6963_v24 = vld [vmem:[%s7197_s11 + $0xc0] sm:$0xff]  }
  0xb8   : > { %6720 = vmatprep.mubr.msk.bf16.mxu0 %vm326_vm1, %v6039_v40  ;;  %v2692_v49 = vsel %vm7270_vm7, %v2687_v41, %v2691_v34  ;;  %v2727_v56 = vshll.u32 %v6020_v32, 16  ;;  %v2701_v61 = vrot.slane %v2700_v45, 4  ;;  %v2710_v62 = vor.u32 %v2709_v46, %v2705_v42  ;;  %v6064_v41 = vld [vmem:[%s7197_s11 + $0x18] sm:$0xe]  ;;  %v6065_v46 = vld [vmem:[%s7197_s11 + $0x1c] sm:$0xf] }
  0xb9   : > { %v6040_v59 = vcombine.low %v2682_v44, %v2692_v49  ;;  %v2720_v58 = vrot.slane %v2718_v48, 4  ;;  %v2723_v2 = vrot.slane %v2721_v51, 5  ;;  %v2731_v4 = vshrl.u32 %v6020_v32, 16 }
  0xba   : > { %v2729_v3 = vrot.slane %v2727_v56, 5  ;;  %v2737_v5 = vshll.u32 %v6021_v47, 16  ;;  %v2706_v8 = vsel %vm7270_vm7, %v2701_v61, %v2705_v42  ;;  %v2711_v9 = vrot.slane %v2710_v62, 4  ;;  %v6066_v47 = vld [vmem:[%s7197_s11 + $0x20] sm:$0x1] }
  0xbb   : > { %6721 = vmatmul.mubr.msk.bf16.gmra.mxu0 %vm326_vm1, %v6040_v59  ;;  %v2742_v53 = vshrl.u32 %v6022_v57, 16  ;;  %v2745_v10 = vshll.u32 %v6022_v57, 16  ;;  %v2724_v12 = vor.u32 %v2723_v2, %v2720_v58  ;;  %v2733_v13 = vrot.slane %v2731_v4, 4  ;;  %v6067_v56 = vld [vmem:[%s7197_s11 + $0x24] sm:$0xe] }
  0xbc   : > { %v2739_v14 = vrot.slane %v2737_v5, 5  ;;  %v2751_v19 = vshll.u32 %v6023_v0, 16  ;;  %6691 = vmatmul.mubr.msk.bf16.gmra.mxu1 %vm326_vm1, %v6961_v60  ;;  %v2716_v15 = vsel %vm7270_vm7, %v2711_v9, %v2715_v50  ;;  %v2755_v20 = vshrl.u32 %v6023_v0, 16  ;;  %v6068_v57 = vld [vmem:[%s7197_s11 + $0x28] sm:$0xf] }
  0xbd   : > { %v2744_v16 = vrot.slane %v2742_v53, 4  ;;  %v2747_v17 = vrot.slane %v2745_v10, 5  ;;  %v6041_v22 = vcombine.low %v2706_v8, %v2716_v15  ;;  %v2725_v23 = vrot.slane %v2724_v12, 4  ;;  %6694 = vmatprep.mubr.msk.bf16.mxu1 %vm326_vm1, %v6962_v63  ;;  %v6069_v58 = vld [vmem:[%s7197_s11 + $0x2c] sm:$0x1]  ;;  %v6964_v15 = vld [vmem:[%s7197_s11 + $0x18] sm:$0xff]  }
  0xbe   : > { %v2734_v25 = vor.u32 %v2733_v13, %v2729_v3  ;;  %v2753_v26 = vrot.slane %v2751_v19, 5  ;;  %v2757_v28 = vrot.slane %v2755_v20, 4  ;;  %v2761_v21 = vshll.u32 %v6024_v6, 16  ;;  %v6070_v8 = vld [vmem:[%s7197_s11 + $0x30] sm:$0xe] }
  0xbf   : > { %v2748_v18 = vor.u32 %v2747_v17, %v2744_v16  ;;  %v2766_v29 = vshrl.u32 %v6025_v7, 16  ;;  %6724 = vmatprep.mubr.msk.bf16.mxu0 %vm326_vm1, %v6041_v22  ;;  %v2730_v32 = vsel %vm7270_vm7, %v2725_v23, %v2729_v3  ;;  %v2769_v34 = vshll.u32 %v6025_v7, 16  ;;  %v6071_v9 = vld [vmem:[%s7197_s11 + $0x34] sm:$0xf]  ;;  %v6072_v13 = vld [vmem:[%s7197_s11 + $0x38] sm:$0x1] }
  0xc0   : > { %v2735_v33 = vrot.slane %v2734_v25, 4  ;;  %v2775_v35 = vshll.u32 %v6026_v11, 16  ;;  %v2758_v38 = vor.u32 %v2757_v28, %v2753_v26  ;;  %v2763_v39 = vrot.slane %v2761_v21, 5  ;;  %v6073_v20 = vld [vmem:[%s7197_s11 + $0x3c] sm:$0xe] }
  0xc1   : > { %v2749_v37 = vrot.slane %v2748_v18, 4  ;;  %v2768_v40 = vrot.slane %v2766_v29, 4  ;;  %v2771_v43 = vrot.slane %v2769_v34, 5  ;;  %v2779_v45 = vshrl.u32 %v6026_v11, 16  ;;  %v6076_v18 = vld [vmem:[%s7197_s11 + $0x48] sm:$0xe] }
  0xc2   : > { %v2740_v42 = vsel %vm7270_vm7, %v2735_v33, %v2739_v14  ;;  %v2777_v44 = vrot.slane %v2775_v35, 5  ;;  %v2759_v50 = vrot.slane %v2758_v38, 4  ;;  %v2785_v51 = vshll.u32 %v6027_v27, 16  ;;  %v6075_v27 = vld [vmem:[%s7197_s11 + $0x44] sm:$0x1] }
  0xc3   : > { %v6042_v48 = vcombine.low %v2730_v32, %v2740_v42  ;;  %v2754_v49 = vsel %vm7270_vm7, %v2749_v37, %v2753_v26  ;;  %v2772_v59 = vor.u32 %v2771_v43, %v2768_v40  ;;  %v2781_v60 = vrot.slane %v2779_v45, 4  ;;  %v6074_v26 = vld [vmem:[%s7197_s11 + $0x40] sm:$0xf]  ;;  %v6077_v28 = vld [vmem:[%s7197_s11 + $0x4c] sm:$0xf] }
  0xc4   : > { %v6109_v61 = vrot.slane %v6061_v30, 9  ;;  %v3245_v62 = vrot.slane %v6062_v31, 5  ;;  %6695 = vmatmul.mubr.msk.bf16.gmra.mxu1 %vm326_vm1, %v6963_v24  ;;  %v2764_v63 = vsel %vm7270_vm7, %v2759_v50, %v2763_v39  ;;  %v2787_v0 = vrot.slane %v2785_v51, 5  ;;  %v6078_v32 = vld [vmem:[%s7197_s11 + $0x50] sm:$0x1] }
  0xc5   : > { %6725 = vmatmul.mubr.msk.bf16.gmra.mxu0 %vm326_vm1, %v6042_v48  ;;  %v3248_v2 = vrot.slane %v6063_v36, 5  ;;  %v6110_v3 = vrot.slane %v6064_v41, 9  ;;  %v6043_v4 = vcombine.low %v2754_v49, %v2764_v63  ;;  %v2773_v5 = vrot.slane %v2772_v59, 4  ;;  %v6079_v33 = vld [vmem:[%s7197_s11 + $0x54] sm:$0xe] }
  0xc6   : > { %v2782_v6 = vor.u32 %v2781_v60, %v2777_v44  ;;  %v3246_v7 = vsel %vm7263_vm6, %v6109_v61, %v3245_v62  ;;  %v3247_v53 = vrot.slane %v3245_v62, 4  ;;  %v3252_v10 = vrot.slane %v6065_v46, 5  ;;  %v6080_v34 = vld [vmem:[%s7197_s11 + $0x58] sm:$0xf]  ;;  %v6081_v42 = vld [vmem:[%s7197_s11 + $0x5c] sm:$0x1] }
  0xc7   : > { %v3255_v11 = vrot.slane %v6066_v47, 5  ;;  %v4667_v12 = vsel %vm375_vm0, %v7614_v1, 0  ;;  %6728 = vmatprep.mubr.msk.bf16.mxu0 %vm326_vm1, %v6043_v4  ;;  %v2778_v14 = vsel %vm7270_vm7, %v2773_v5, %v2777_v44  ;;  %v6111_v16 = vrot.slane %v6067_v56, 9  ;;  %v6082_v47 = vld [vmem:[%s7197_s11 + $0x60] sm:$0xe] }
  0xc8   : > { %v2783_v19 = vrot.slane %v2782_v6, 4  ;;  %v3259_v17 = vrot.slane %v6068_v57, 5  ;;  %v3249_v22 = vsel %vm7263_vm6, %v3247_v53, %v3248_v2  ;;  %v3253_v1 = vsel %vm7263_vm6, %v6110_v3, %v3252_v10  ;;  %v6083_v48 = vld [vmem:[%s7197_s11 + $0x64] sm:$0xf]  ;;  %v6084_v56 = vld [vmem:[%s7197_s11 + $0x68] sm:$0x1] }
  0xc9   : > { %v3254_v23 = vrot.slane %v3252_v10, 4  ;;  %v3262_v25 = vrot.slane %v6069_v58, 5  ;;  %v6126_v29 = vcombine.low %v3246_v7, %v3249_v22  ;;  %v6112_v24 = vrot.slane %v6070_v8, 9  ;;  %v6085_v62 = vld [vmem:[%s7197_s11 + $0x6c] sm:$0xe]  ;;  %v6965_v7 = vld [vmem:[%s7197_s11 + $0x24] sm:$0xff]  }
  0xca   : > { %v2788_v21 = vsel %vm7270_vm7, %v2783_v19, %v2787_v0  ;;  %v3260_v30 = vsel %vm7263_vm6, %v6111_v16, %v3259_v17  ;;  %v3261_v31 = vrot.slane %v3259_v17, 4  ;;  %v3266_v37 = vrot.slane %v6071_v9, 5  ;;  %v6086_v3 = vld [vmem:[%s7197_s11 + $0x70] sm:$0xf]  ;;  %v7776_v4 = vld [vmem:[%s7197_s11 + $0x74] sm:$0x1] }
  0xcb   : > { %v6044_v35 = vcombine.low %v2778_v14, %v2788_v21  ;;  %v3256_v36 = vsel %vm7263_vm6, %v3254_v23, %v3255_v11  ;;  %6734 = vmatprep.mubr.msk.bf16.mxu1 %vm326_vm1, %v6126_v29  ;;  %v3269_v40 = vrot.slane %v6072_v13, 5  ;;  %v7752_v41 = vsel %vm375_vm0, %v7647_v52, 0  ;;  %v6088_v5 = vld [vmem:[%s7197_s11 + $0x78] sm:$0xe]  ;;  %v6089_v6 = vld [vmem:[%s7197_s11 + $0x7c] sm:$0xf] }
  0xcc   : > { %v6127_v38 = vcombine.low %v3253_v1, %v3256_v36  ;;  %v3263_v39 = vsel %vm7263_vm6, %v3261_v31, %v3262_v25  ;;  %v3267_v44 = vsel %vm7263_vm6, %v6112_v24, %v3266_v37  ;;  %v3268_v45 = vrot.slane %v3266_v37, 4  ;;  %v7786_v11 = vld [vmem:[%s7197_s11 + $0x80] sm:$0x1]  ;;  %v6092_v13 = vld [vmem:[%s7197_s11 + $0x88] sm:$0xf]  ;;  %v6966_v17 = vld [vmem:[%s7197_s11 + $0x30] sm:$0xff]  }
  0xcd   : > { %6729 = vmatmul.mubr.msk.bf16.gmra.mxu0 %vm326_vm1, %v6044_v35  ;;  %v6128_v43 = vcombine.low %v3260_v30, %v3263_v39  ;;  %v6113_v46 = vrot.slane %v6073_v20, 9  ;;  %v3273_v49 = vrot.slane %v6074_v26, 5  ;;  %v3276_v52 = vrot.slane %v6075_v27, 5  ;;  %v6093_v25 = vld [vmem:[%s7197_s11 + $0x8c] sm:$0x1] }
  0xce   : > { %6735 = vmatmul.mubr.msk.bf16.vlgmr.msra.gmra.mxu1 %vm326_vm1, %v6127_v38  ;;  %6768 = vmatprep.mubr.msk.bf16.mxu0 %vm326_vm1, %v6964_v15  ;;  %v6114_v50 = vrot.slane %v6076_v18, 9  ;;  %v3280_v51 = vrot.slane %v6077_v28, 5  ;;  %v3270_v57 = vsel %vm7263_vm6, %v3268_v45, %v3269_v40  ;;  %v3283_v59 = vrot.slane %v6078_v32, 5  ;;  %v6094_v29 = vld [vmem:[%s7197_s11 + $0x90] sm:$0xe] }
  0xcf   : > { %6801 = vmatpush3.bf16.msra.mxu1 %v4667_v12  ;;  %6738 = vmatprep.mubr.msk.bf16.mxu1 %vm326_vm1, %v6128_v43  ;;  %v6115_v60 = vrot.slane %v6079_v33, 9  ;;  %v3287_v61 = vrot.slane %v6080_v34, 5  ;;  %v6129_v58 = vcombine.low %v3267_v44, %v3270_v57  ;;  %v3274_v63 = vsel %vm7263_vm6, %v6113_v46, %v3273_v49  ;;  %v6091_v12 = vld [vmem:[%s7197_s11 + $0x84] sm:$0xe]  ;;  %v6095_v30 = vld [vmem:[%s7197_s11 + $0x94] sm:$0xf] }
  0xd0   : > { %v3275_v0 = vrot.slane %v3273_v49, 4  ;;  %v7772_v2 = vsel %vm7263_vm6, %v6114_v50, %v3280_v51  ;;  %v3282_v8 = vrot.slane %v3280_v51, 4  ;;  %v3290_v10 = vrot.slane %v6081_v42, 5  ;;  %v6096_v35 = vld [vmem:[%s7197_s11 + $0x98] sm:$0x1] }
  0xd1   : > { %v7783_v9 = vsel %vm7263_vm6, %v6115_v60, %v3287_v61  ;;  %v3289_v53 = vrot.slane %v3287_v61, 4  ;;  %v6116_v19 = vrot.slane %v6082_v47, 9  ;;  %v3294_v15 = vrot.slane %v6083_v48, 5  ;;  %v6097_v42 = vld [vmem:[%s7197_s11 + $0x9c] sm:$0xe] }
  0xd2   : > { %v3277_v14 = vsel %vm7263_vm6, %v3275_v0, %v3276_v52  ;;  %v3297_v16 = vrot.slane %v6084_v56, 5  ;;  %v7795_v22 = vsel %vm7263_vm6, %v3282_v8, %v3283_v59  ;;  %v6117_v23 = vrot.slane %v6085_v62, 9  ;;  %v6098_v46 = vld [vmem:[%s7197_s11 + $0xa0] sm:$0xf]  ;;  %v7845_v47 = vld [vmem:[%s7197_s11 + $0xa4] sm:$0x1] }
  0xd3   : > { %v6130_v20 = vcombine.low %v3274_v63, %v3277_v14  ;;  %v7799_v1 = vsel %vm7263_vm6, %v3289_v53, %v3290_v10  ;;  %v6131_v26 = vcombine.low %v7772_v2, %v7795_v22  ;;  %v7808_v18 = vsel %vm7263_vm6, %v6116_v19, %v3294_v15  ;;  %v6100_v48 = vld [vmem:[%s7197_s11 + $0xa8] sm:$0xe]  ;;  %v6101_v49 = vld [vmem:[%s7197_s11 + $0xac] sm:$0xf]  ;;  %v7856_v60 = vld [vmem:[%s7197_s11 + $0xb0] sm:$0x1] }
  0xd4   : > { %v6132_v27 = vcombine.low %v7783_v9, %v7799_v1  ;;  %v3296_v28 = vrot.slane %v3294_v15, 4  ;;  %v3301_v31 = vrot.slane %v6086_v3, 5  ;;  %v3304_v32 = vrot.slane %v7776_v4, 5  ;;  %v6103_v61 = vld [vmem:[%s7197_s11 + $0xb4] sm:$0xe]  ;;  %v6967_v62 = vld [vmem:[%s7197_s11 + $0x3c] sm:$0xff]  }
  0xd5   : > { %6769 = vmatmul.mubr.msk.bf16.vlgmr.msra.gmra.mxu0 %vm326_vm1, %v6965_v7  ;;  %v6118_v33 = vrot.slane %v6088_v5, 9  ;;  %v3308_v34 = vrot.slane %v6089_v6, 5  ;;  %v3311_v24 = vrot.slane %v7786_v11, 5  ;;  %v6119_v39 = vrot.slane %v6091_v12, 9  ;;  %v6968_v4 = vld [vmem:[%s7197_s11 + $0x48] sm:$0xff]  }
  0xd6   : > { %6739 = vmatmul.mubr.msk.bf16.gmra.mxu1 %vm326_vm1, %v6129_v58  ;;  %6835 = vmatpush3.bf16.msra.mxu0 %v7752_v41  ;;  %v7824_v36 = vsel %vm7263_vm6, %v3296_v28, %v3297_v16  ;;  %v3315_v40 = vrot.slane %v6092_v13, 5  ;;  %v7836_v43 = vsel %vm7263_vm6, %v6117_v23, %v3301_v31  ;;  %v3303_v44 = vrot.slane %v3301_v31, 4  ;;  %v6104_v11 = vld [vmem:[%s7197_s11 + $0xb8] sm:$0xf]  ;;  %v6105_v15 = vld [vmem:[%s7197_s11 + $0xbc] sm:$0x1] }
  0xd7   : > { %6772 = vmatprep.mubr.msk.bf16.mxu0 %vm326_vm1, %v6966_v17  ;;  %6742 = vmatprep.mubr.msk.bf16.mxu1 %vm326_vm1, %v6130_v20  ;;  %v6133_v41 = vcombine.low %v7808_v18, %v7824_v36  ;;  %v7840_v45 = vsel %vm7263_vm6, %v6118_v33, %v3308_v34  ;;  %v3310_v52 = vrot.slane %v3308_v34, 4  ;;  %v3318_v59 = vrot.slane %v6093_v25, 5  ;;  %v6106_v16 = vld [vmem:[%s7197_s11 + $0xc0] sm:$0xe]  ;;  %v6108_v34 = vld [vmem:[%s7197_s11 + $0xc8] sm:$0x1] }
  0xd8   : > { %v7853_v56 = vsel %vm7263_vm6, %v6119_v39, %v3315_v40  ;;  %v3317_v57 = vrot.slane %v3315_v40, 4  ;;  %v7862_v58 = vsel %vm7263_vm6, %v3303_v44, %v3304_v32  ;;  %v6120_v63 = vrot.slane %v6094_v29, 9  ;;  %v6107_v29 = vld [vmem:[%s7197_s11 + $0xc4] sm:$0xf]  ;;  %v6223_v22 = vld [vmem:[%s7197_s11 + $0x18] sm:$0xf] }
  0xd9   : > { %v3322_v0 = vrot.slane %v6095_v30, 5  ;;  %v3325_v3 = vrot.slane %v6096_v35, 5  ;;  %v6134_v5 = vcombine.low %v7836_v43, %v7862_v58  ;;  %v7870_v6 = vsel %vm7263_vm6, %v3310_v52, %v3311_v24  ;;  %v6224_v52 = vld [vmem:[%s7197_s11 + $0x1c] sm:$0xf] }
  0xda   : > { %v7874_v8 = vsel %vm7263_vm6, %v3317_v57, %v3318_v59  ;;  %v6121_v10 = vrot.slane %v6097_v42, 9  ;;  %v6135_v12 = vcombine.low %v7840_v45, %v7870_v6  ;;  %v3329_v23 = vrot.slane %v6098_v46, 5 }
  0xdb   : > { %v6136_v13 = vcombine.low %v7853_v56, %v7874_v8  ;;  %v7886_v14 = vsel %vm7263_vm6, %v6120_v63, %v3322_v0  ;;  %v3324_v19 = vrot.slane %v3322_v0, 4  ;;  %v3332_v25 = vrot.slane %v7845_v47, 5  ;;  %v6226_v63 = vld [vmem:[%s7197_s11 + $0x24] sm:$0xf] }
  0xdc   : > { %v6122_v28 = vrot.slane %v6100_v48, 9  ;;  %v3339_v31 = vrot.slane %v7856_v60, 5  ;;  %v6123_v32 = vrot.slane %v6103_v61, 9  ;;  %v3343_v33 = vrot.slane %v6104_v11, 5  ;;  %v6225_v61 = vld [vmem:[%s7197_s11 + $0x20] sm:$0x1] }
  0xdd   : > { %6773 = vmatmul.mubr.msk.bf16.gmra.mxu0 %vm326_vm1, %v6967_v62  ;;  %v7898_v30 = vsel %vm7263_vm6, %v3324_v19, %v3325_v3  ;;  %v7913_v39 = vsel %vm7263_vm6, %v6121_v10, %v3329_v23  ;;  %v3331_v40 = vrot.slane %v3329_v23, 4  ;;  %v3346_v46 = vrot.slane %v6105_v15, 5  ;;  %v6970_v0 = vld [vmem:[%s7197_s11 + $0x60] sm:$0xff]   ;;  %v6227_v15 = vld [vmem:[%s7197_s11 + $0x28] sm:$0xf] }
  0xde   : > { %v6582_v21 = vpop.f32.mrf.mxu1  ;;  %6743 = vmatmul.mubr.msk.bf16.gmra.mxu1 %vm326_vm1, %v6131_v26  ;;  %6776 = vmatprep.mubr.msk.bf16.mxu0 %vm326_vm1, %v6968_v4  ;;  %v6137_v35 = vcombine.low %v7886_v14, %v7898_v30  ;;  %v7927_v42 = vsel %vm7263_vm6, %v6123_v32, %v3343_v33  ;;  %v3345_v44 = vrot.slane %v3343_v33, 4  ;;  %v6124_v9 = vrot.slane %v6106_v16, 9 }
  0xdf   : > { %558 = vst [vmem:[%s7816_s10 + $0x90] sm:$0xff] %v6582_v21  ;;  %v7827_v38 = vpop.f32.mrf.mxu0  ;;  %v3336_v21 = vrot.slane %v6101_v49, 5  ;;  %6746 = vmatprep.mubr.msk.bf16.mxu1 %vm326_vm1, %v6132_v27  ;;  %v7933_v49 = vsel %vm7263_vm6, %v3331_v40, %v3332_v25  ;;  %v3350_v1 = vrot.slane %v6107_v29, 5  ;;  %v3353_v27 = vrot.slane %v6108_v34, 5 }
  0xe0   : > { %v477_v37 = vpop.f32.mrf.mxu1  ;;  %v6138_v57 = vcombine.low %v7913_v39, %v7933_v49  ;;  %v7946_v60 = vsel %vm7263_vm6, %v3345_v44, %v3346_v46  ;;  %v4185_v62 = vshrl.u32 %v6223_v22, 16  ;;  %v4194_v23 = vshll.u32 %v6224_v52, 16  ;;  %v6305_v46 = vld [vmem:[%s7197_s11 + $0x1c] sm:$0xf] }
  0xe1   : > { %556 = vst [vmem:[%s7816_s10 + $0x80] sm:$0xff] %v477_v37  ;;  %v7849_v51 = vpop.f32.mrf.mxu0  ;;  %v7917_v2 = vsel %vm7263_vm6, %v6122_v28, %v3336_v21  ;;  %v3338_v26 = vrot.slane %v3336_v21, 4  ;;  %v7959_v11 = vsel %vm7263_vm6, %v6124_v9, %v3350_v1  ;;  %v3352_v19 = vrot.slane %v3350_v1, 4  ;;  %v6228_v28 = vld [vmem:[%s7197_s11 + $0x2c] sm:$0x1] }
  0xe2   : > { %v6583_v50 = vpop.f32.mrf.mxu1  ;;  %v4187_v16 = vrot.slane %v4185_v62, 4  ;;  %v4198_v25 = vshrl.u32 %v6224_v52, 16  ;;  %v4204_v32 = vshll.u32 %v6225_v61, 16  ;;  %v4209_v33 = vshrl.u32 %v6226_v63, 16  ;;  %v6306_v62 = vld [vmem:[%s7197_s11 + $0x20] sm:$0x1] }
  0xe3   : > { %559 = vst [vmem:[%s7816_s10 + $0x98] sm:$0xff] %v6583_v50  ;;  %v7876_v53 = vpop.f32.mrf.mxu0  ;;  %v6969_v50 = vld [vmem:[%s7197_s11 + $0x54] sm:$0xff]   ;;  %v7942_v59 = vsel %vm7263_vm6, %v3338_v26, %v3339_v31  ;;  %v7968_v31 = vsel %vm7263_vm6, %v3352_v19, %v3353_v27  ;;  %v4212_v34 = vshll.u32 %v6226_v63, 16  ;;  %v4196_v26 = vrot.slane %v4194_v23, 5  ;;  %v6307_v63 = vld [vmem:[%s7197_s11 + $0x24] sm:$0xe] }
  0xe4   : > { %v480_v7 = vpop.f32.mrf.mxu1  ;;  %v4200_v44 = vrot.slane %v4198_v25, 4  ;;  %v4206_v1 = vrot.slane %v4204_v32, 5  ;;  %v4211_v27 = vrot.slane %v4209_v33, 4  ;;  %v4228_v61 = vshll.u32 %v6228_v28, 16  ;;  %v6972_v32 = vld [vmem:[%s7197_s11 + $0x78] sm:$0xff]  }
  0xe5   : > { %557 = vst [vmem:[%s7816_s10 + $0x88] sm:$0xff] %v480_v7  ;;  %v7890_v20 = vpop.f32.mrf.mxu0  ;;  %6777 = vmatmul.mubr.msk.bf16.gmra.mxu0 %vm326_vm1, %v6969_v50  ;;  %v4214_v52 = vrot.slane %v4212_v34, 5  ;;  %v4218_v50 = vshll.u32 %v6227_v15, 16  ;;  %v5024_v58 = vrot.slane %v6305_v46, 5  ;;  %v5027_v46 = vrot.slane %v6306_v62, 5 }
  0xe6   : > { %v6586_v17 = vpop.f32.mrf.mxu1  ;;  %6747 = vmatmul.mubr.msk.bf16.gmra.mxu1 %vm326_vm1, %v6133_v41  ;;  %6780 = vmatprep.mubr.msk.bf16.mxu0 %vm326_vm1, %v6970_v0  ;;  %v4201_v36 = vor.u32 %v4200_v44, %v4196_v26  ;;  %v4222_v41 = vshrl.u32 %v6227_v15, 16  ;;  %v6971_v0 = vld [vmem:[%s7197_s11 + $0x6c] sm:$0xff]   ;;  %v4230_v28 = vrot.slane %v4228_v61, 5 }
  0xe7   : > { %562 = vst [vmem:[%s7816_s10 + $0xb0] sm:$0xff] %v6586_v17  ;;  %v7909_v37 = vpop.f32.mrf.mxu0  ;;  %v4188_v17 = vshll.u32 %v6223_v22, 16  ;;  %6750 = vmatprep.mubr.msk.bf16.mxu1 %vm326_vm1, %v6134_v5  ;;  %v4220_v23 = vrot.slane %v4218_v50, 5  ;;  %v6308_v5 = vld [vmem:[%s7197_s11 + $0x28] sm:$0xf] }
  0xe8   : > { %v493_v24 = vpop.f32.mrf.mxu1  ;;  %v4202_v25 = vrot.slane %v4201_v36, 4  ;;  %v4224_v15 = vrot.slane %v4222_v41, 4  ;;  %v6230_v36 = vld [vmem:[%s7197_s11 + $0x34] sm:$0xf] }
  0xe9   : > { %560 = vst [vmem:[%s7816_s10 + $0xa0] sm:$0xff] %v493_v24  ;;  %v7929_v48 = vpop.f32.mrf.mxu0  ;;  %v6304_v24 = vld [vmem:[%s7197_s11 + $0x18] sm:$0xe]  ;;  %v4190_v22 = vrot.slane %v4188_v17, 5  ;;  %v4215_v17 = vor.u32 %v4214_v52, %v4211_v27 }
  0xea   : > { %v6587_v47 = vpop.f32.mrf.mxu1  ;;  %v6352_v43 = vrot.slane %v6304_v24, 9  ;;  %v5026_v24 = vrot.slane %v5024_v58, 4  ;;  %v4207_v52 = vsel %vm7270_vm7, %v4202_v25, %v4206_v1  ;;  %v4225_v50 = vor.u32 %v4224_v15, %v4220_v23 }
  0xeb   : > { %563 = vst [vmem:[%s7816_s10 + $0xb8] sm:$0xff] %v6587_v47  ;;  %v7951_v4 = vpop.f32.mrf.mxu0  ;;  %v4191_v18 = vor.u32 %v4190_v22, %v4187_v16  ;;  %v4216_v22 = vrot.slane %v4215_v17, 4 }
  0xec   : > { %v496_v3 = vpop.f32.mrf.mxu1  ;;  %v8001_v44 = vsel %vm7263_vm6, %v6352_v43, %v5024_v58  ;;  %v8018_v17 = vsel %vm7263_vm6, %v5026_v24, %v5027_v46  ;;  %v5031_v43 = vrot.slane %v6308_v5, 5  ;;  %v4226_v1 = vrot.slane %v4225_v50, 4 }
  0xed   : > { %561 = vst [vmem:[%s7816_s10 + $0xa8] sm:$0xff] %v496_v3  ;;  %v7964_v29 = vpop.f32.mrf.mxu0  ;;  %v4192_v16 = vrot.slane %v4191_v18, 4  ;;  %v6353_v18 = vrot.slane %v6307_v63, 9  ;;  %v4221_v62 = vsel %vm7270_vm7, %v4216_v22, %v4220_v23  ;;  %6781 = vmatmul.mubr.msk.bf16.gmra.mxu0 %vm326_vm1, %v6971_v0  ;;  %v6233_v22 = vld [vmem:[%s7197_s11 + $0x40] sm:$0xf] }
  0xee   : > { %v6590_v21 = vpop.f32.mrf.mxu1  ;;  %6751 = vmatmul.mubr.msk.bf16.gmra.mxu1 %vm326_vm1, %v6135_v12  ;;  %6784 = vmatprep.mubr.msk.bf16.mxu0 %vm326_vm1, %v6972_v32  ;;  %v5033_v25 = vrot.slane %v5031_v43, 4  ;;  %v4231_v45 = vsel %vm7270_vm7, %v4226_v1, %v4230_v28  ;;  %v4246_v12 = vshrl.u32 %v6230_v36, 16  ;;  %v6310_v28 = vld [vmem:[%s7197_s11 + $0x30] sm:$0xe] }
  0xef   : > { %566 = vst [vmem:[%s7816_s10 + $0xd0] sm:$0xff] %v6590_v21  ;;  %v7981_v9 = vpop.f32.mrf.mxu0  ;;  %v6309_v21 = vld [vmem:[%s7197_s11 + $0x2c] sm:$0x1]  ;;  %v4197_v27 = vsel %vm7270_vm7, %v4192_v16, %v4196_v26  ;;  %v6231_v26 = vld [vmem:[%s7197_s11 + $0x38] sm:$0x1]  ;;  %v8034_v0 = vsel %vm7263_vm6, %v6353_v18, %v5031_v43  ;;  %6754 = vmatprep.mubr.msk.bf16.mxu1 %vm326_vm1, %v6136_v13  ;;  %v6354_v63 = vrot.slane %v6310_v28, 9 }
  0xf0   : > { %v509_v47 = vpop.f32.mrf.mxu1  ;;  %v5034_v58 = vrot.slane %v6309_v21, 5  ;;  %v4242_v21 = vshll.u32 %v6230_v36, 16  ;;  %v4252_v32 = vshll.u32 %v6231_v26, 16  ;;  %v4248_v18 = vrot.slane %v4246_v12, 4 }
  0xf1   : > { %564 = vst [vmem:[%s7816_s10 + $0xc0] sm:$0xff] %v509_v47  ;;  %v7991_v19 = vpop.f32.mrf.mxu0  ;;  %v6229_v47 = vld [vmem:[%s7197_s11 + $0x30] sm:$0xf] }
  0xf2   : > { %v6591_v3 = vpop.f32.mrf.mxu1  ;;  %v4233_v16 = vshrl.u32 %v6229_v47, 16  ;;  %v4236_v15 = vshll.u32 %v6229_v47, 16  ;;  %v8047_v47 = vcombine.low %v4221_v62, %v4231_v45  ;;  %v8051_v56 = vsel %vm7263_vm6, %v5033_v25, %v5034_v58  ;;  %v6974_v62 = vld [vmem:[%s7197_s11 + $0x90] sm:$0xff]  }
  0xf3   : > { %567 = vst [vmem:[%s7816_s10 + $0xd8] sm:$0xff] %v6591_v3  ;;  %v7997_v34 = vpop.f32.mrf.mxu0  ;;  %v8012_v3 = vcombine.low %v4197_v27, %v4207_v52  ;;  %v4244_v13 = vrot.slane %v4242_v21, 5  ;;  %v6234_v27 = vld [vmem:[%s7197_s11 + $0x44] sm:$0x1]  ;;  %v4254_v36 = vrot.slane %v4252_v32, 5 }
  0xf4   : > { %v512_v33 = vpop.f32.mrf.mxu1  ;;  %v4235_v6 = vrot.slane %v4233_v16, 4  ;;  %v4238_v8 = vrot.slane %v4236_v15, 5  ;;  %v6973_v52 = vld [vmem:[%s7197_s11 + $0x84] sm:$0xff]   ;;  %v4266_v16 = vshll.u32 %v6233_v22, 16  ;;  %v6311_v25 = vld [vmem:[%s7197_s11 + $0x34] sm:$0xf] }
  0xf5   : > { %565 = vst [vmem:[%s7816_s10 + $0xc8] sm:$0xff] %v512_v33  ;;  %v8010_v61 = vpop.f32.mrf.mxu0  ;;  %v6232_v33 = vld [vmem:[%s7197_s11 + $0x3c] sm:$0xf]  ;;  %v4249_v15 = vor.u32 %v4248_v18, %v4244_v13  ;;  %v4276_v45 = vshll.u32 %v6234_v27, 16  ;;  %6785 = vmatmul.mubr.msk.bf16.gmra.mxu0 %vm326_vm1, %v6973_v52 }
  0xf6   : > { %v6594_v41 = vpop.f32.mrf.mxu1  ;;  %v4239_v1 = vor.u32 %v4238_v8, %v4235_v6  ;;  %v4260_v58 = vshll.u32 %v6232_v33, 16  ;;  %v4268_v10 = vrot.slane %v4266_v16, 5  ;;  %v5038_v8 = vrot.slane %v6311_v25, 5  ;;  %6755 = vmatmul.mubr.msk.bf16.gmra.mxu1 %vm326_vm1, %v6137_v35  ;;  %6788 = vmatprep.mubr.msk.bf16.mxu0 %vm326_vm1, %v6974_v62 }
  0xf7   : > { %570 = vst [vmem:[%s7816_s10 + $0xf0] sm:$0xff] %v6594_v41  ;;  %v8030_v5 = vpop.f32.mrf.mxu0  ;;  %v4257_v41 = vshrl.u32 %v6232_v33, 16  ;;  %v4250_v6 = vrot.slane %v4249_v15, 4  ;;  %6758 = vmatprep.mubr.msk.bf16.mxu1 %vm326_vm1, %v6138_v57  ;;  %v6976_v15 = vld [vmem:[%s7197_s11 + $0xa8] sm:$0xff]  }
  0xf8   : > { %v525_v23 = vpop.f32.mrf.mxu1  ;;  %v4240_v12 = vrot.slane %v4239_v1, 4  ;;  %v4262_v32 = vrot.slane %v4260_v58, 5  ;;  %v5040_v57 = vrot.slane %v5038_v8, 4 }
  0xf9   : > { %568 = vst [vmem:[%s7816_s10 + $0xe0] sm:$0xff] %v525_v23  ;;  %v8045_v46 = vpop.f32.mrf.mxu0  ;;  %v4270_v23 = vshrl.u32 %v6233_v22, 16  ;;  %v4259_v21 = vrot.slane %v4257_v41, 4  ;;  %v4278_v22 = vrot.slane %v4276_v45, 5  ;;  %v4255_v35 = vsel %vm7270_vm7, %v4250_v6, %v4254_v36  ;;  %v6237_v6 = vld [vmem:[%s7197_s11 + $0x50] sm:$0x1] }
  0xfa   : > { %v6595_v24 = vpop.f32.mrf.mxu1  ;;  %v4245_v18 = vsel %vm7270_vm7, %v4240_v12, %v4244_v13  ;;  %v6315_v13 = vld [vmem:[%s7197_s11 + $0x44] sm:$0x1] }
  0xfb   : > { %571 = vst [vmem:[%s7816_s10 + $0xf8] sm:$0xff] %v6595_v24  ;;  %v8060_v26 = vpop.f32.mrf.mxu0  ;;  %v6312_v24 = vld [vmem:[%s7197_s11 + $0x38] sm:$0x1]  ;;  %v4272_v7 = vrot.slane %v4270_v23, 4  ;;  %v4263_v41 = vor.u32 %v4262_v32, %v4259_v21  ;;  %v8090_v58 = vcombine.low %v4245_v18, %v4255_v35  ;;  %v6238_v35 = vld [vmem:[%s7197_s11 + $0x54] sm:$0xf] }
  0xfc   : > { %v528_v43 = vpop.f32.mrf.mxu1 }
  0xfd   : > { %569 = vst [vmem:[%s7816_s10 + $0xe8] sm:$0xff] %v528_v43  ;;  %v8065_v40 = vpop.f32.mrf.mxu0  ;;  %v4273_v52 = vor.u32 %v4272_v7, %v4268_v10  ;;  %v6314_v43 = vld [vmem:[%s7197_s11 + $0x40] sm:$0xf]  ;;  %v8087_v7 = vsel %vm7263_vm6, %v6354_v63, %v5038_v8  ;;  %v4264_v39 = vrot.slane %v4263_v41, 4  ;;  %v6235_v63 = vld [vmem:[%s7197_s11 + $0x48] sm:$0xf] }
  0xfe   : > { %v6600_v50 = vpop.f32.mrf.mxu1  ;;  %v5045_v25 = vrot.slane %v6314_v43, 5 }
  0xff   : > { %v1303_v33 = vadd.f32 %v6600_v50, %v7827_v38  ;;  %v6634_v28 = vpop.f32.mrf.mxu0  ;;  %v5041_v38 = vrot.slane %v6312_v24, 5  ;;  %v6313_v50 = vld [vmem:[%s7197_s11 + $0x3c] sm:$0xe]  ;;  %v4274_v49 = vrot.slane %v4273_v52, 4  ;;  %v4269_v24 = vsel %vm7270_vm7, %v4264_v39, %v4268_v10 }
 0x100   : > { %v1142_v27 = vpop.f32.mrf.mxu1  ;;  %v6355_v23 = vrot.slane %v6313_v50, 9  ;;  %v5047_v41 = vrot.slane %v5045_v25, 4  ;;  %v4281_v52 = vshrl.u32 %v6235_v63, 16 }
 0x101   : > { %v1301_v14 = vadd.f32 %v1142_v27, %v7849_v51  ;;  %v1872_v30 = vadd.f32 %v6634_v28, %v1303_v33  ;;  %v1711_v1 = vpop.f32.mrf.mxu0  ;;  %v6975_v51 = vld [vmem:[%s7197_s11 + $0x9c] sm:$0xff]   ;;  %v4279_v12 = vsel %vm7270_vm7, %v4274_v49, %v4278_v22  ;;  %v8103_v32 = vsel %vm7263_vm6, %v5040_v57, %v5041_v38  ;;  %v6236_v33 = vld [vmem:[%s7197_s11 + $0x4c] sm:$0xf] }
 0x102   : > { %v6601_v62 = vpop.f32.mrf.mxu1  ;;  %v8109_v28 = vcombine.low %v4269_v24, %v4279_v12  ;;  %v6371_v10 = vcombine.low %v8087_v7, %v8103_v32  ;;  %v8115_v22 = vsel %vm7263_vm6, %v6355_v23, %v5045_v25  ;;  %v4284_v38 = vshll.u32 %v6235_v63, 16  ;;  %6789 = vmatmul.mubr.msk.bf16.gmra.mxu0 %vm326_vm1, %v6975_v51  ;;  %v6239_v51 = vld [vmem:[%s7197_s11 + $0x58] sm:$0xf]  ;;  %v6240_v12 = vld [vmem:[%s7197_s11 + $0x5c] sm:$0x1] }
 0x103   : > { %v1304_v16 = vadd.f32 %v6601_v62, %v7876_v53  ;;  %1904 = vst [vmem:[%s7816_s10 + $0x10] sm:$0xff] %v1872_v30  ;;  %v1870_v36 = vadd.f32 %v1711_v1, %v1301_v14  ;;  %v6635_v45 = vpop.f32.mrf.mxu0  ;;  %v5048_v53 = vrot.slane %v6315_v13, 5  ;;  %v4290_v43 = vshll.u32 %v6236_v33, 16  ;;  %6792 = vmatprep.mubr.msk.bf16.mxu0 %vm326_vm1, %v6976_v15 }
 0x104   : > { %v1145_v21 = vpop.f32.mrf.mxu1  ;;  %v4294_v14 = vshrl.u32 %v6236_v33, 16  ;;  %v4300_v30 = vshll.u32 %v6237_v6, 16  ;;  %v8948_v13 = vcombine.low %v7917_v2, %v7942_v59  ;;  %v4283_v49 = vrot.slane %v4281_v52, 4 }
 0x105   : > { %v1302_v8 = vadd.f32 %v1145_v21, %v7890_v20  ;;  %1902 = vst [vmem:[%s7816_s10] sm:$0xff] %v1870_v36  ;;  %v1873_v27 = vadd.f32 %v6635_v45, %v1304_v16  ;;  %v1714_v18 = vpop.f32.mrf.mxu0  ;;  %v8128_v39 = vsel %vm7263_vm6, %v5047_v41, %v5048_v53  ;;  %v4286_v57 = vrot.slane %v4284_v38, 5  ;;  %v6316_v38 = vld [vmem:[%s7197_s11 + $0x48] sm:$0xe] }
 0x106   : > { %v6604_v20 = vpop.f32.mrf.mxu1  ;;  %6759 = vmatmul.mubr.msk.bf16.gmra.mxu1 %vm326_vm1, %v8948_v13  ;;  %v8949_v16 = vcombine.low %v7927_v42, %v7946_v60  ;;  %v4292_v59 = vrot.slane %v4290_v43, 5  ;;  %v4296_v36 = vrot.slane %v4294_v14, 4  ;;  %v4302_v23 = vrot.slane %v4300_v30, 5  ;;  %v6977_v60 = vld [vmem:[%s7197_s11 + $0xb4] sm:$0xff]  }
 0x107   : > { %1905 = vst [vmem:[%s7816_s10 + $0x18] sm:$0xff] %v1873_v27  ;;  %v1871_v50 = vadd.f32 %v1714_v18, %v1302_v8  ;;  %v1307_v62 = vadd.f32 %v6604_v20, %v7909_v37  ;;  %v6638_v1 = vpop.f32.mrf.mxu0  ;;  %v6372_v37 = vcombine.low %v8115_v22, %v8128_v39  ;;  %v4287_v21 = vor.u32 %v4286_v57, %v4283_v49  ;;  %v6978_v8 = vld [vmem:[%s7197_s11 + $0xc0] sm:$0xff]   ;;  %v6318_v49 = vld [vmem:[%s7197_s11 + $0x50] sm:$0x1]  ;;  %v6319_v57 = vld [vmem:[%s7197_s11 + $0x54] sm:$0xe] }
 0x108   : > { %6762 = vmatprep.mubr.msk.bf16.mxu1 %vm326_vm1, %v8949_v16  ;;  %v1158_v2 = vpop.f32.mrf.mxu1  ;;  %v4305_v42 = vshrl.u32 %v6238_v35, 16  ;;  %v4297_v24 = vor.u32 %v4296_v36, %v4292_v59  ;;  %v4308_v53 = vshll.u32 %v6238_v35, 16  ;;  %v4314_v33 = vshll.u32 %v6239_v51, 16  ;;  %v6317_v35 = vld [vmem:[%s7197_s11 + $0x4c] sm:$0xf] }
 0x109   : > { %1903 = vst [vmem:[%s7816_s10 + $0x8] sm:$0xff] %v1871_v50  ;;  %v1305_v25 = vadd.f32 %v1158_v2, %v7929_v48  ;;  %v1876_v63 = vadd.f32 %v6638_v1, %v1307_v62  ;;  %v1727_v15 = vpop.f32.mrf.mxu0  ;;  %v4318_v6 = vshrl.u32 %v6239_v51, 16  ;;  %v4288_v48 = vrot.slane %v4287_v21, 4 }
 0x10a   : > { %v6605_v45 = vpop.f32.mrf.mxu1  ;;  %v4307_v52 = vrot.slane %v4305_v42, 4  ;;  %v4298_v50 = vrot.slane %v4297_v24, 4  ;;  %v4310_v43 = vrot.slane %v4308_v53, 5  ;;  %v4316_v14 = vrot.slane %v4314_v33, 5  ;;  %6793 = vmatmul.mubr.msk.bf16.gmra.mxu0 %vm326_vm1, %v6977_v60  ;;  %v6241_v60 = vld [vmem:[%s7197_s11 + $0x60] sm:$0xf] }
 0x10b   : > { %v1308_v27 = vadd.f32 %v6605_v45, %v7951_v4  ;;  %1908 = vst [vmem:[%s7816_s10 + $0x30] sm:$0xff] %v1876_v63  ;;  %v1874_v18 = vadd.f32 %v1727_v15, %v1305_v25  ;;  %v6639_v41 = vpop.f32.mrf.mxu0  ;;  %v4320_v30 = vrot.slane %v4318_v6, 4  ;;  %v4293_v4 = vsel %vm7270_vm7, %v4288_v48, %v4292_v59  ;;  %v6321_v63 = vld [vmem:[%s7197_s11 + $0x5c] sm:$0x1]  ;;  %6796 = vmatprep.mubr.msk.bf16.mxu0 %vm326_vm1, %v6978_v8  ;;  %v6979_v8 = vld [vmem:[%s7197_s11 + $0xcc] sm:$0xff]  }
 0x10c   : > { %v1161_v20 = vpop.f32.mrf.mxu1  ;;  %v4324_v1 = vshll.u32 %v6240_v12, 16  ;;  %v4303_v51 = vsel %vm7270_vm7, %v4298_v50, %v4302_v23  ;;  %v4311_v16 = vor.u32 %v4310_v43, %v4307_v52  ;;  %v6356_v25 = vrot.slane %v6316_v38, 9  ;;  %v6242_v48 = vld [vmem:[%s7197_s11 + $0x64] sm:$0xf] }
 0x10d   : > { %v1306_v13 = vadd.f32 %v1161_v20, %v7964_v29  ;;  %1906 = vst [vmem:[%s7816_s10 + $0x20] sm:$0xff] %v1874_v18  ;;  %v1877_v62 = vadd.f32 %v6639_v41, %v1308_v27  ;;  %v4321_v2 = vor.u32 %v4320_v30, %v4316_v14  ;;  %v1730_v36 = vpop.f32.mrf.mxu0  ;;  %v6320_v29 = vld [vmem:[%s7197_s11 + $0x58] sm:$0xf]  ;;  %v8950_v59 = vcombine.low %v7959_v11, %v7968_v31 }
 0x10e   : > { %v8162_v15 = vcombine.low %v4293_v4, %v4303_v51  ;;  %v4326_v21 = vrot.slane %v4324_v1, 5  ;;  %v5052_v42 = vrot.slane %v6317_v35, 5  ;;  %v4312_v45 = vrot.slane %v4311_v16, 4  ;;  %v6608_v27 = vpop.f32.mrf.mxu1  ;;  %v6244_v35 = vld [vmem:[%s7197_s11 + $0x6c] sm:$0xf] }
 0x10f   : > { %6763 = vmatmul.mubr.msk.bf16.gmra.mxu1 %vm326_vm1, %v8950_v59  ;;  %1909 = vst [vmem:[%s7816_s10 + $0x38] sm:$0xff] %v1877_v62  ;;  %v1875_v23 = vadd.f32 %v1730_v36, %v1306_v13  ;;  %v4322_v24 = vrot.slane %v4321_v2, 4  ;;  %v5055_v12 = vrot.slane %v6318_v49, 5  ;;  %v6357_v11 = vrot.slane %v6319_v57, 9  ;;  %v6642_v43 = vpop.f32.mrf.mxu0  ;;  %v6245_v59 = vld [vmem:[%s7197_s11 + $0x70] sm:$0xf] }
 0x110   : > { %6802 = vmatprep.mubr.msk.bf16.mxu1 %vm326_vm1, %v8012_v3  ;;  %v8171_v31 = vsel %vm7263_vm6, %v6356_v25, %v5052_v42  ;;  %v5054_v53 = vrot.slane %v5052_v42, 4  ;;  %v5059_v33 = vrot.slane %v6320_v29, 5  ;;  %v5062_v6 = vrot.slane %v6321_v63, 5  ;;  %v1174_v13 = vpop.f32.mrf.mxu1 }
 0x111   : > { %1907 = vst [vmem:[%s7816_s10 + $0x28] sm:$0xff] %v1875_v23  ;;  %v4317_v18 = vsel %vm7270_vm7, %v4312_v45, %v4316_v14  ;;  %v4327_v3 = vsel %vm7270_vm7, %v4322_v24, %v4326_v21  ;;  %v4329_v41 = vshrl.u32 %v6241_v60, 16  ;;  %v4332_v52 = vshll.u32 %v6241_v60, 16  ;;  %v6243_v14 = vld [vmem:[%s7197_s11 + $0x68] sm:$0x1]  ;;  %v1743_v51 = vpop.f32.mrf.mxu0 }
 0x112   : > { %v1311_v38 = vadd.f32 %v6608_v27, %v7981_v9  ;;  %v8180_v20 = vcombine.low %v4317_v18, %v4327_v3  ;;  %v8184_v50 = vsel %vm7263_vm6, %v5054_v53, %v5055_v12  ;;  %v8188_v30 = vsel %vm7263_vm6, %v6357_v11, %v5059_v33  ;;  %6797 = vmatmul.mubr.msk.bf16.gmra.mxu0 %vm326_vm1, %v6979_v8  ;;  %v6609_v36 = vpop.f32.mrf.mxu1  ;;  %v6246_v12 = vld [vmem:[%s7197_s11 + $0x74] sm:$0x1]  ;;  %v6322_v53 = vld [vmem:[%s7197_s11 + $0x60] sm:$0xe]  ;;  %v6323_v18 = vld [vmem:[%s7197_s11 + $0x64] sm:$0xf] }
 0x113   : > { %v6373_v4 = vcombine.low %v8171_v31, %v8184_v50  ;;  %v5061_v62 = vrot.slane %v5059_v33, 4  ;;  %v4331_v9 = vrot.slane %v4329_v41, 4  ;;  %v4334_v1 = vrot.slane %v4332_v52, 5  ;;  %v6643_v24 = vpop.f32.mrf.mxu0  ;;  %v6324_v3 = vld [vmem:[%s7197_s11 + $0x68] sm:$0x1] }
 0x114   : > { %v1309_v49 = vadd.f32 %v1174_v13, %v7991_v19  ;;  %v1880_v57 = vadd.f32 %v6642_v43, %v1311_v38  ;;  %v4338_v16 = vshll.u32 %v6242_v48, 16  ;;  %v4342_v2 = vshrl.u32 %v6242_v48, 16  ;;  %v6325_v43 = vld [vmem:[%s7197_s11 + $0x6c] sm:$0xe] }
 0x115   : > { %v8198_v25 = vsel %vm7263_vm6, %v5061_v62, %v5062_v6  ;;  %v4335_v29 = vor.u32 %v4334_v1, %v4331_v9  ;;  %v4348_v63 = vshll.u32 %v6243_v14, 16  ;;  %v4353_v21 = vshrl.u32 %v6244_v35, 16  ;;  %v1746_v38 = vpop.f32.mrf.mxu0  ;;  %v6326_v14 = vld [vmem:[%s7197_s11 + $0x70] sm:$0xf] }
 0x116   : > { %v8951_v19 = vcombine.low %v8001_v44, %v8018_v17  ;;  %v1312_v23 = vadd.f32 %v6609_v36, %v7997_v34  ;;  %1912 = vst [vmem:[%s7816_s10 + $0x50] sm:$0xff] %v1880_v57  ;;  %v6374_v42 = vcombine.low %v8188_v30, %v8198_v25  ;;  %v1878_v60 = vadd.f32 %v1743_v51, %v1309_v49 }
 0x117   : > { %6803 = vmatmul.mubr.msk.bf16.vlgmr.msra.gmra.mxu1 %vm326_vm1, %v8047_v47  ;;  %v4340_v45 = vrot.slane %v4338_v16, 5  ;;  %v1177_v47 = vpop.f32.mrf.mxu1  ;;  %v4336_v44 = vrot.slane %v4335_v29, 4  ;;  %v4344_v17 = vrot.slane %v4342_v2, 4  ;;  %v4350_v11 = vrot.slane %v4348_v63, 5  ;;  %v6327_v2 = vld [vmem:[%s7197_s11 + $0x74] sm:$0x1] }
 0x118   : > { %6836 = vmatprep.mubr.msk.bf16.mxu0 %vm326_vm1, %v8951_v19  ;;  %6806 = vmatprep.mubr.msk.bf16.mxu1 %vm326_vm1, %v8090_v58  ;;  %v4355_v34 = vrot.slane %v4353_v21, 4  ;;  %v1310_v33 = vadd.f32 %v1177_v47, %v8010_v61  ;;  %1910 = vst [vmem:[%s7816_s10 + $0x40] sm:$0xff] %v1878_v60  ;;  %v1881_v6 = vadd.f32 %v6643_v24, %v1312_v23  ;;  %v4356_v8 = vshll.u32 %v6244_v35, 16  ;;  %v6646_v24 = vpop.f32.mrf.mxu0  ;;  %v6247_v47 = vld [vmem:[%s7197_s11 + $0x78] sm:$0xf] }
 0x119   : > { %v4362_v27 = vshll.u32 %v6245_v59, 16  ;;  %v4341_v58 = vsel %vm7270_vm7, %v4336_v44, %v4340_v45  ;;  %v4345_v48 = vor.u32 %v4344_v17, %v4340_v45  ;;  %v4366_v41 = vshrl.u32 %v6245_v59, 16  ;;  %v6612_v21 = vpop.f32.mrf.mxu1 }
 0x11a   : > { %v4372_v52 = vshll.u32 %v6246_v12, 16  ;;  %1913 = vst [vmem:[%s7816_s10 + $0x58] sm:$0xff] %v1881_v6  ;;  %v4358_v13 = vrot.slane %v4356_v8, 5  ;;  %v8224_v61 = vadd.f32 %v1746_v38, %v1310_v33  ;;  %v6358_v9 = vrot.slane %v6322_v53, 9  ;;  %v6248_v53 = vld [vmem:[%s7197_s11 + $0x7c] sm:$0xf] }
 0x11b   : > { %v4364_v62 = vrot.slane %v4362_v27, 5  ;;  %v4346_v35 = vrot.slane %v4345_v48, 4  ;;  %v4368_v1 = vrot.slane %v4366_v41, 4  ;;  %v5066_v57 = vrot.slane %v6323_v18, 5  ;;  %v1190_v44 = vpop.f32.mrf.mxu1  ;;  %v6249_v27 = vld [vmem:[%s7197_s11 + $0x80] sm:$0x1] }
 0x11c   : > { %v4374_v49 = vrot.slane %v4372_v52, 5  ;;  %v4359_v51 = vor.u32 %v4358_v13, %v4355_v34  ;;  %v5069_v16 = vrot.slane %v6324_v3, 5  ;;  %v6359_v36 = vrot.slane %v6325_v43, 9 }
 0x11d   : > { %v5073_v29 = vrot.slane %v6326_v14, 5  ;;  %v8952_v63 = vcombine.low %v8034_v0, %v8051_v56  ;;  %v4351_v59 = vsel %vm7270_vm7, %v4346_v35, %v4350_v11  ;;  %v4369_v19 = vor.u32 %v4368_v1, %v4364_v62  ;;  %v6613_v6 = vpop.f32.mrf.mxu1  ;;  %v6251_v35 = vld [vmem:[%s7197_s11 + $0x88] sm:$0xf] }
 0x11e   : > { %v8235_v23 = vsel %vm7263_vm6, %v6358_v9, %v5066_v57  ;;  %v5068_v60 = vrot.slane %v5066_v57, 4  ;;  %v6278_v0 = vcombine.low %v4341_v58, %v4351_v59  ;;  %v1315_v56 = vadd.f32 %v6612_v21, %v8030_v5  ;;  %v6329_v59 = vld [vmem:[%s7197_s11 + $0x7c] sm:$0xf] }
 0x11f   : > { %6837 = vmatmul.mubr.msk.bf16.vlgmr.msra.gmra.mxu0 %vm326_vm1, %v8952_v63  ;;  %6807 = vmatmul.mubr.msk.bf16.gmra.mxu1 %vm326_vm1, %v8109_v28  ;;  %v4360_v45 = vrot.slane %v4359_v51, 4  ;;  %v8246_v12 = vsel %vm7263_vm6, %v6359_v36, %v5073_v29  ;;  %v4370_v28 = vrot.slane %v4369_v19, 4  ;;  %v5075_v5 = vrot.slane %v5073_v29, 4  ;;  %v1193_v43 = vpop.f32.mrf.mxu1  ;;  %v6252_v51 = vld [vmem:[%s7197_s11 + $0x8c] sm:$0x1] }
 0x120   : > { %6840 = vmatprep.mubr.msk.bf16.mxu0 %vm326_vm1, %v6371_v10  ;;  %6810 = vmatprep.mubr.msk.bf16.mxu1 %vm326_vm1, %v8162_v15  ;;  %v8253_v7 = vsel %vm7263_vm6, %v5068_v60, %v5069_v16  ;;  %v5076_v32 = vrot.slane %v6327_v2, 5  ;;  %v1313_v17 = vadd.f32 %v1190_v44, %v8045_v46  ;;  %v8260_v34 = vadd.f32 %v6646_v24, %v1315_v56  ;;  %v1759_v15 = vpop.f32.mrf.mxu0  ;;  %v6250_v46 = vld [vmem:[%s7197_s11 + $0x84] sm:$0xf]  ;;  %v6328_v16 = vld [vmem:[%s7197_s11 + $0x78] sm:$0xe] }
 0x121   : > { %v4365_v10 = vsel %vm7270_vm7, %v4360_v45, %v4364_v62  ;;  %v6375_v11 = vcombine.low %v8235_v23, %v8253_v7  ;;  %v4375_v33 = vsel %vm7270_vm7, %v4370_v28, %v4374_v49  ;;  %v4377_v18 = vshrl.u32 %v6247_v47, 16  ;;  %v6330_v19 = vld [vmem:[%s7197_s11 + $0x80] sm:$0x1]  ;;  %v1286_v23 = vld [vmem:[%s7816_s10 + $0x88] sm:$0xff] }
 0x122   : > { %v8267_v8 = vsel %vm7263_vm6, %v5075_v5, %v5076_v32  ;;  %v4380_v3 = vshll.u32 %v6247_v47, 16  ;;  %v8271_v58 = vcombine.low %v4365_v10, %v4375_v33  ;;  %v1316_v48 = vadd.f32 %v6613_v6, %v8060_v26  ;;  %v6647_v38 = vpop.f32.mrf.mxu0  ;;  %v6616_v32 = vpop.f32.mrf.mxu1  ;;  %v1287_v10 = vld [vmem:[%s7816_s10 + $0x90] sm:$0xff] }
 0x123   : > { %v6376_v41 = vcombine.low %v8246_v12, %v8267_v8  ;;  %v8276_v52 = vadd.f32 %v1759_v15, %v1313_v17  ;;  %v4379_v14 = vrot.slane %v4377_v18, 4  ;;  %v4386_v62 = vshll.u32 %v6248_v53, 16  ;;  %v6336_v8 = vld [vmem:[%s7197_s11 + $0x98] sm:$0x1] }
 0x124   : > { %v4382_v13 = vrot.slane %v4380_v3, 5  ;;  %v4390_v9 = vshrl.u32 %v6248_v53, 16  ;;  %v1314_v1 = vadd.f32 %v1193_v43, %v8065_v40  ;;  %v4396_v49 = vshll.u32 %v6249_v27, 16 }
 0x125   : > { %v8280_v57 = vadd.f32 %v6647_v38, %v1316_v48  ;;  %v4401_v26 = vshrl.u32 %v6250_v46, 16  ;;  %v4388_v36 = vrot.slane %v4386_v62, 5  ;;  %v4404_v63 = vshll.u32 %v6250_v46, 16  ;;  %v1206_v46 = vpop.f32.mrf.mxu1  ;;  %v1285_v48 = vld [vmem:[%s7816_s10 + $0x80] sm:$0xff]  ;;  %v6333_v38 = vld [vmem:[%s7197_s11 + $0x8c] sm:$0x1] }
 0x126   : > { %v4383_v2 = vor.u32 %v4382_v13, %v4379_v14  ;;  %v4392_v29 = vrot.slane %v4390_v9, 4  ;;  %v4398_v40 = vrot.slane %v4396_v49, 5  ;;  %v4410_v22 = vshll.u32 %v6251_v35, 16  ;;  %v6253_v49 = vld [vmem:[%s7197_s11 + $0x90] sm:$0xf] }
 0x127   : > { %6841 = vmatmul.mubr.msk.bf16.gmra.mxu0 %vm326_vm1, %v6372_v37  ;;  %6811 = vmatmul.mubr.msk.bf16.gmra.mxu1 %vm326_vm1, %v8180_v20  ;;  %v4403_v21 = vrot.slane %v4401_v26, 4  ;;  %v4414_v39 = vshrl.u32 %v6251_v35, 16  ;;  %v1762_v37 = vpop.f32.mrf.mxu0  ;;  %v4406_v45 = vrot.slane %v4404_v63, 5  ;;  %v4420_v24 = vshll.u32 %v6252_v51, 16  ;;  %v6331_v20 = vld [vmem:[%s7197_s11 + $0x84] sm:$0xe] }
 0x128   : > { %6844 = vmatprep.mubr.msk.bf16.mxu0 %vm326_vm1, %v6373_v4  ;;  %6814 = vmatprep.mubr.msk.bf16.mxu1 %vm326_vm1, %v6278_v0  ;;  %v4384_v60 = vrot.slane %v4383_v2, 4  ;;  %v4393_v56 = vor.u32 %v4392_v29, %v4388_v36  ;;  %v4412_v47 = vrot.slane %v4410_v22, 5  ;;  %v8298_v31 = vadd.f32 %v1762_v37, %v1314_v1  ;;  %v6332_v4 = vld [vmem:[%s7197_s11 + $0x88] sm:$0xf]  ;;  %v1288_v2 = vld [vmem:[%s7816_s10 + $0x98] sm:$0xff] }
 0x129   : > { %v4416_v28 = vrot.slane %v4414_v39, 4  ;;  %v6360_v50 = vrot.slane %v6328_v16, 9  ;;  %v4407_v0 = vor.u32 %v4406_v45, %v4403_v21  ;;  %v4422_v17 = vrot.slane %v4420_v24, 5  ;;  %v6650_v27 = vpop.f32.mrf.mxu0  ;;  %v6617_v16 = vpop.f32.mrf.mxu1  ;;  %v6256_v37 = vld [vmem:[%s7197_s11 + $0x9c] sm:$0xf] }
 0x12a   : > { %v4389_v44 = vsel %vm7270_vm7, %v4384_v60, %v4388_v36  ;;  %v4394_v5 = vrot.slane %v4393_v56, 4  ;;  %v1319_v15 = vadd.f32 %v6616_v32, %v1287_v10  ;;  %v5080_v33 = vrot.slane %v6329_v59, 5  ;;  %v6254_v59 = vld [vmem:[%s7197_s11 + $0x94] sm:$0xf]  ;;  %v6257_v24 = vld [vmem:[%s7197_s11 + $0xa0] sm:$0xf] }
 0x12b   : > { %v4417_v53 = vor.u32 %v4416_v28, %v4412_v47  ;;  %v5083_v6 = vrot.slane %v6330_v19, 5  ;;  %v4408_v3 = vrot.slane %v4407_v0, 4  ;;  %v6361_v43 = vrot.slane %v6331_v20, 9  ;;  %v1775_v1 = vpop.f32.mrf.mxu0  ;;  %v1209_v22 = vpop.f32.mrf.mxu1  ;;  %v6258_v32 = vld [vmem:[%s7197_s11 + $0xa4] sm:$0x1] }
 0x12c   : > { %v4399_v18 = vsel %vm7270_vm7, %v4394_v5, %v4398_v40  ;;  %v5087_v14 = vrot.slane %v6332_v4, 5  ;;  %v1317_v9 = vadd.f32 %v1285_v48, %v1206_v46  ;;  %v5081_v35 = vsel %vm7263_vm6, %v6360_v50, %v5080_v33  ;;  %v6334_v46 = vld [vmem:[%s7197_s11 + $0x90] sm:$0xe] }
 0x12d   : > { %v6280_v13 = vcombine.low %v4389_v44, %v4399_v18  ;;  %v4418_v62 = vrot.slane %v4417_v53, 4  ;;  %v4413_v51 = vsel %vm7270_vm7, %v4408_v3, %v4412_v47  ;;  %v5082_v26 = vrot.slane %v5080_v33, 4  ;;  %v6651_v40 = vpop.f32.mrf.mxu0 }
 0x12e   : > { %v8318_v36 = vadd.f32 %v6650_v27, %v1319_v15  ;;  %v8322_v29 = vsel %vm7263_vm6, %v6361_v43, %v5087_v14  ;;  %v1320_v25 = vadd.f32 %v6617_v16, %v1288_v2  ;;  %v5090_v63 = vrot.slane %v6333_v38, 5  ;;  %v6620_v38 = vpop.f32.mrf.mxu1  ;;  %v1291_v43 = vld [vmem:[%s7816_s10 + $0xb0] sm:$0xff] }
 0x12f   : > { %6845 = vmatmul.mubr.msk.bf16.gmra.mxu0 %vm326_vm1, %v6374_v42  ;;  %6815 = vmatmul.mubr.msk.bf16.gmra.mxu1 %vm326_vm1, %v8271_v58  ;;  %v4423_v30 = vsel %vm7270_vm7, %v4418_v62, %v4422_v17  ;;  %v5089_v42 = vrot.slane %v5087_v14, 4  ;;  %v5084_v58 = vsel %vm7263_vm6, %v5082_v26, %v5083_v6  ;;  %v8337_v7 = vadd.f32 %v1775_v1, %v1317_v9  ;;  %v1778_v0 = vpop.f32.mrf.mxu0  ;;  %v6335_v9 = vld [vmem:[%s7197_s11 + $0x94] sm:$0xf] }
 0x130   : > { %6848 = vmatprep.mubr.msk.bf16.mxu0 %vm326_vm1, %v6375_v11  ;;  %6818 = vmatprep.mubr.msk.bf16.mxu1 %vm326_vm1, %v6280_v13  ;;  %v6281_v21 = vcombine.low %v4413_v51, %v4423_v30  ;;  %v6255_v11 = vld [vmem:[%s7197_s11 + $0x98] sm:$0x1]  ;;  %v4425_v39 = vshrl.u32 %v6253_v49, 16  ;;  %v6377_v19 = vcombine.low %v5081_v35, %v5084_v58  ;;  %v1318_v56 = vadd.f32 %v1286_v23, %v1209_v22  ;;  %v1222_v2 = vpop.f32.mrf.mxu1  ;;  %v1289_v30 = vld [vmem:[%s7816_s10 + $0xa0] sm:$0xff] }
 0x131   : > { %v8343_v60 = vsel %vm7263_vm6, %v5089_v42, %v5090_v63  ;;  %v4428_v45 = vshll.u32 %v6253_v49, 16  ;;  %v4434_v28 = vshll.u32 %v6254_v59, 16  ;;  %v4438_v50 = vshrl.u32 %v6254_v59, 16  ;;  %v6338_v58 = vld [vmem:[%s7197_s11 + $0xa0] sm:$0xf] }
 0x132   : > { %v6378_v20 = vcombine.low %v8322_v29, %v8343_v60  ;;  %v4427_v47 = vrot.slane %v4425_v39, 4  ;;  %v4444_v44 = vshll.u32 %v6255_v11, 16  ;;  %v8348_v5 = vadd.f32 %v6651_v40, %v1320_v25 }
 0x133   : > { %v4430_v4 = vrot.slane %v4428_v45, 5  ;;  %v4449_v10 = vshrl.u32 %v6256_v37, 16  ;;  %v4436_v17 = vrot.slane %v4434_v28, 5  ;;  %v4440_v15 = vrot.slane %v4438_v50, 4  ;;  %v1292_v50 = vld [vmem:[%s7816_s10 + $0xb8] sm:$0xff] }
 0x134   : > { %v4452_v53 = vshll.u32 %v6256_v37, 16  ;;  %v4458_v33 = vshll.u32 %v6257_v24, 16  ;;  %v4446_v27 = vrot.slane %v4444_v44, 5  ;;  %v4462_v3 = vshrl.u32 %v6257_v24, 16  ;;  %v6621_v37 = vpop.f32.mrf.mxu1 }
 0x135   : > { %v4431_v6 = vor.u32 %v4430_v4, %v4427_v47  ;;  %v4451_v18 = vrot.slane %v4449_v10, 4  ;;  %v4441_v48 = vor.u32 %v4440_v15, %v4436_v17  ;;  %v4468_v62 = vshll.u32 %v6258_v32, 16  ;;  %v1290_v4 = vld [vmem:[%s7816_s10 + $0xa8] sm:$0xff] }
 0x136   : > { %v4454_v14 = vrot.slane %v4452_v53, 5  ;;  %v4460_v13 = vrot.slane %v4458_v33, 5  ;;  %v1323_v1 = vadd.f32 %v6620_v38, %v1291_v43  ;;  %v4464_v49 = vrot.slane %v4462_v3, 4  ;;  %v1225_v15 = vpop.f32.mrf.mxu1  ;;  %v6259_v53 = vld [vmem:[%s7197_s11 + $0xa8] sm:$0xf] }
 0x137   : > { %6849 = vmatmul.mubr.msk.bf16.gmra.mxu0 %vm326_vm1, %v6376_v41  ;;  %6819 = vmatmul.mubr.msk.bf16.gmra.mxu1 %vm326_vm1, %v6281_v21  ;;  %v4432_v35 = vrot.slane %v4431_v6, 4  ;;  %v8360_v12 = vadd.f32 %v1778_v0, %v1318_v56  ;;  %v6654_v41 = vpop.f32.mrf.mxu0  ;;  %v4442_v51 = vrot.slane %v4441_v48, 4  ;;  %v4470_v16 = vrot.slane %v4468_v62, 5  ;;  %v6337_v21 = vld [vmem:[%s7197_s11 + $0x9c] sm:$0xe] }
 0x138   : > { %6852 = vmatprep.mubr.msk.bf16.mxu0 %vm326_vm1, %v6377_v19  ;;  %v4455_v26 = vor.u32 %v4454_v14, %v4451_v18  ;;  %v6362_v25 = vrot.slane %v6334_v46, 9  ;;  %v4465_v63 = vor.u32 %v4464_v49, %v4460_v13  ;;  %v1321_v59 = vadd.f32 %v1289_v30, %v1222_v2  ;;  %v6339_v56 = vld [vmem:[%s7197_s11 + $0xa4] sm:$0x1]  ;;  %v6260_v33 = vld [vmem:[%s7197_s11 + $0xac] sm:$0xf] }
 0x139   : > { %v4437_v42 = vsel %vm7270_vm7, %v4432_v35, %v4436_v17  ;;  %v5094_v40 = vrot.slane %v6335_v9, 5  ;;  %v1791_v22 = vpop.f32.mrf.mxu0  ;;  %v4447_v23 = vsel %vm7270_vm7, %v4442_v51, %v4446_v27  ;;  %v5097_v39 = vrot.slane %v6336_v8, 5  ;;  %v6261_v46 = vld [vmem:[%s7197_s11 + $0xb0] sm:$0x1]  ;;  %v6264_v30 = vld [vmem:[%s7197_s11 + $0xbc] sm:$0x1] }
 0x13a   : > { %v4456_v11 = vrot.slane %v4455_v26, 4  ;;  %v8370_v19 = vadd.f32 %v6654_v41, %v1323_v1  ;;  %v6282_v45 = vcombine.low %v4437_v42, %v4447_v23  ;;  %v4466_v24 = vrot.slane %v4465_v63, 4  ;;  %v6262_v1 = vld [vmem:[%s7197_s11 + $0xb4] sm:$0xf]  ;;  %v6263_v41 = vld [vmem:[%s7197_s11 + $0xb8] sm:$0xf]  ;;  %v6624_v63 = vpop.f32.mrf.mxu1 }
 0x13b   : > { %v5095_v47 = vsel %vm7263_vm6, %v6362_v25, %v5094_v40  ;;  %v5096_v28 = vrot.slane %v5094_v40, 4  ;;  %v6655_v44 = vpop.f32.mrf.mxu0  ;;  %v1324_v10 = vadd.f32 %v6621_v37, %v1292_v50  ;;  %v6363_v0 = vrot.slane %v6337_v21, 9  ;;  %v1293_v50 = vld [vmem:[%s7816_s10 + $0xc0] sm:$0xff] }
 0x13c   : > { %v4461_v32 = vsel %vm7270_vm7, %v4456_v11, %v4460_v13  ;;  %v5101_v17 = vrot.slane %v6338_v58, 5  ;;  %6822 = vmatprep.mubr.msk.bf16.mxu1 %vm326_vm1, %v6282_v45  ;;  %v4471_v6 = vsel %vm7270_vm7, %v4466_v24, %v4470_v16  ;;  %v5104_v18 = vrot.slane %v6339_v56, 5 }
 0x13d   : > { %v5098_v27 = vsel %vm7263_vm6, %v5096_v28, %v5097_v39  ;;  %v1322_v3 = vadd.f32 %v1290_v4, %v1225_v15  ;;  %v6283_v48 = vcombine.low %v4461_v32, %v4471_v6  ;;  %v8393_v13 = vadd.f32 %v1791_v22, %v1321_v59  ;;  %v1794_v49 = vpop.f32.mrf.mxu0  ;;  %v1295_v59 = vld [vmem:[%s7816_s10 + $0xd0] sm:$0xff]  ;;  %v6340_v39 = vld [vmem:[%s7197_s11 + $0xa8] sm:$0xe]  ;;  %v1238_v28 = vpop.f32.mrf.mxu1  ;;  %v6341_v4 = vld [vmem:[%s7197_s11 + $0xac] sm:$0xf] }
 0x13e   : > { %v6379_v38 = vcombine.low %v5095_v47, %v5098_v27  ;;  %v5102_v43 = vsel %vm7263_vm6, %v6363_v0, %v5101_v17  ;;  %v5103_v14 = vrot.slane %v5101_v17, 4  ;;  %v4473_v62 = vshrl.u32 %v6259_v53, 16  ;;  %v6342_v17 = vld [vmem:[%s7197_s11 + $0xb0] sm:$0x1] }
 0x13f   : > { %6853 = vmatmul.mubr.msk.bf16.gmra.mxu0 %vm326_vm1, %v6378_v20  ;;  %v4476_v9 = vshll.u32 %v6259_v53, 16  ;;  %v4482_v35 = vshll.u32 %v6260_v33, 16  ;;  %6823 = vmatmul.mubr.msk.bf16.gmra.mxu1 %vm326_vm1, %v6283_v48  ;;  %v4486_v60 = vshrl.u32 %v6260_v33, 16  ;;  %v4492_v20 = vshll.u32 %v6261_v46, 16  ;;  %v6658_v37 = vpop.f32.mrf.mxu0  ;;  %v1296_v46 = vld [vmem:[%s7816_s10 + $0xd8] sm:$0xff] }
 0x140   : > { %6856 = vmatprep.mubr.msk.bf16.mxu0 %vm326_vm1, %v6379_v38  ;;  %v5105_v29 = vsel %vm7263_vm6, %v5103_v14, %v5104_v18  ;;  %v8400_v8 = vadd.f32 %v6655_v44, %v1324_v10  ;;  %v4475_v26 = vrot.slane %v4473_v62, 4  ;;  %v4497_v40 = vshrl.u32 %v6262_v1, 16  ;;  %v6625_v18 = vpop.f32.mrf.mxu1  ;;  %v6343_v62 = vld [vmem:[%s7197_s11 + $0xb4] sm:$0xe] }
 0x141   : > { %v6380_v51 = vcombine.low %v5102_v43, %v5105_v29  ;;  %v4478_v16 = vrot.slane %v4476_v9, 5  ;;  %v4484_v2 = vrot.slane %v4482_v35, 5  ;;  %v4488_v25 = vrot.slane %v4486_v60, 4  ;;  %v1807_v15 = vpop.f32.mrf.mxu0  ;;  %v6344_v9 = vld [vmem:[%s7197_s11 + $0xb8] sm:$0xf] }
 0x142   : > { %v4494_v42 = vrot.slane %v4492_v20, 5  ;;  %v4500_v21 = vshll.u32 %v6262_v1, 16  ;;  %v1327_v22 = vadd.f32 %v6624_v63, %v1295_v59  ;;  %v4506_v23 = vshll.u32 %v6263_v41, 16  ;;  %v6345_v60 = vld [vmem:[%s7197_s11 + $0xbc] sm:$0x1]  ;;  %v1241_v20 = vpop.f32.mrf.mxu1 }
 0x143   : > { %v4479_v58 = vor.u32 %v4478_v16, %v4475_v26  ;;  %v4510_v11 = vshrl.u32 %v6263_v41, 16  ;;  %v4489_v56 = vor.u32 %v4488_v25, %v4484_v2  ;;  %v4499_v45 = vrot.slane %v4497_v40, 4  ;;  %v6659_v35 = vpop.f32.mrf.mxu0  ;;  %v6265_v59 = vld [vmem:[%s7197_s11 + $0xc0] sm:$0xf]  ;;  %v6266_v40 = vld [vmem:[%s7197_s11 + $0xc4] sm:$0xf] }
 0x144   : > { %v4502_v24 = vrot.slane %v4500_v21, 5  ;;  %v4516_v47 = vshll.u32 %v6264_v30, 16  ;;  %v4508_v32 = vrot.slane %v4506_v23, 5  ;;  %v1325_v0 = vadd.f32 %v1293_v50, %v1238_v28 }
 0x145   : > { %v4480_v44 = vrot.slane %v4479_v58, 4  ;;  %v4512_v10 = vrot.slane %v4510_v11, 4  ;;  %v4490_v53 = vrot.slane %v4489_v56, 4  ;;  %v8410_v27 = vadd.f32 %v1794_v49, %v1322_v3  ;;  %v1810_v56 = vpop.f32.mrf.mxu0 }
 0x146   : > { %v4503_v33 = vor.u32 %v4502_v24, %v4499_v45  ;;  %v4518_v6 = vrot.slane %v4516_v47, 5  ;;  %v6364_v43 = vrot.slane %v6340_v39, 9  ;;  %v5108_v14 = vrot.slane %v6341_v4, 5  ;;  %v6267_v39 = vld [vmem:[%s7197_s11 + $0xc8] sm:$0x1] }
 0x147   : > { %6857 = vmatmul.mubr.msk.bf16.gmra.mxu0 %vm326_vm1, %v6380_v51  ;;  %v4485_v48 = vsel %vm7270_vm7, %v4480_v44, %v4484_v2  ;;  %v4513_v38 = vor.u32 %v4512_v10, %v4508_v32  ;;  %v4495_v1 = vsel %vm7270_vm7, %v4490_v53, %v4494_v42  ;;  %v5111_v3 = vrot.slane %v6342_v17, 5  ;;  %v1294_v2 = vld [vmem:[%s7816_s10 + $0xc8] sm:$0xff]  ;;  %v6628_v53 = vpop.f32.mrf.mxu1 }
 0x148   : > { %v4504_v29 = vrot.slane %v4503_v33, 4  ;;  %v1328_v49 = vadd.f32 %v6625_v18, %v1296_v46  ;;  %v6284_v41 = vcombine.low %v4485_v48, %v4495_v1  ;;  %v5109_v26 = vsel %vm7263_vm6, %v6364_v43, %v5108_v14  ;;  %v6268_v44 = vld [vmem:[%s7197_s11 + $0xcc] sm:$0xf]  ;;  %v1299_v48 = vld [vmem:[%s7816_s10 + $0xf0] sm:$0xff]  ;;  %v6662_v43 = vpop.f32.mrf.mxu0 }
 0x149   : > { %v4514_v51 = vrot.slane %v4513_v38, 4  ;;  %v5110_v16 = vrot.slane %v5108_v14, 4  ;;  %v8425_v25 = vadd.f32 %v6658_v37, %v1327_v22  ;;  %v6365_v42 = vrot.slane %v6343_v62, 9  ;;  %v6270_v38 = vld [vmem:[%s7197_s11 + $0xd4] sm:$0x1] }
 0x14a   : > { %v4509_v30 = vsel %vm7270_vm7, %v4504_v29, %v4508_v32  ;;  %v5115_v63 = vrot.slane %v6344_v9, 5  ;;  %6826 = vmatprep.mubr.msk.bf16.mxu1 %vm326_vm1, %v6284_v41  ;;  %v5118_v23 = vrot.slane %v6345_v60, 5  ;;  %v1326_v11 = vadd.f32 %v1294_v2, %v1241_v20  ;;  %v1254_v29 = vpop.f32.mrf.mxu1  ;;  %v1297_v20 = vld [vmem:[%s7816_s10 + $0xe0] sm:$0xff] }
 0x14b   : > { %v4519_v21 = vsel %vm7270_vm7, %v4514_v51, %v4518_v6  ;;  %v5112_v58 = vsel %vm7263_vm6, %v5110_v16, %v5111_v3  ;;  %v8437_v47 = vadd.f32 %v1807_v15, %v1325_v0  ;;  %v4521_v28 = vshrl.u32 %v6265_v59, 16  ;;  %v6269_v0 = vld [vmem:[%s7197_s11 + $0xd0] sm:$0xf]  ;;  %v6346_v41 = vld [vmem:[%s7197_s11 + $0xc0] sm:$0xe]  ;;  %v1823_v51 = vpop.f32.mrf.mxu0 }
 0x14c   : > { %v6285_v45 = vcombine.low %v4509_v30, %v4519_v21  ;;  %v6381_v22 = vcombine.low %v5109_v26, %v5112_v58  ;;  %v5116_v37 = vsel %vm7263_vm6, %v6365_v42, %v5115_v63  ;;  %v5117_v24 = vrot.slane %v5115_v63, 4  ;;  %v6347_v42 = vld [vmem:[%s7197_s11 + $0xc4] sm:$0xf]  ;;  %v6629_v63 = vpop.f32.mrf.mxu1 }
 0x14d   : > { %v4524_v50 = vshll.u32 %v6265_v59, 16  ;;  %v4530_v4 = vshll.u32 %v6266_v40, 16  ;;  %v4534_v10 = vshrl.u32 %v6266_v40, 16  ;;  %v4540_v17 = vshll.u32 %v6267_v39, 16  ;;  %v6663_v39 = vpop.f32.mrf.mxu0 }
 0x14e   : > { %6827 = vmatmul.mubr.msk.bf16.gmra.mxu1 %vm326_vm1, %v6285_v45  ;;  %6860 = vmatprep.mubr.msk.bf16.mxu0 %vm326_vm1, %v6381_v22  ;;  %v5119_v32 = vsel %vm7263_vm6, %v5117_v24, %v5118_v23  ;;  %v8444_v33 = vadd.f32 %v6659_v35, %v1328_v49  ;;  %v4523_v6 = vrot.slane %v4521_v28, 4  ;;  %v1331_v9 = vadd.f32 %v6628_v53, %v1299_v48  ;;  %v6348_v23 = vld [vmem:[%s7197_s11 + $0xc8] sm:$0x1]  ;;  %v6349_v28 = vld [vmem:[%s7197_s11 + $0xcc] sm:$0xe] }
 0x14f   : > { %v6382_v15 = vcombine.low %v5116_v37, %v5119_v32  ;;  %v4526_v18 = vrot.slane %v4524_v50, 5  ;;  %v4532_v46 = vrot.slane %v4530_v4, 5  ;;  %v4536_v14 = vrot.slane %v4534_v10, 4  ;;  %v1257_v50 = vpop.f32.mrf.mxu1  ;;  %v6350_v53 = vld [vmem:[%s7197_s11 + $0xd0] sm:$0xf]  ;;  %v1826_v48 = vpop.f32.mrf.mxu0 }
 0x150   : > { %v4542_v62 = vrot.slane %v4540_v17, 5  ;;  %v4545_v1 = vshrl.u32 %v6268_v44, 16  ;;  %v4548_v3 = vshll.u32 %v6268_v44, 16  ;;  %v4554_v49 = vshll.u32 %v6269_v0, 16  ;;  %v1300_v17 = vld [vmem:[%s7816_s10 + $0xf8] sm:$0xff] }
 0x151   : > { %6861 = vmatmul.mubr.msk.bf16.gmra.mxu0 %vm326_vm1, %v6382_v15  ;;  %v4527_v35 = vor.u32 %v4526_v18, %v4523_v6  ;;  %v4558_v60 = vshrl.u32 %v6269_v0, 16  ;;  %v4537_v26 = vor.u32 %v4536_v14, %v4532_v46  ;;  %v4564_v2 = vshll.u32 %v6270_v38, 16  ;;  %v6351_v0 = vld [vmem:[%s7197_s11 + $0xd4] sm:$0x1]  ;;  %s6408_s11 = sshll.u32 %s7149_s19, 12 }
 0x152   : > { %v4547_v16 = vrot.slane %v4545_v1, 4  ;;  %v1329_v30 = vadd.f32 %v1297_v20, %v1254_v29  ;;  %v4550_v40 = vrot.slane %v4548_v3, 5  ;;  %v4556_v21 = vrot.slane %v4554_v49, 5  ;;  %s8823_s22 = scalar_lea.hbm %s8939_s2, %s6408_s11 }
 0x153   : > { %v4528_v59 = vrot.slane %v4527_v35, 4  ;;  %v4560_v58 = vrot.slane %v4558_v60, 4  ;;  %v4538_v45 = vrot.slane %v4537_v26, 4  ;;  %v4566_v22 = vrot.slane %v4564_v2, 5  ;;  %v1298_v60 = vld [vmem:[%s7816_s10 + $0xe8] sm:$0xff] }
 0x154   : > { %v8454_v37 = vadd.f32 %v1810_v56, %v1326_v11  ;;  %v6366_v24 = vrot.slane %v6346_v41, 9  ;;  %v4551_v44 = vor.u32 %v4550_v40, %v4547_v16  ;;  %v5122_v10 = vrot.slane %v6347_v42, 5  ;;  %v6668_v56 = vpop.f32.mrf.mxu1  ;;  %v6702_v40 = vpop.f32.mrf.mxu0 }
 0x155   : > { %v4533_v4 = vsel %vm7270_vm7, %v4528_v59, %v4532_v46  ;;  %v4561_v32 = vor.u32 %v4560_v58, %v4556_v21  ;;  %v4543_v15 = vsel %vm7270_vm7, %v4538_v45, %v4542_v62  ;;  %v5125_v6 = vrot.slane %v6348_v23, 5 }
 0x156   : > { %v1332_v18 = vadd.f32 %v6629_v63, %v1300_v17  ;;  %v8464_v11 = vadd.f32 %v6662_v43, %v1331_v9  ;;  %v6286_v38 = vcombine.low %v4533_v4, %v4543_v15  ;;  %v4552_v14 = vrot.slane %v4551_v44, 4  ;;  %v2134_v20 = vpop.f32.mrf.mxu1  ;;  %v2263_v63 = vld [vmem:[%s7816_s10 + $0x10] sm:$0xff]  ;;  %v2924_v4 = vpop.f32.mrf.mxu0 }
 0x157   : > { %v4562_v1 = vrot.slane %v4561_v32, 4  ;;  %v5123_v46 = vsel %vm7263_vm6, %v6366_v24, %v5122_v10  ;;  %v5124_v29 = vrot.slane %v5122_v10, 4  ;;  %v6367_v35 = vrot.slane %v6349_v28, 9 }
 0x158   : > { %v5129_v3 = vrot.slane %v6350_v53, 5  ;;  %v5132_v49 = vrot.slane %v6351_v0, 5  ;;  %6830 = vmatprep.mubr.msk.bf16.mxu1 %vm326_vm1, %v6286_v38  ;;  %v4557_v43 = vsel %vm7270_vm7, %v4552_v14, %v4556_v21  ;;  %v1330_v9 = vadd.f32 %v1298_v60, %v1257_v50  ;;  %v6669_v59 = vpop.f32.mrf.mxu1  ;;  %v2262_v50 = vld [vmem:[%s7816_s10 + $0x8] sm:$0xff]  ;;  %v2267_v53 = vld [vmem:[%s7816_s10 + $0x30] sm:$0xff]  ;;  %v6703_v54 = vpop.f32.mrf.mxu0 }
 0x159   : > { %v4567_v62 = vsel %vm7270_vm7, %v4562_v1, %v4566_v22  ;;  %v8474_v41 = vadd.f32 %v1823_v51, %v1329_v30  ;;  %v5126_v16 = vsel %vm7263_vm6, %v5124_v29, %v5125_v6  ;;  %v8481_v58 = vadd.f32 %v6663_v39, %v1332_v18  ;;  %v2261_v51 = vld [vmem:[%s7816_s10] sm:$0xff]  ;;  %v2264_v30 = vld [vmem:[%s7816_s10 + $0x18] sm:$0xff] }
 0x15a   : > { %v6287_v26 = vcombine.low %v4557_v43, %v4567_v62  ;;  %v5130_v2 = vsel %vm7263_vm6, %v6367_v35, %v5129_v3  ;;  %v5131_v42 = vrot.slane %v5129_v3, 4  ;;  %v6383_v21 = vcombine.low %v5123_v46, %v5126_v16  ;;  %v2137_v28 = vpop.f32.mrf.mxu1  ;;  %v2265_v18 = vld [vmem:[%s7816_s10 + $0x20] sm:$0xff]  ;;  %v2268_v1 = vld [vmem:[%s7816_s10 + $0x38] sm:$0xff]  ;;  %v2271_v16 = vld [vmem:[%s7816_s10 + $0x50] sm:$0xff] }
 0x15b   : > { %v2295_v55 = vadd.f32 %v6668_v56, %v2263_v63  ;;  %v8483_v23 = vadd.f32 %v1826_v48, %v1330_v9  ;;  %v2293_v22 = vadd.f32 %v2261_v51, %v2134_v20  ;;  %v2296_v24 = vadd.f32 %v6669_v59, %v2264_v30  ;;  %v2927_v56 = vpop.f32.mrf.mxu0  ;;  %v2272_v51 = vld [vmem:[%s7816_s10 + $0x58] sm:$0xff] }
 0x15c   : > { %6831 = vmatmul.mubr.msk.bf16.gmra.mxu1 %vm326_vm1, %v6287_v26  ;;  %v5133_v45 = vsel %vm7263_vm6, %v5131_v42, %v5132_v49  ;;  %6864 = vmatprep.mubr.msk.bf16.mxu0 %vm326_vm1, %v6383_v21  ;;  %v2294_v32 = vadd.f32 %v2262_v50, %v2137_v28  ;;  %v6672_v17 = vpop.f32.mrf.mxu1  ;;  %v2266_v49 = vld [vmem:[%s7816_s10 + $0x28] sm:$0xff] }
 0x15d   : > { %v6384_v39 = vcombine.low %v5130_v2, %v5133_v45  ;;  %v8492_v44 = vadd.f32 %v6702_v40, %v2295_v55  ;;  %v8494_v10 = vadd.f32 %v2924_v4, %v2293_v22  ;;  %v2299_v0 = vadd.f32 %v6672_v17, %v2267_v53  ;;  %v6706_v46 = vpop.f32.mrf.mxu0  ;;  %v2269_v40 = vld [vmem:[%s7816_s10 + $0x40] sm:$0xff] }
 0x15e   : > { %v8498_v15 = vadd.f32 %v6703_v54, %v2296_v24  ;;  %v2150_v6 = vpop.f32.mrf.mxu1  ;;  %v8501_v38 = vadd.f32 %v2927_v56, %v2294_v32 }
 0x15f   : > { %6865 = vmatmul.mubr.msk.bf16.gmra.mxu0 %vm326_vm1, %v6384_v39  ;;  %v2297_v48 = vadd.f32 %v2265_v18, %v2150_v6  ;;  %v8504_v35 = vadd.f32 %v6706_v46, %v2299_v0  ;;  %v2940_v60 = vpop.f32.mrf.mxu0 }
 0x160   : > { %v6673_v14 = vpop.f32.mrf.mxu1 }
 0x161   : > { %v2300_v29 = vadd.f32 %v6673_v14, %v2268_v1  ;;  %v8507_v43 = vadd.f32 %v2940_v60, %v2297_v48  ;;  %v6707_v9 = vpop.f32.mrf.mxu0 }
 0x162   : > { %v2153_v3 = vpop.f32.mrf.mxu1 }
 0x163   : > { %v2298_v20 = vadd.f32 %v2266_v49, %v2153_v3  ;;  %v8509_v26 = vadd.f32 %v6707_v9, %v2300_v29  ;;  %v2943_v42 = vpop.f32.mrf.mxu0 }
 0x164   : > { %v6676_v62 = vpop.f32.mrf.mxu1 }
 0x165   : > { %v2303_v63 = vadd.f32 %v6676_v62, %v2271_v16  ;;  %v8512_v59 = vadd.f32 %v2943_v42, %v2298_v20  ;;  %v6710_v30 = vpop.f32.mrf.mxu0 }
 0x166   : > { %v2166_v2 = vpop.f32.mrf.mxu1 }
 0x167   : > { %v2301_v55 = vadd.f32 %v2269_v40, %v2166_v2  ;;  %v8516_v24 = vadd.f32 %v6710_v30, %v2303_v63  ;;  %v2956_v50 = vpop.f32.mrf.mxu0 }
 0x168   : > { %v6677_v21 = vpop.f32.mrf.mxu1 }
 0x169   : > { %v2304_v22 = vadd.f32 %v6677_v21, %v2272_v51  ;;  %v8519_v39 = vadd.f32 %v2956_v50, %v2301_v55  ;;  %v6711_v17 = vpop.f32.mrf.mxu0 }
 0x16a   : > { %v2169_v45 = vpop.f32.mrf.mxu1 }
 0x16b   : > { %v2302_v28 = vadd.f32 %v2169_v45, %v8224_v61  ;;  %v8522_v54 = vadd.f32 %v6711_v17, %v2304_v22  ;;  %v2959_v6 = vpop.f32.mrf.mxu0 }
 0x16c   : > { %v6680_v4 = vpop.f32.mrf.mxu1 }
 0x16d   : > { %v2307_v32 = vadd.f32 %v6680_v4, %v8260_v34  ;;  %v8525_v56 = vadd.f32 %v2959_v6, %v2302_v28  ;;  %v6714_v14 = vpop.f32.mrf.mxu0 }
 0x16e   : > { %v2182_v53 = vpop.f32.mrf.mxu1 }
 0x16f   : > { %v2305_v0 = vadd.f32 %v2182_v53, %v8276_v52  ;;  %v8528_v1 = vadd.f32 %v6714_v14, %v2307_v32  ;;  %v2972_v29 = vpop.f32.mrf.mxu0 }
 0x170   : > { %v6681_v18 = vpop.f32.mrf.mxu1 }
 0x171   : > { %v2308_v48 = vadd.f32 %v6681_v18, %v8280_v57  ;;  %v8531_v3 = vadd.f32 %v2972_v29, %v2305_v0  ;;  %v6715_v60 = vpop.f32.mrf.mxu0 }
 0x172   : > { %v2185_v61 = vpop.f32.mrf.mxu1 }
 0x173   : > { %v2306_v46 = vadd.f32 %v2185_v61, %v8298_v31  ;;  %v8534_v20 = vadd.f32 %v6715_v60, %v2308_v48  ;;  %v2975_v9 = vpop.f32.mrf.mxu0 }
 0x174   : > { %v6684_v34 = vpop.f32.mrf.mxu1 }
 0x175   : > { %v2311_v49 = vadd.f32 %v6684_v34, %v8318_v36  ;;  %v8537_v16 = vadd.f32 %v2975_v9, %v2306_v46  ;;  %v6718_v42 = vpop.f32.mrf.mxu0 }
 0x176   : > { %v2198_v52 = vpop.f32.mrf.mxu1 }
 0x177   : > { %v2309_v62 = vadd.f32 %v2198_v52, %v8337_v7  ;;  %v8540_v63 = vadd.f32 %v6718_v42, %v2311_v49  ;;  %v2988_v21 = vpop.f32.mrf.mxu0 }
 0x178   : > { %v6685_v57 = vpop.f32.mrf.mxu1 }
 0x179   : > { %v2312_v2 = vadd.f32 %v6685_v57, %v8348_v5  ;;  %8953 = vst [vmem:[#allocation9_spill] sm:$0xff] %v8540_v63  ;;  %v8543_v55 = vadd.f32 %v2988_v21, %v2309_v62  ;;  %v6719_v30 = vpop.f32.mrf.mxu0 }
 0x17a   : > { %v2201_v31 = vpop.f32.mrf.mxu1 }
 0x17b   : > { %v2310_v40 = vadd.f32 %v2201_v31, %v8360_v12  ;;  %8954 = vst [vmem:[#allocation10_spill] sm:$0xff] %v8543_v55  ;;  %v8546_v45 = vadd.f32 %v6719_v30, %v2312_v2  ;;  %v2991_v28 = vpop.f32.mrf.mxu0 }
 0x17c   : > { %v6688_v36 = vpop.f32.mrf.mxu1 }
 0x17d   : > { %v2315_v51 = vadd.f32 %v6688_v36, %v8370_v19  ;;  %8955 = vst [vmem:[#allocation11_spill] sm:$0xff] %v8546_v45  ;;  %v8549_v50 = vadd.f32 %v2991_v28, %v2310_v40  ;;  %v6722_v32 = vpop.f32.mrf.mxu0 }
 0x17e   : > { %v2214_v7 = vpop.f32.mrf.mxu1 }
 0x17f   : > { %v2313_v22 = vadd.f32 %v2214_v7, %v8393_v13  ;;  %8956 = vst [vmem:[#allocation12_spill] sm:$0xff] %v8549_v50  ;;  %v8552_v17 = vadd.f32 %v6722_v32, %v2315_v51  ;;  %v3004_v0 = vpop.f32.mrf.mxu0 }
 0x180   : > { %v6689_v5 = vpop.f32.mrf.mxu1 }
 0x181   : > { %v2316_v4 = vadd.f32 %v6689_v5, %v8400_v8  ;;  %8957 = vst [vmem:[#allocation13_spill] sm:$0xff] %v8552_v17  ;;  %v8555_v6 = vadd.f32 %v3004_v0, %v2313_v22  ;;  %v6723_v48 = vpop.f32.mrf.mxu0 }
 0x182   : > { %v2217_v12 = vpop.f32.mrf.mxu1 }
 0x183   : > { %v2314_v53 = vadd.f32 %v2217_v12, %v8410_v27  ;;  %8958 = vst [vmem:[#allocation14_spill] sm:$0xff] %v8555_v6  ;;  %v8558_v14 = vadd.f32 %v6723_v48, %v2316_v4  ;;  %v3007_v46 = vpop.f32.mrf.mxu0 }
 0x184   : > { %v6692_v19 = vpop.f32.mrf.mxu1 }
 0x185   : > { %v2319_v18 = vadd.f32 %v6692_v19, %v8425_v25  ;;  %8959 = vst [vmem:[#allocation15_spill] sm:$0xff] %v8558_v14  ;;  %v8561_v29 = vadd.f32 %v3007_v46, %v2314_v53  ;;  %v6726_v60 = vpop.f32.mrf.mxu0 }
 0x186   : > { %v2230_v13 = vpop.f32.mrf.mxu1 }
 0x187   : > { %v2317_v61 = vadd.f32 %v2230_v13, %v8437_v47  ;;  %8960 = vst [vmem:[#allocation16_spill] sm:$0xff] %v8561_v29  ;;  %v8565_v62 = vadd.f32 %v6726_v60, %v2319_v18  ;;  %v3020_v9 = vpop.f32.mrf.mxu0 }
 0x188   : > { %v6693_v8 = vpop.f32.mrf.mxu1 }
 0x189   : > { %v2320_v34 = vadd.f32 %v6693_v8, %v8444_v33  ;;  %8961 = vst [vmem:[#allocation17_spill] sm:$0xff] %v8565_v62  ;;  %v8568_v2 = vadd.f32 %v3020_v9, %v2317_v61  ;;  %v6727_v42 = vpop.f32.mrf.mxu0 }
 0x18a   : > { %v2233_v49 = vpop.f32.mrf.mxu1 }
 0x18b   : > { %v2318_v27 = vadd.f32 %v2233_v49, %v8454_v37  ;;  %8962 = vst [vmem:[#allocation18_spill] sm:$0xff] %v8568_v2  ;;  %v8571_v40 = vadd.f32 %v6727_v42, %v2320_v34  ;;  %v3023_v21 = vpop.f32.mrf.mxu0 }
 0x18c   : > { %v6696_v52 = vpop.f32.mrf.mxu1 }
 0x18d   : > { %v2323_v25 = vadd.f32 %v6696_v52, %v8464_v11  ;;  %8963 = vst [vmem:[#allocation19_spill] sm:$0xff] %v8571_v40  ;;  %v8574_v36 = vadd.f32 %v3023_v21, %v2318_v27  ;;  %v6730_v30 = vpop.f32.mrf.mxu0 }
 0x18e   : > { %v2246_v57 = vpop.f32.mrf.mxu1 }
 0x18f   : > { %v2321_v47 = vadd.f32 %v2246_v57, %v8474_v41  ;;  %8964 = vst [vmem:[#allocation20_spill] sm:$0xff] %v8574_v36  ;;  %v3113_v11 = vadd.f32 %v6730_v30, %v2323_v25  ;;  %v3036_v22 = vpop.f32.mrf.mxu0 }
 0x190   : > { %v6697_v31 = vpop.f32.mrf.mxu1 }
 0x191   : > { %v2324_v33 = vadd.f32 %v6697_v31, %v8481_v58  ;;  %v3111_v28 = vadd.f32 %v3036_v22, %v2321_v47  ;;  %v6731_v41 = vpop.f32.mrf.mxu0 }
 0x192   : > { %v2249_v37 = vpop.f32.mrf.mxu1 }
 0x193   : > { %v2322_v51 = vadd.f32 %v2249_v37, %v8483_v23  ;;  %v3114_v4 = vadd.f32 %v6731_v41, %v2324_v33  ;;  %v3039_v12 = vpop.f32.mrf.mxu0 }
 0x194   : > { %v8577_v7 = vpop.f32.mrf.mxu1 }
 0x195   : > { %v8583_v58 = vadd.f32 %v3039_v12, %v2322_v51  ;;  %v8587_v0 = vpop.f32.mrf.mxu0 }
 0x196   : > { %v8579_v5 = vpop.f32.mrf.mxu1 }
 0x197   : > { %v8591_v19 = vpop.f32.mrf.mxu0 }
 0x198   : > { %v8581_v32 = vpop.f32.mrf.mxu1 }
 0x199   : > { %v8595_v48 = vpop.f32.mrf.mxu0 }
 0x19a   : > { %v8585_v53 = vpop.f32.mrf.mxu1 }
 0x19b   : > { %v8599_v61 = vpop.f32.mrf.mxu0 }
 0x19c   : > { %v8589_v23 = vpop.f32.mrf.mxu1 }
 0x19d   : > { %v8603_v8 = vpop.f32.mrf.mxu0 }
 0x19e   : > { %v8593_v18 = vpop.f32.mrf.mxu1 }
 0x19f   : > { %v8607_v49 = vpop.f32.mrf.mxu0 }
 0x1a0   : > { %v8597_v13 = vpop.f32.mrf.mxu1 }
 0x1a1   : > { %v8611_v60 = vpop.f32.mrf.mxu0 }
 0x1a2   : > { %v8601_v46 = vpop.f32.mrf.mxu1 }
 0x1a3   : > { %v8615_v25 = vpop.f32.mrf.mxu0 }
 0x1a4   : > { %v8605_v34 = vpop.f32.mrf.mxu1 }
 0x1a5   : > { %v8619_v57 = vpop.f32.mrf.mxu0 }
 0x1a6   : > { %v8609_v27 = vpop.f32.mrf.mxu1 }
 0x1a7   : > { %v8623_v42 = vpop.f32.mrf.mxu0 }
 0x1a8   : > { %v8613_v52 = vpop.f32.mrf.mxu1 }
 0x1a9   : > { %v8627_v33 = vpop.f32.mrf.mxu0 }
 0x1aa   : > { %v8617_v9 = vpop.f32.mrf.mxu1 }
 0x1ab   : > { %v8631_v37 = vpop.f32.mrf.mxu0 }
 0x1ac   : > { %v8621_v47 = vpop.f32.mrf.mxu1 }
 0x1ad   : > { %v8635_v30 = vpop.f32.mrf.mxu0 }
 0x1ae   : > { %v8625_v31 = vpop.f32.mrf.mxu1 }
 0x1af   : > { %v8639_v41 = vpop.f32.mrf.mxu0 }
 0x1b0   : > { %v8629_v21 = vpop.f32.mrf.mxu1 }
 0x1b1   : > { %v8643_v36 = vpop.f32.mrf.mxu0 }
 0x1b2   : > { %v8633_v51 = vpop.f32.mrf.mxu1  ;;  %8967 = vst [vmem:[#allocation23_spill] sm:$0xff] %v8643_v36 }
 0x1b3   : > { %v8647_v2 = vpop.f32.mrf.mxu0 }
 0x1b4   : > { %v8637_v22 = vpop.f32.mrf.mxu1  ;;  %8969 = vst [vmem:[#allocation25_spill] sm:$0xff] %v8647_v2 }
 0x1b5   : > { %8965 = vst [vmem:[#allocation21_spill] sm:$0xff] %v8637_v22  ;;  %v8651_v29 = vpop.f32.mrf.mxu0 }
 0x1b6   : > { %v8641_v12 = vpop.f32.mrf.mxu1  ;;  %8971 = vst [vmem:[#allocation27_spill] sm:$0xff] %v8651_v29 }
 0x1b7   : > { %8966 = vst [vmem:[#allocation22_spill] sm:$0xff] %v8641_v12  ;;  %v8655_v6 = vpop.f32.mrf.mxu0 }
 0x1b8   : > { %v8645_v40 = vpop.f32.mrf.mxu1  ;;  %8973 = vst [vmem:[#allocation29_spill] sm:$0xff] %v8655_v6 }
 0x1b9   : > { %8968 = vst [vmem:[#allocation24_spill] sm:$0xff] %v8645_v40  ;;  %v8659_v50 = vpop.f32.mrf.mxu0 }
 0x1ba   : > { %v8649_v62 = vpop.f32.mrf.mxu1  ;;  %8975 = vst [vmem:[#allocation31_spill] sm:$0xff] %v8659_v50 }
 0x1bb   : > { %8970 = vst [vmem:[#allocation26_spill] sm:$0xff] %v8649_v62  ;;  %v8663_v12 = vpop.f32.mrf.mxu0 }
 0x1bc   : > { %v8653_v14 = vpop.f32.mrf.mxu1  ;;  %8977 = vst [vmem:[#allocation33_spill] sm:$0xff] %v8663_v12 }
 0x1bd   : > { %8972 = vst [vmem:[#allocation28_spill] sm:$0xff] %v8653_v14 }
 0x1be   : > { %v8657_v17 = vpop.f32.mrf.mxu1 }
 0x1bf   : > { %8974 = vst [vmem:[#allocation30_spill] sm:$0xff] %v8657_v17 }
 0x1c0   : > { %v8661_v45 = vpop.f32.mrf.mxu1 }
 0x1c1   : > { %8976 = vst [vmem:[#allocation32_spill] sm:$0xff] %v8661_v45 }
 0x1c2   : > { %v8665_v55 = vpop.f32.mrf.mxu1  ;;  %v8667_v40 = vpop.f32.mrf.mxu0 }
 0x1c3   : > { %8978 = vst [vmem:[#allocation34_spill] sm:$0xff] %v8665_v55  ;;  %8979 = vst [vmem:[#allocation35_spill] sm:$0xff] %v8667_v40 }
 0x1c4   : > { %v8671_v62 = vpop.f32.mrf.mxu0 }
 0x1c5   : > { %8981 = vst [vmem:[#allocation37_spill] sm:$0xff] %v8671_v62 }
 0x1c6   : > { %v8669_v2 = vpop.f32.mrf.mxu1  ;;  %v8675_v14 = vpop.f32.mrf.mxu0 }
 0x1c7   : > { %8980 = vst [vmem:[#allocation36_spill] sm:$0xff] %v8669_v2  ;;  %8983 = vst [vmem:[#allocation39_spill] sm:$0xff] %v8675_v14 }
 0x1c8   : > { %v8673_v29 = vpop.f32.mrf.mxu1  ;;  %v8679_v17 = vpop.f32.mrf.mxu0 }
 0x1c9   : > { %8982 = vst [vmem:[#allocation38_spill] sm:$0xff] %v8673_v29  ;;  %8985 = vst [vmem:[#allocation41_spill] sm:$0xff] %v8679_v17 }
 0x1ca   : > { %v8677_v6 = vpop.f32.mrf.mxu1  ;;  %v8683_v45 = vpop.f32.mrf.mxu0 }
 0x1cb   : > { %8984 = vst [vmem:[#allocation40_spill] sm:$0xff] %v8677_v6  ;;  %8987 = vst [vmem:[#allocation43_spill] sm:$0xff] %v8683_v45  ;;  %v3651_v6 = vadd.f32 %v8577_v7, %v8492_v44  ;;  %v3649_v45 = vadd.f32 %v8579_v5, %v8494_v10  ;;  %v3650_v7 = vadd.f32 %v8585_v53, %v8501_v38 }
 0x1cc   : > { %v8681_v50 = vpop.f32.mrf.mxu1  ;;  %v8685_v55 = vpop.f32.mrf.mxu0  ;;  %v3653_v38 = vadd.f32 %v8593_v18, %v8507_v43 }
 0x1cd   : > { %8986 = vst [vmem:[#allocation42_spill] sm:$0xff] %v8681_v50  ;;  %8988 = vst [vmem:[#allocation44_spill] sm:$0xff] %v8685_v55 }
 0x1ce   : > { %v8687_v2 = vpop.f32.mrf.mxu0  ;;  %v4076_v18 = vadd.f32 %v8607_v49, %v3653_v38 }
 0x1cf   : > { %v6764_v12 = vpop.f32.mrf.mxu1 }
 0x1d0   : > { %v3679_v40 = vadd.f32 %v6764_v12, %v3113_v11  ;;  %v8689_v29 = vpop.f32.mrf.mxu0 }
 0x1d1   : > { %v3602_v36 = vpop.f32.mrf.mxu1 }
 0x1d2   : > { %v3677_v62 = vadd.f32 %v3602_v36, %v3111_v28  ;;  %v6798_v63 = vpop.f32.mrf.mxu0  ;;  %v3652_v36 = vadd.f32 %v8581_v32, %v8498_v15  ;;  %v4074_v28 = vadd.f32 %v8587_v0, %v3651_v6  ;;  %v3655_v15 = vadd.f32 %v8589_v23, %v8504_v35 }
 0x1d3   : > { %v6765_v22 = vpop.f32.mrf.mxu1  ;;  %v8696_v55 = vadd.f32 %v6798_v63, %v3679_v40  ;;  %v3656_v35 = vadd.f32 %v8597_v13, %v8509_v26  ;;  %v3659_v26 = vadd.f32 %v8605_v34, %v8516_v24 }
 0x1d4   : > { %v3680_v14 = vadd.f32 %v6765_v22, %v3114_v4  ;;  %v4025_v12 = vpop.f32.mrf.mxu0  ;;  %v4075_v6 = vadd.f32 %v8595_v48, %v3652_v36  ;;  %v3654_v36 = vadd.f32 %v8601_v46, %v8512_v59  ;;  %v3657_v59 = vadd.f32 %v8609_v27, %v8519_v39 }
 0x1d5   : > { %v3605_v17 = vpop.f32.mrf.mxu1  ;;  %v8701_v4 = vadd.f32 %v4025_v12, %v3677_v62 }
 0x1d6   : > { %v3678_v50 = vadd.f32 %v3605_v17, %v8583_v58  ;;  %v6799_v44 = vpop.f32.mrf.mxu0  ;;  %v4072_v17 = vadd.f32 %v8591_v19, %v3649_v45  ;;  %v4073_v45 = vadd.f32 %v8599_v61, %v3650_v7  ;;  %v4077_v46 = vadd.f32 %v8615_v25, %v3654_v36 }
 0x1d7   : > { %v6804_v11 = vpop.f32.mrf.mxu1  ;;  %v8706_v58 = vadd.f32 %v6799_v44, %v3680_v14 }
 0x1d8   : > { %v4864_v10 = vadd.f32 %v6804_v11, %v4074_v28  ;;  %v4028_v40 = vpop.f32.mrf.mxu0 }
 0x1d9   : > { %v4703_v22 = vpop.f32.mrf.mxu1  ;;  %v8711_v62 = vadd.f32 %v4028_v40, %v3678_v50  ;;  %v4078_v50 = vadd.f32 %v8603_v8, %v3655_v15  ;;  %v4079_v8 = vadd.f32 %v8611_v60, %v3656_v35  ;;  %v3660_v60 = vadd.f32 %v8613_v52, %v8522_v54 }
 0x1da   : > { %v4862_v5 = vadd.f32 %v4703_v22, %v4072_v17 }
 0x1db   : > { %v6805_v63 = vpop.f32.mrf.mxu1 }
 0x1dc   : > { %v4865_v14 = vadd.f32 %v6805_v63, %v4075_v6  ;;  %v4082_v6 = vadd.f32 %v8619_v57, %v3659_v26 }
 0x1dd   : > { %v4706_v32 = vpop.f32.mrf.mxu1 }
 0x1de   : > { %v4863_v23 = vadd.f32 %v4706_v32, %v4073_v45  ;;  %v3658_v45 = vadd.f32 %v8617_v9, %v8525_v56 }
 0x1df   : > { %v6838_v0 = vpop.f32.mrf.mxu0  ;;  %v6808_v19 = vpop.f32.mrf.mxu1 }
 0x1e0   : > { %v5430_v53 = vadd.f32 %v6838_v0, %v4864_v10  ;;  %v4868_v61 = vadd.f32 %v6808_v19, %v4078_v50 }
 0x1e1   : > { %v5269_v11 = vpop.f32.mrf.mxu0  ;;  %v4719_v12 = vpop.f32.mrf.mxu1 }
 0x1e2   : > { %5462 = vst [vmem:[%s7816_s10 + $0x10] sm:$0xff] %v5430_v53  ;;  %v5428_v48 = vadd.f32 %v5269_v11, %v4862_v5  ;;  %v4866_v44 = vadd.f32 %v4719_v12, %v4076_v18  ;;  %v5564_v5 = vmul.f32 %v5430_v53, %v5430_v53  ;;  %v3661_v18 = vadd.f32 %v8625_v31, %v8531_v3 }
 0x1e3   : > { %v6839_v43 = vpop.f32.mrf.mxu0  ;;  %v6809_v22 = vpop.f32.mrf.mxu1 }
 0x1e4   : > { %5460 = vst [vmem:[%s7816_s10] sm:$0xff] %v5428_v48  ;;  %v5431_v28 = vadd.f32 %v6839_v43, %v4865_v14  ;;  %v5562_v49 = vmul.f32 %v5428_v48, %v5428_v48  ;;  %v4869_v15 = vadd.f32 %v6809_v22, %v4079_v8  ;;  %v4080_v14 = vadd.f32 %v8623_v42, %v3657_v59 }
 0x1e5   : > { %v5272_v13 = vpop.f32.mrf.mxu0  ;;  %v4722_v17 = vpop.f32.mrf.mxu1  ;;  %v3664_v8 = vadd.f32 %v8629_v21, %v8534_v20 }
 0x1e6   : > { %5463 = vst [vmem:[%s7816_s10 + $0x18] sm:$0xff] %v5431_v28  ;;  %v5429_v7 = vadd.f32 %v5272_v13, %v4863_v23  ;;  %v4867_v25 = vadd.f32 %v4722_v17, %v4077_v46  ;;  %v5565_v19 = vmul.f32 %v5431_v28, %v5431_v28  ;;  %v4083_v23 = vadd.f32 %v8627_v33, %v3660_v60  ;;  %v8990_v60 = vld [vmem:[#allocation21_spill] sm:$0xff] }
 0x1e7   : > { %v6842_v10 = vpop.f32.mrf.mxu0  ;;  %v6812_v34 = vpop.f32.mrf.mxu1 }
 0x1e8   : > { %5461 = vst [vmem:[%s7816_s10 + $0x8] sm:$0xff] %v5429_v7  ;;  %v5524_v63 = vadd.f32 %v5429_v7, %v5428_v48  ;;  %v5563_v40 = vmul.f32 %v5429_v7, %v5429_v7  ;;  %v5434_v24 = vadd.f32 %v6842_v10, %v4868_v61  ;;  %v4872_v52 = vadd.f32 %v6812_v34, %v4082_v6 }
 0x1e9   : > { %v5285_v32 = vpop.f32.mrf.mxu0  ;;  %v4735_v38 = vpop.f32.mrf.mxu1  ;;  %v4081_v61 = vadd.f32 %v8631_v37, %v3658_v45  ;;  %v4084_v10 = vadd.f32 %v8639_v41, %v3661_v18  ;;  %v8993_v45 = vld [vmem:[#allocation22_spill] sm:$0xff] }
 0x1ea   : > { %v5525_v39 = vadd.f32 %v5524_v63, %v5430_v53  ;;  %v5594_v27 = vadd.f32 %v5563_v40, %v5562_v49  ;;  %5466 = vst [vmem:[%s7816_s10 + $0x30] sm:$0xff] %v5434_v24  ;;  %v5432_v0 = vadd.f32 %v5285_v32, %v4866_v44  ;;  %v3663_v53 = vadd.f32 %v8621_v47, %v8528_v1 }
 0x1eb   : > { %v6843_v11 = vpop.f32.mrf.mxu0  ;;  %v6813_v50 = vpop.f32.mrf.mxu1  ;;  %v4870_v48 = vadd.f32 %v4735_v38, %v4080_v14  ;;  %v5568_v7 = vmul.f32 %v5434_v24, %v5434_v24  ;;  %v3662_v49 = vadd.f32 %v8633_v51, %v8537_v16  ;;  %v8992_v38 = vld [vmem:[#allocation10_spill] sm:$0xff] }
 0x1ec   : > { %v5595_v35 = vadd.f32 %v5594_v27, %v5564_v5  ;;  %5464 = vst [vmem:[%s7816_s10 + $0x20] sm:$0xff] %v5432_v0  ;;  %v5526_v54 = vadd.f32 %v5525_v39, %v5431_v28  ;;  %v5435_v57 = vadd.f32 %v6843_v11, %v4869_v15  ;;  %v5566_v9 = vmul.f32 %v5432_v0, %v5432_v0  ;;  %v8991_v5 = vld [vmem:[#allocation23_spill] sm:$0xff] }
 0x1ed   : > { %v5288_v12 = vpop.f32.mrf.mxu0  ;;  %v4738_v43 = vpop.f32.mrf.mxu1  ;;  %v4873_v28 = vadd.f32 %v6813_v50, %v4083_v23  ;;  %v4086_v44 = vadd.f32 %v8635_v30, %v3663_v53  ;;  %v4087_v32 = vadd.f32 %v8991_v5, %v3664_v8  ;;  %v3665_v14 = vadd.f32 %v8993_v45, %v8992_v38  ;;  %v9000_v8 = vld [vmem:[#allocation29_spill] sm:$0xff]  ;;  %v9004_v5 = vld [vmem:[#allocation14_spill] sm:$0xff]  ;;  %v9007_v45 = vld [vmem:[#allocation15_spill] sm:$0xff] }
 0x1ee   : > { %v5527_v56 = vadd.f32 %v5526_v54, %v5432_v0  ;;  %v5596_v42 = vadd.f32 %v5595_v35, %v5565_v19  ;;  %5467 = vst [vmem:[%s7816_s10 + $0x38] sm:$0xff] %v5435_v57  ;;  %v5433_v36 = vadd.f32 %v5288_v12, %v4867_v25  ;;  %v4871_v37 = vadd.f32 %v4738_v43, %v4081_v61  ;;  %v8994_v19 = vld [vmem:[#allocation25_spill] sm:$0xff]  ;;  %v8996_v12 = vld [vmem:[#allocation24_spill] sm:$0xff] }
 0x1ef   : > { %v6846_v22 = vpop.f32.mrf.mxu0  ;;  %v6816_v13 = vpop.f32.mrf.mxu1  ;;  %v5569_v63 = vmul.f32 %v5435_v57, %v5435_v57  ;;  %v4085_v11 = vadd.f32 %v8994_v19, %v3662_v49  ;;  %v9002_v49 = vld [vmem:[#allocation28_spill] sm:$0xff] }
 0x1f0   : > { %v5597_v26 = vadd.f32 %v5596_v42, %v5566_v9  ;;  %5465 = vst [vmem:[%s7816_s10 + $0x28] sm:$0xff] %v5433_v36  ;;  %v5528_v1 = vadd.f32 %v5527_v56, %v5433_v36  ;;  %v5567_v47 = vmul.f32 %v5433_v36, %v5433_v36  ;;  %v5438_v33 = vadd.f32 %v6846_v22, %v4872_v52  ;;  %v8997_v9 = vld [vmem:[#allocation27_spill] sm:$0xff] }
 0x1f1   : > { %v5301_v17 = vpop.f32.mrf.mxu0  ;;  %v4751_v46 = vpop.f32.mrf.mxu1  ;;  %v4876_v21 = vadd.f32 %v6816_v13, %v4086_v44  ;;  %v4088_v44 = vadd.f32 %v9000_v8, %v3665_v14  ;;  %v9008_v14 = vld [vmem:[#allocation32_spill] sm:$0xff] }
 0x1f2   : > { %v5529_v3 = vadd.f32 %v5528_v1, %v5434_v24  ;;  %v5598_v31 = vadd.f32 %v5597_v26, %v5567_v47  ;;  %5470 = vst [vmem:[%s7816_s10 + $0x50] sm:$0xff] %v5438_v33  ;;  %v5436_v59 = vadd.f32 %v5301_v17, %v4870_v48  ;;  %v8989_v24 = vld [vmem:[#allocation9_spill] sm:$0xff]  ;;  %v4874_v39 = vadd.f32 %v4751_v46, %v4084_v10  ;;  %v8995_v48 = vld [vmem:[#allocation11_spill] sm:$0xff]  ;;  %v8998_v1 = vld [vmem:[#allocation12_spill] sm:$0xff] }
 0x1f3   : > { %v6847_v40 = vpop.f32.mrf.mxu0  ;;  %v6817_v34 = vpop.f32.mrf.mxu1  ;;  %v3667_v6 = vadd.f32 %v8990_v60, %v8989_v24  ;;  %v3668_v56 = vadd.f32 %v8996_v12, %v8995_v48  ;;  %v5572_v36 = vmul.f32 %v5438_v33, %v5438_v33  ;;  %v8999_v47 = vld [vmem:[#allocation26_spill] sm:$0xff]  ;;  %v3672_v19 = vadd.f32 %v9008_v14, %v9007_v45 }
 0x1f4   : > { %v5599_v15 = vadd.f32 %v5598_v31, %v5568_v7  ;;  %5468 = vst [vmem:[%s7816_s10 + $0x40] sm:$0xff] %v5436_v59  ;;  %v5530_v20 = vadd.f32 %v5529_v3, %v5435_v57  ;;  %v5439_v30 = vadd.f32 %v6847_v40, %v4873_v28  ;;  %v5570_v51 = vmul.f32 %v5436_v59, %v5436_v59 }
 0x1f5   : > { %v5304_v27 = vpop.f32.mrf.mxu0  ;;  %v4754_v0 = vpop.f32.mrf.mxu1  ;;  %v4877_v35 = vadd.f32 %v6817_v34, %v4087_v32  ;;  %v4090_v42 = vadd.f32 %v8997_v9, %v3667_v6  ;;  %v3666_v13 = vadd.f32 %v8999_v47, %v8998_v1  ;;  %v9005_v32 = vld [vmem:[#allocation30_spill] sm:$0xff] }
 0x1f6   : > { %v5531_v16 = vadd.f32 %v5530_v20, %v5436_v59  ;;  %v5600_v41 = vadd.f32 %v5599_v15, %v5569_v63  ;;  %5471 = vst [vmem:[%s7816_s10 + $0x58] sm:$0xff] %v5439_v30  ;;  %v5437_v25 = vadd.f32 %v5304_v27, %v4871_v37  ;;  %v4875_v28 = vadd.f32 %v4754_v0, %v4085_v11  ;;  %v9003_v63 = vld [vmem:[#allocation31_spill] sm:$0xff]  ;;  %v9011_v9 = vld [vmem:[#allocation34_spill] sm:$0xff] }
 0x1f7   : > { %v6850_v54 = vpop.f32.mrf.mxu0  ;;  %v6820_v23 = vpop.f32.mrf.mxu1  ;;  %v5573_v7 = vmul.f32 %v5439_v30, %v5439_v30  ;;  %v4091_v40 = vadd.f32 %v9003_v63, %v3668_v56  ;;  %v9009_v11 = vld [vmem:[#allocation35_spill] sm:$0xff]  ;;  %v9010_v56 = vld [vmem:[#allocation16_spill] sm:$0xff] }
 0x1f8   : > { %v5601_v52 = vadd.f32 %v5600_v41, %v5570_v51  ;;  %5469 = vst [vmem:[%s7816_s10 + $0x48] sm:$0xff] %v5437_v25  ;;  %v5532_v57 = vadd.f32 %v5531_v16, %v5437_v25  ;;  %v5571_v50 = vmul.f32 %v5437_v25, %v5437_v25  ;;  %v5442_v53 = vadd.f32 %v6850_v54, %v4876_v21 }
 0x1f9   : > { %v5317_v43 = vpop.f32.mrf.mxu0  ;;  %v4767_v26 = vpop.f32.mrf.mxu1  ;;  %v4880_v37 = vadd.f32 %v6820_v23, %v4090_v42  ;;  %v3670_v42 = vadd.f32 %v9011_v9, %v9010_v56  ;;  %v9023_v56 = vld [vmem:[#allocation42_spill] sm:$0xff] }
 0x1fa   : > { %v5533_v18 = vadd.f32 %v5532_v57, %v5438_v33  ;;  %v5602_v61 = vadd.f32 %v5601_v52, %v5571_v50  ;;  %5474 = vst [vmem:[%s7816_s10 + $0x70] sm:$0xff] %v5442_v53  ;;  %v5440_v22 = vadd.f32 %v5317_v43, %v4874_v39  ;;  %v9001_v33 = vld [vmem:[#allocation13_spill] sm:$0xff]  ;;  %v4878_v15 = vadd.f32 %v4767_v26, %v4088_v44 }
 0x1fb   : > { %v6851_v17 = vpop.f32.mrf.mxu0  ;;  %v6821_v46 = vpop.f32.mrf.mxu1  ;;  %v3671_v10 = vadd.f32 %v9002_v49, %v9001_v33  ;;  %v9006_v39 = vld [vmem:[#allocation33_spill] sm:$0xff]  ;;  %v5576_v54 = vmul.f32 %v5442_v53, %v5442_v53 }
 0x1fc   : > { %v5603_v3 = vadd.f32 %v5602_v61, %v5572_v36  ;;  %5472 = vst [vmem:[%s7816_s10 + $0x60] sm:$0xff] %v5440_v22  ;;  %v5534_v31 = vadd.f32 %v5533_v18, %v5439_v30  ;;  %v5443_v59 = vadd.f32 %v6851_v17, %v4877_v35  ;;  %v5574_v34 = vmul.f32 %v5440_v22, %v5440_v22  ;;  %v9012_v36 = vld [vmem:[#allocation37_spill] sm:$0xff] }
 0x1fd   : > { %v5320_v20 = vpop.f32.mrf.mxu0  ;;  %v4770_v6 = vpop.f32.mrf.mxu1  ;;  %v3669_v30 = vadd.f32 %v9005_v32, %v9004_v5  ;;  %v4089_v27 = vadd.f32 %v9006_v39, %v3666_v13  ;;  %v4881_v16 = vadd.f32 %v6821_v46, %v4091_v40  ;;  %v4094_v35 = vadd.f32 %v9009_v11, %v3671_v10  ;;  %v9014_v46 = vld [vmem:[#allocation41_spill] sm:$0xff]  ;;  %v9020_v11 = vld [vmem:[#allocation40_spill] sm:$0xff] }
 0x1fe   : > { %v5535_v21 = vadd.f32 %v5534_v31, %v5440_v22  ;;  %v5604_v24 = vadd.f32 %v5603_v3, %v5573_v7  ;;  %5475 = vst [vmem:[%s7816_s10 + $0x78] sm:$0xff] %v5443_v59  ;;  %v5441_v60 = vadd.f32 %v5320_v20, %v4875_v28  ;;  %v5577_v18 = vmul.f32 %v5443_v59, %v5443_v59 }
 0x1ff   : > { %v6854_v51 = vpop.f32.mrf.mxu0  ;;  %v6824_v57 = vpop.f32.mrf.mxu1  ;;  %v4879_v48 = vadd.f32 %v4770_v6, %v4089_v27  ;;  %v4092_v43 = vadd.f32 %v9012_v36, %v3669_v30  ;;  %v4093_v33 = vadd.f32 %v9014_v46, %v3670_v42  ;;  %v9017_v27 = vld [vmem:[#allocation18_spill] sm:$0xff]  ;;  %v9024_v42 = vld [vmem:[#allocation44_spill] sm:$0xff] }
 0x200   : > { %v5605_v41 = vadd.f32 %v5604_v24, %v5574_v34  ;;  %5473 = vst [vmem:[%s7816_s10 + $0x68] sm:$0xff] %v5441_v60  ;;  %v5536_v25 = vadd.f32 %v5535_v21, %v5441_v60  ;;  %v5575_v0 = vmul.f32 %v5441_v60, %v5441_v60  ;;  %v5446_v38 = vadd.f32 %v6854_v51, %v4880_v37  ;;  %v9015_v21 = vld [vmem:[#allocation17_spill] sm:$0xff]  ;;  %v9016_v34 = vld [vmem:[#allocation36_spill] sm:$0xff] }
 0x201   : > { %v5333_v52 = vpop.f32.mrf.mxu0  ;;  %v4783_v28 = vpop.f32.mrf.mxu1  ;;  %v4884_v1 = vadd.f32 %v6824_v57, %v4094_v35  ;;  %v3675_v24 = vadd.f32 %v9016_v34, %v9015_v21 }
 0x202   : > { %v5537_v50 = vadd.f32 %v5536_v25, %v5442_v53  ;;  %v5606_v23 = vadd.f32 %v5605_v41, %v5575_v0  ;;  %5478 = vst [vmem:[%s7816_s10 + $0x90] sm:$0xff] %v5446_v38  ;;  %v5444_v12 = vadd.f32 %v5333_v52, %v4878_v15  ;;  %v9013_v53 = vld [vmem:[#allocation39_spill] sm:$0xff]  ;;  %v4882_v31 = vadd.f32 %v4783_v28, %v4092_v43 }
 0x203   : > { %v6855_v61 = vpop.f32.mrf.mxu0  ;;  %v4095_v13 = vadd.f32 %v9013_v53, %v3672_v19  ;;  %v6825_v7 = vpop.f32.mrf.mxu1  ;;  %v5580_v60 = vmul.f32 %v5446_v38, %v5446_v38  ;;  %v9019_v19 = vld [vmem:[#allocation19_spill] sm:$0xff] }
 0x204   : > { %v5607_v22 = vadd.f32 %v5606_v23, %v5576_v54  ;;  %5476 = vst [vmem:[%s7816_s10 + $0x80] sm:$0xff] %v5444_v12  ;;  %v5538_v26 = vadd.f32 %v5537_v50, %v5443_v59  ;;  %v5447_v47 = vadd.f32 %v6855_v61, %v4881_v16  ;;  %v5578_v8 = vmul.f32 %v5444_v12, %v5444_v12  ;;  %v9018_v16 = vld [vmem:[#allocation38_spill] sm:$0xff]  ;;  %v9021_v54 = vld [vmem:[#allocation43_spill] sm:$0xff] }
 0x205   : > { %v5336_v44 = vpop.f32.mrf.mxu0  ;;  %v4885_v49 = vadd.f32 %v6825_v7, %v4095_v13  ;;  %v4786_v63 = vpop.f32.mrf.mxu1  ;;  %v3673_v51 = vadd.f32 %v9018_v16, %v9017_v27  ;;  %v3676_v35 = vadd.f32 %v9020_v11, %v9019_v19  ;;  %v4098_v52 = vadd.f32 %v9021_v54, %v3675_v24 }
 0x206   : > { %v5539_v17 = vadd.f32 %v5538_v26, %v5444_v12  ;;  %v5608_v3 = vadd.f32 %v5607_v22, %v5577_v18  ;;  %5479 = vst [vmem:[%s7816_s10 + $0x98] sm:$0xff] %v5447_v47  ;;  %v5445_v37 = vadd.f32 %v5336_v44, %v4879_v48  ;;  %v4883_v32 = vadd.f32 %v4786_v63, %v4093_v33  ;;  %v9022_v12 = vld [vmem:[#allocation20_spill] sm:$0xff] }
 0x207   : > { %v6858_v10 = vpop.f32.mrf.mxu0  ;;  %v5581_v45 = vmul.f32 %v5447_v47, %v5447_v47  ;;  %v3674_v9 = vadd.f32 %v9023_v56, %v9022_v12  ;;  %v4096_v36 = vadd.f32 %v9024_v42, %v3673_v51  ;;  %v4099_v26 = vadd.f32 %v8687_v2, %v3676_v35 }
 0x208   : > { %v5609_v59 = vadd.f32 %v5608_v3, %v5578_v8  ;;  %5477 = vst [vmem:[%s7816_s10 + $0x88] sm:$0xff] %v5445_v37  ;;  %v5540_v40 = vadd.f32 %v5539_v17, %v5445_v37  ;;  %v5579_v15 = vmul.f32 %v5445_v37, %v5445_v37  ;;  %v5450_v20 = vadd.f32 %v6858_v10, %v4884_v1 }
 0x209   : > { %v5349_v6 = vpop.f32.mrf.mxu0  ;;  %v4097_v7 = vadd.f32 %v8689_v29, %v3674_v9 }
 0x20a   : > { %v5610_v5 = vadd.f32 %v5609_v59, %v5579_v15  ;;  %5482 = vst [vmem:[%s7816_s10 + $0xb0] sm:$0xff] %v5450_v20  ;;  %v5448_v30 = vadd.f32 %v5349_v6, %v4882_v31  ;;  %v5541_v39 = vadd.f32 %v5540_v40, %v5446_v38  ;;  %v5584_v8 = vmul.f32 %v5450_v20, %v5450_v20 }
 0x20b   : > { %v6859_v41 = vpop.f32.mrf.mxu0 }
 0x20c   : > { %5480 = vst [vmem:[%s7816_s10 + $0xa0] sm:$0xff] %v5448_v30  ;;  %v5451_v25 = vadd.f32 %v6859_v41, %v4885_v49  ;;  %v5542_v0 = vadd.f32 %v5541_v39, %v5447_v47  ;;  %v5611_v14 = vadd.f32 %v5610_v5, %v5580_v60  ;;  %v5582_v38 = vmul.f32 %v5448_v30, %v5448_v30 }
 0x20d   : > { %v5352_v57 = vpop.f32.mrf.mxu0 }
 0x20e   : > { %5483 = vst [vmem:[%s7816_s10 + $0xb8] sm:$0xff] %v5451_v25  ;;  %v5449_v50 = vadd.f32 %v5352_v57, %v4883_v32  ;;  %v5543_v23 = vadd.f32 %v5542_v0, %v5448_v30  ;;  %v5612_v48 = vadd.f32 %v5611_v14, %v5581_v45  ;;  %v6828_v43 = vpop.f32.mrf.mxu1  ;;  %v5585_v33 = vmul.f32 %v5451_v25, %v5451_v25 }
 0x20f   : > { %v4888_v18 = vadd.f32 %v6828_v43, %v4098_v52 }
 0x210   : > { %5481 = vst [vmem:[%s7816_s10 + $0xa8] sm:$0xff] %v5449_v50  ;;  %v5544_v61 = vadd.f32 %v5543_v23, %v5449_v50  ;;  %v5583_v28 = vmul.f32 %v5449_v50, %v5449_v50  ;;  %v5613_v22 = vadd.f32 %v5612_v48, %v5582_v38  ;;  %v4799_v1 = vpop.f32.mrf.mxu1 }
 0x211   : > { %v4886_v47 = vadd.f32 %v4799_v1, %v4096_v36  ;;  %v6862_v53 = vpop.f32.mrf.mxu0 }
 0x212   : > { %v5545_v13 = vadd.f32 %v5544_v61, %v5450_v20  ;;  %v5614_v44 = vadd.f32 %v5613_v22, %v5583_v28  ;;  %v6829_v17 = vpop.f32.mrf.mxu1  ;;  %v5454_v3 = vadd.f32 %v6862_v53, %v4888_v18 }
 0x213   : > { %v4889_v31 = vadd.f32 %v6829_v17, %v4099_v26  ;;  %v5365_v37 = vpop.f32.mrf.mxu0 }
 0x214   : > { %v5546_v46 = vadd.f32 %v5545_v13, %v5451_v25  ;;  %v5615_v49 = vadd.f32 %v5614_v44, %v5584_v8  ;;  %5486 = vst [vmem:[%s7816_s10 + $0xd0] sm:$0xff] %v5454_v3  ;;  %v4802_v2 = vpop.f32.mrf.mxu1  ;;  %v5452_v10 = vadd.f32 %v5365_v37, %v4886_v47  ;;  %v5588_v30 = vmul.f32 %v5454_v3, %v5454_v3 }
 0x215   : > { %v4887_v63 = vadd.f32 %v4802_v2, %v4097_v7  ;;  %v6863_v59 = vpop.f32.mrf.mxu0 }
 0x216   : > { %v5616_v40 = vadd.f32 %v5615_v49, %v5585_v33  ;;  %5484 = vst [vmem:[%s7816_s10 + $0xc0] sm:$0xff] %v5452_v10  ;;  %v5455_v15 = vadd.f32 %v6863_v59, %v4889_v31  ;;  %v5547_v20 = vadd.f32 %v5546_v46, %v5452_v10  ;;  %v5586_v21 = vmul.f32 %v5452_v10, %v5452_v10 }
 0x217   : > { %v5368_v29 = vpop.f32.mrf.mxu0 }
 0x218   : > { %5487 = vst [vmem:[%s7816_s10 + $0xd8] sm:$0xff] %v5455_v15  ;;  %v5453_v34 = vadd.f32 %v5368_v29, %v4887_v63  ;;  %v5617_v24 = vadd.f32 %v5616_v40, %v5586_v21  ;;  %v5589_v41 = vmul.f32 %v5455_v15, %v5455_v15 }
 0x21a   : > { %5485 = vst [vmem:[%s7816_s10 + $0xc8] sm:$0xff] %v5453_v34  ;;  %v5548_v60 = vadd.f32 %v5547_v20, %v5453_v34  ;;  %v5587_v6 = vmul.f32 %v5453_v34, %v5453_v34 }
 0x21c   : > { %v6832_v5 = vpop.f32.mrf.mxu1  ;;  %v5549_v32 = vadd.f32 %v5548_v60, %v5454_v3  ;;  %v5618_v39 = vadd.f32 %v5617_v24, %v5587_v6 }
 0x21d   : > { %v4892_v27 = vadd.f32 %v6832_v5, %v8696_v55 }
 0x21e   : > { %v4815_v16 = vpop.f32.mrf.mxu1  ;;  %v5550_v51 = vadd.f32 %v5549_v32, %v5455_v15  ;;  %v5619_v25 = vadd.f32 %v5618_v39, %v5588_v30 }
 0x21f   : > { %v4890_v0 = vadd.f32 %v4815_v16, %v8701_v4  ;;  %v6866_v45 = vpop.f32.mrf.mxu0 }
 0x220   : > { %v6833_v14 = vpop.f32.mrf.mxu1  ;;  %v5458_v19 = vadd.f32 %v6866_v45, %v4892_v27  ;;  %v5620_v11 = vadd.f32 %v5619_v25, %v5589_v41 }
 0x221   : > { %v4893_v35 = vadd.f32 %v6833_v14, %v8706_v58  ;;  %v5381_v54 = vpop.f32.mrf.mxu0 }
 0x222   : > { %5490 = vst [vmem:[%s7816_s10 + $0xf0] sm:$0xff] %v5458_v19  ;;  %v4818_v52 = vpop.f32.mrf.mxu1  ;;  %v5456_v55 = vadd.f32 %v5381_v54, %v4890_v0 }
 0x223   : > { %v4891_v57 = vadd.f32 %v4818_v52, %v8711_v62  ;;  %v6867_v50 = vpop.f32.mrf.mxu0 }
 0x224   : > { %5488 = vst [vmem:[%s7816_s10 + $0xe0] sm:$0xff] %v5456_v55  ;;  %v5459_v4 = vadd.f32 %v6867_v50, %v4893_v35  ;;  %v5551_v23 = vadd.f32 %v5550_v51, %v5456_v55  ;;  %v5590_v38 = vmul.f32 %v5456_v55, %v5456_v55 }
 0x225   : > { %v5384_v48 = vpop.f32.mrf.mxu0 }
 0x226   : > { %5491 = vst [vmem:[%s7816_s10 + $0xf8] sm:$0xff] %v5459_v4  ;;  %v5457_v58 = vadd.f32 %v5384_v48, %v4891_v57  ;;  %v5621_v62 = vadd.f32 %v5620_v11, %v5590_v38 }
 0x228   : > { %5489 = vst [vmem:[%s7816_s10 + $0xe8] sm:$0xff] %v5457_v58  ;;  %v5552_v12 = vadd.f32 %v5551_v23, %v5457_v58  ;;  %v5591_v56 = vmul.f32 %v5457_v58, %v5457_v58 }
 0x229   : > { %6993 = shalt.err (!%p6990_p3)
}
 0x22a   : > { %s6994_s5 = scalar_lea.hbm %s8823_s22, 4096  ;;  %s6998_s9 = scalar_lea.hbm %s8939_s2, 8192 }
 0x22b   : > { %p6995_p4 = scmp.ne.s32.totalorder %s8823_s22, %s6994_s5  ;;  %p6999_p9 = scmp.lt.s32.totalorder %s8823_s22, %s8939_s2 }
 0x22c   : > { %p7000_p10 = scmp.lt.s32.totalorder %s6998_s9, %s6994_s5 }
 0x22d   : > { %p6996_p7 = pnand %p6995_p4, %p7168_p5 }
 0x22e   : > { %p7001_p11 = por %p7000_p10, %p6999_p9 }
 0x22f   : > { %p6997_p8 = pneg %p6996_p7 }
 0x231   : > { %p7002_p12 = pnand %p7001_p11, %p6997_p8 }
 0x233   : > { %7005 = shalt.err (!%p7002_p12)
}
 0x234   : > { %s7099_s13 = smov 128   ;;  %s7100_s14 = smov 8   ;;  %v5553_v9 = vadd.f32 %v5552_v12, %v5458_v19  ;;  %v5592_v42 = vmul.f32 %v5458_v19, %v5458_v19  ;;  %v5622_v36 = vadd.f32 %v5621_v62, %v5591_v56  ;;  %v5593_v18 = vmul.f32 %v5459_v4, %v5459_v4 }
 0x235   : > { %6881 = dma.vmem_to_hbm [thread:$0]  (%p7168_p5), %s8825_s12, 4096, %s8823_s22, %s5633_s23, %s7099_s13, %s7099_s13, %s7100_s14  }
 0x236   : > { %v5554_v43 = vadd.f32 %v5553_v9, %v5459_v4  ;;  %v5623_v61 = vadd.f32 %v5622_v36, %v5592_v42  ;;  %s5637_s27 = sand.u32 1, %s7149_s19   ;;  %s6404_s12 = sshll.u32 %s7149_s19, 4 }
 0x237   : > { %s200_s22 = scalar_lea.vmem [#allocation4], %s7743_s8  ;;  %s206_s28 = scalar_lea.vmem [#allocation6], %s7743_s8 }
 0x238   : > { %v5555_v28 = vrot.slane %v5554_v43, 4  ;;  %v5624_v22 = vadd.f32 %v5623_v61, %v5593_v18  ;;  %s5670_s23 = sshll.u32 %s200_s22, 4  ;;  %s5683_s29 = sshll.u32 %s206_s28, 4  ;;  %s8863_s23 = int_to_ptr.vmem [resolvable:$true] %s5670_s23  ;;  %s8870_s29 = int_to_ptr.vmem [resolvable:$true] %s5683_s29 }
 0x239   : > { %s8861_s6 = scalar_lea.hbm %s8940_s3, %s6404_s12  ;;  %s8868_s9 = scalar_lea.hbm %s8941_s4, %s6404_s12 }
 0x23a   : > { %v5556_v26 = vadd.f32 %v5555_v28, %v5554_v43  ;;  %v5625_v1 = vrot.slane %v5624_v22, 4  ;;  %s8872_s10 = scalar_lea.sflag [#allocation5], %s5637_s27  ;;  %s7006_s11 = scalar_lea.vmem %s8863_s23, 16 }
 0x23b   : > { %p7007_p13 = scmp.ne.s32.totalorder %s8863_s23, %s7006_s11  ;;  %s7101_s13 = smov [#allocation4]  }
 0x23c   : > { %v5557_v47 = vrot.slane %v5556_v26, 2  ;;  %v5626_v53 = vadd.f32 %v5625_v1, %v5624_v22  ;;  %s7010_s14 = sshll.u32 %s7101_s13, 4  ;;  %s7011_s14 = int_to_ptr.vmem [resolvable:$false] %s7010_s14 }
 0x23d   : > { %p7008_p0 = pnand %p7007_p13, %p7168_p5  ;;  %s7012_s30 = scalar_lea.vmem %s7011_s14, 32 }
 0x23e   : > { %v5558_v13 = vadd.f32 %v5557_v47, %v5556_v26  ;;  %v5627_v8 = vrot.slane %v5626_v53, 2  ;;  %p7013_p2 = scmp.lt.s32.totalorder %s8863_s23, %s7011_s14  ;;  %p7014_p3 = scmp.lt.s32.totalorder %s7012_s30, %s7006_s11 }
 0x23f   : > { %p7009_p1 = pneg %p7008_p0 }
 0x240   : > { %v5559_v44 = vrot.slane %v5558_v13, 1  ;;  %v5628_v7 = vadd.f32 %v5627_v8, %v5626_v53  ;;  %p7015_p4 = por %p7014_p3, %p7013_p2 }
 0x242   : > { %v5560_v17 = vadd.f32 %v5559_v44, %v5558_v13  ;;  %v5629_v3 = vrot.slane %v5628_v7, 1  ;;  %p7016_p7 = pnand %p7015_p4, %p7009_p1 }
 0x244   : > { %5561 = vst [vmem:[%s200_s22] sm:$0x1] %v5560_v17  ;;  %v5630_v31 = vadd.f32 %v5629_v3, %v5628_v7 }
 0x245   : > { %7019 = shalt.err (!%p7016_p7)
}
 0x246   : > { %s7020_s27 = scalar_lea.hbm %s8861_s6, 16  ;;  %s7024_s5 = scalar_lea.hbm %s8940_s3, 32 }
 0x247   : > { %p7021_p8 = scmp.ne.s32.totalorder %s8861_s6, %s7020_s27  ;;  %p7025_p11 = scmp.lt.s32.totalorder %s8861_s6, %s8940_s3 }
 0x248   : > { %p7026_p12 = scmp.lt.s32.totalorder %s7024_s5, %s7020_s27 }
 0x249   : > { %p7022_p9 = pnand %p7021_p8, %p7168_p5 }
 0x24a   : > { %p7027_p13 = por %p7026_p12, %p7025_p11 }
 0x24b   : > { %p7023_p10 = pneg %p7022_p9 }
 0x24d   : > { %p7028_p0 = pnand %p7027_p13, %p7023_p10 }
 0x24f   : > { %7031 = shalt.err (!%p7028_p0)
}
 0x250   : > { %6882 = dma.vmem_to_hbm [thread:$0]  (%p7168_p5), %s8863_s23, 16, %s8861_s6, %s8872_s10   ;;  %5631 = vst [vmem:[%s206_s28] sm:$0x1] %v5630_v31 }
 0x251   : > { %s7032_s11 = scalar_lea.vmem %s8870_s29, 16  ;;  %s7102_s13 = smov [#allocation6]  }
 0x252   : > { %p7033_p1 = scmp.ne.s32.totalorder %s8870_s29, %s7032_s11  ;;  %s7036_s14 = sshll.u32 %s7102_s13, 4  ;;  %s7037_s14 = int_to_ptr.vmem [resolvable:$false] %s7036_s14 }
 0x253   : > { %s7038_s30 = scalar_lea.vmem %s7037_s14, 32  ;;  %p7039_p4 = scmp.lt.s32.totalorder %s8870_s29, %s7037_s14 }
 0x254   : > { %p7034_p2 = pnand %p7033_p1, %p7168_p5  ;;  %p7040_p7 = scmp.lt.s32.totalorder %s7038_s30, %s7032_s11 }
 0x256   : > { %p7035_p3 = pneg %p7034_p2  ;;  %p7041_p8 = por %p7040_p7, %p7039_p4 }
 0x258   : > { %p7042_p9 = pnand %p7041_p8, %p7035_p3 }
 0x25a   : > { %7045 = shalt.err (!%p7042_p9)
}
 0x25b   : > { %s7046_s8 = scalar_lea.hbm %s8868_s9, 16  ;;  %s7050_s6 = scalar_lea.hbm %s8941_s4, 32 }
 0x25c   : > { %p7047_p10 = scmp.ne.s32.totalorder %s8868_s9, %s7046_s8  ;;  %p7051_p13 = scmp.lt.s32.totalorder %s8868_s9, %s8941_s4 }
 0x25d   : > { %p7052_p0 = scmp.lt.s32.totalorder %s7050_s6, %s7046_s8 }
 0x25e   : > { %p7048_p11 = pnand %p7047_p10, %p7168_p5 }
 0x25f   : > { %p7053_p1 = por %p7052_p0, %p7051_p13 }
 0x260   : > { %p7049_p12 = pneg %p7048_p11 }
 0x262   : > { %p7054_p2 = pnand %p7053_p1, %p7049_p12 }
 0x264   : > { %7057 = shalt.err (!%p7054_p2)
}
 0x265   : > { %6883 = dma.vmem_to_hbm [thread:$0]  (%p7168_p5), %s8870_s29, 16, %s8868_s9, %s8872_s10  }
 0x266 PF: > { %p6897_p3 = scmp.ge.s32.totalorder %s7096_s18, 2  ;;  %s5695_s22 = sand.u32 1, %s7084_s15  }
 0x267   : > { %s5696_s5 = scalar_lea.sflag [#allocation3], %s5695_s22 }
 0x268   : > { %p6888_p4 = pnand %p6897_p3, %p7172_p6 }
 0x26a   : > { %p6889_p7 = pneg %p6888_p4 }
 0x26c   : > { %7075 = dma.done.wait (%p6889_p7), %s5696_s5, 4096  }
 0x26d   : > { %7077 = vsyncadd (%p6889_p7), %s5696_s5, 4294963200  ;;  %s5704_s19 = sand.u32 1, %s5795_s20  }
 0x26e   : > { %s5705_s25 = scalar_lea.sflag [#allocation5], %s5704_s19 }
 0x26f   : > { %7079 = dma.done.wait (%p6889_p7), %s5705_s25, 32  }
 0x270   : > { %7081 = vsyncadd (%p6889_p7), %s5705_s25, 4294967264  ;;  %p18_p5 = scmp.ge.s32.totalorder %s7153_s21, 4   ;;  %s9025_s15 = smov %s7088_s16 }
 0x271   : > { %s9026_s16 = smov %s7092_s17  ;;  %s9027_s17 = smov %s7166_s24 }
 0x272   : > { %s9028_s18 = smov %s7153_s21  ;;  %20 = sbr.rel (!%p18_p5) target bundleno = 5 (0x5), region = 105 }
 0x277   :  { %5717 = vsyncpa [#allocation3], 1 }
 0x278   :  { %5719 = vsyncpa [#allocation3 + $0x1], 1 }
 0x279   :  { %5720 = vsyncpa [#allocation5], 1 }
 0x27a   :  { %5722 = vsyncpa [#allocation5 + $0x1], 1 }

</bundles_post_ra>
